<compile_context>
chip_gen: v6e
topology: v6e:2x2x1
jax: 0.10.0
libtpu: 0.0.40
codegen_flags: <defaults>
</compile_context>

<pallas_src>
import functools

import jax
import jax.numpy as jnp
from jax.experimental import pallas as pl
from jax.experimental.pallas import tpu as pltpu


def _aspp_conv_kernel(xp_ref, w_ref, shift_ref, o_ref, acc_ref, *, H, W, rate):
    # xp_ref:    (1, H+2r, W+2r, tile_cin)  padded NHWC activation tile (bf16)
    # w_ref:     (9, tile_cin, tile_cout)   BN-scale-folded taps (bf16)
    # shift_ref: (1, tile_cout)             beta - mean * scale (f32)
    # o_ref:     (1, H*W, tile_cout)        lane-dense output tile (f32)
    # acc_ref:   (H*W, tile_cout)           f32 VMEM accumulator (resident over ci)
    ci = pl.program_id(2)
    tile_cin = xp_ref.shape[-1]
    tile_cout = w_ref.shape[-1]
    HW = H * W

    @pl.when(ci == 0)
    def _():
        acc_ref[...] = jnp.zeros_like(acc_ref)

    # 9 static taps of the dilated 3x3 stencil -> 9 bf16 MXU matmuls, f32 acc.
    for kh in range(3):
        for kw in range(3):
            patch = xp_ref[0,
                           kh * rate: kh * rate + H,
                           kw * rate: kw * rate + W,
                           :]                               # (H, W, tile_cin) bf16
            patch = patch.reshape(HW, tile_cin)
            acc_ref[...] += jnp.dot(patch, w_ref[kh * 3 + kw],
                                    preferred_element_type=jnp.float32)

    @pl.when(ci == pl.num_programs(2) - 1)
    def _():
        y = acc_ref[...] + shift_ref[...]                   # folded-BN shift
        o_ref[...] = jnp.maximum(y, 0.0).reshape(1, HW, tile_cout).astype(o_ref.dtype)


def aspp_conv(x_nchw, weight_oihw, gamma, beta, running_mean, running_var,
              atrous_rate, eps=1e-5, tile_cin=128, tile_cout=128):
    """Forward pass of _ASPPConv. Inputs/outputs are NCHW like PyTorch."""
    N, Cin, H, W = x_nchw.shape
    Cout = weight_oihw.shape[0]
    r = int(atrous_rate)

    # Channel tiles: 128 (lane-native) when the channel count divides evenly,
    # otherwise fall back to the full extent (keeps the (8,128) rule satisfied).
    tc_in = tile_cin if (Cin % tile_cin == 0) else Cin
    tc_out = tile_cout if (Cout % tile_cout == 0) else Cout
    n_ci = Cin // tc_in
    n_co = Cout // tc_out

    # ---- glue (plain JAX): layout transforms + BN folding --------------------
    x_nhwc = jnp.transpose(x_nchw, (0, 2, 3, 1)).astype(jnp.bfloat16)
    xp = jnp.pad(x_nhwc, ((0, 0), (r, r), (r, r), (0, 0)))          # zero halo

    scale = (gamma / jnp.sqrt(running_var + eps)).astype(jnp.float32)   # (Cout,)
    shift = (beta - running_mean * scale).astype(jnp.float32).reshape(1, Cout)

    # OIHW -> (kh, kw, Cin, Cout) -> (9, Cin, Cout); fold BN scale; bf16 for MXU.
    w = jnp.transpose(weight_oihw, (2, 3, 1, 0)).reshape(9, Cin, Cout)
    w = (w.astype(jnp.float32) * scale[None, None, :]).astype(jnp.bfloat16)

    Hp, Wp = H + 2 * r, W + 2 * r
    HW = H * W

    kernel = functools.partial(_aspp_conv_kernel, H=H, W=W, rate=r)

    # VMEM budget: double-buffered inputs/output + f32 accumulator, with
    # headroom; capped well under v7x's 64 MiB physical VMEM.
    tile_bytes = (Hp * Wp * tc_in * 2            # activation tile (bf16)
                  + 9 * tc_in * tc_out * 2       # weight tile (bf16)
                  + tc_out * 4                   # shift tile (f32)
                  + HW * tc_out * 4)             # output tile (f32)
    vmem_needed = 2 * tile_bytes + HW * tc_out * 4
    vmem_limit = int(min(max(2 * vmem_needed, 16 * 1024 * 1024), 56 * 1024 * 1024))

    flops = int(2 * N * HW * 9 * Cin * Cout)
    bytes_accessed = int(xp.size * 2 + w.size * 2 + shift.size * 4
                         + N * HW * Cout * 4)
    cost = pl.CostEstimate(flops=flops, transcendentals=0,
                           bytes_accessed=bytes_accessed)

    out_flat = pl.pallas_call(
        kernel,
        out_shape=jax.ShapeDtypeStruct((N, HW, Cout), jnp.float32),
        grid_spec=pltpu.PrefetchScalarGridSpec(
            num_scalar_prefetch=0,
            grid=(N, n_co, n_ci),
            in_specs=[
                pl.BlockSpec((1, Hp, Wp, tc_in), lambda n, co, ci: (n, 0, 0, ci)),
                pl.BlockSpec((9, tc_in, tc_out), lambda n, co, ci: (0, ci, co)),
                pl.BlockSpec((1, tc_out), lambda n, co, ci: (0, co)),
            ],
            out_specs=pl.BlockSpec((1, HW, tc_out), lambda n, co, ci: (n, 0, co)),
            scratch_shapes=[pltpu.VMEM((HW, tc_out), jnp.float32)],
        ),
        compiler_params=pltpu.CompilerParams(
            dimension_semantics=("parallel", "parallel", "arbitrary"),
            vmem_limit_bytes=vmem_limit),
        cost_estimate=cost,
    )(xp, w, shift)

    out_nhwc = out_flat.reshape(N, H, W, Cout)
    return jnp.transpose(out_nhwc, (0, 3, 1, 2))  # back to NCHW


def _reference(x_nchw, weight_oihw, gamma, beta, running_mean, running_var,
               rate, eps=1e-5):
    """Pure-JAX reference matching the kernel's numerics (bf16 operands,
    BN scale folded into weights, f32 accumulation, eval-mode BN, ReLU)."""
    scale = gamma / jnp.sqrt(running_var + eps)
    shift = beta - running_mean * scale
    w = weight_oihw.astype(jnp.float32) * scale[:, None, None, None]
    w = w.astype(jnp.bfloat16).astype(jnp.float32)
    xb = x_nchw.astype(jnp.float32).astype(jnp.bfloat16).astype(jnp.float32)
    y = jax.lax.conv_general_dilated(
        xb, w,
        window_strides=(1, 1),
        padding=((rate, rate), (rate, rate)),
        rhs_dilation=(rate, rate),
        dimension_numbers=("NCHW", "OIHW", "NCHW"))
    y = y + shift[None, :, None, None]
    return jnp.maximum(y, 0.0)


if __name__ == "__main__":
    key = jax.random.PRNGKey(0)
    k_x, k_w, k_g, k_b, k_m, k_v = jax.random.split(key, 6)

    # Small shapes consistent with the module.
    N, Cin, H, W = 2, 4, 16, 16
    Cout = 8
    atrous_rate = 2

    x = jax.random.normal(k_x, (N, Cin, H, W), jnp.float32)

    # Deterministic synthetic parameters (shapes from __init__).
    weight = jax.random.normal(k_w, (Cout, Cin, 3, 3), jnp.float32) * 0.1
    gamma = 1.0 + 0.1 * jax.random.normal(k_g, (Cout,), jnp.float32)
    beta = 0.1 * jax.random.normal(k_b, (Cout,), jnp.float32)
    running_mean = 0.1 * jax.random.normal(k_m, (Cout,), jnp.float32)
    running_var = jnp.abs(1.0 + 0.1 * jax.random.normal(k_v, (Cout,), jnp.float32))

    out = aspp_conv(x, weight, gamma, beta, running_mean, running_var, atrous_rate)
    out = jax.block_until_ready(out)

    ref = _reference(x, weight, gamma, beta, running_mean, running_var, atrous_rate)
    assert out.shape == (N, Cout, H, W), out.shape
    max_err = float(jnp.max(jnp.abs(out - ref)))
    assert jnp.allclose(out, ref, atol=5e-3, rtol=5e-3), max_err

    print("KERNEL_OK")
</pallas_src>

<mosaic_0001>
module attributes {stable_mosaic.version = 11 : i64} {
  func.func @_aspp_conv_kernel(%arg0: i32, %arg1: i32, %arg2: i32, %arg3: memref<1x20x20x4xbf16, #tpu.memory_space<vmem>>, %arg4: memref<9x4x8xbf16, #tpu.memory_space<vmem>>, %arg5: memref<1x8xf32, #tpu.memory_space<vmem>>, %arg6: memref<1x256x8xf32, #tpu.memory_space<vmem>>, %arg7: memref<256x8xf32, #tpu.memory_space<vmem>>) attributes {dimension_semantics = [#tpu.dimension_semantics<parallel>, #tpu.dimension_semantics<parallel>, #tpu.dimension_semantics<arbitrary>], iteration_bounds = array<i64: 2, 1, 1>, scalar_prefetch = 0 : i64, scratch_operands = 1 : i64, tpu.core_type = #tpu.core_type<tc>, window_params = [{transform_indices = @transform_0, window_bounds = array<i64: 1, 20, 20, 4>}, {transform_indices = @transform_1, window_bounds = array<i64: 9, 4, 8>}, {transform_indices = @transform_2, window_bounds = array<i64: 1, 8>}, {transform_indices = @transform_3, window_bounds = array<i64: 1, 256, 8>}]} {
    %c0_i32 = arith.constant 0 : i32
    %0 = arith.cmpi eq, %arg2, %c0_i32 : i32
    %1 = arith.extui %0 : i1 to i32
    %c0_i32_0 = arith.constant 0 : i32
    %2 = arith.cmpi ne, %1, %c0_i32_0 : i32
    scf.if %2 {
      %cst_101 = arith.constant 0.000000e+00 : f32
      %87 = vector.broadcast %cst_101 : f32 to vector<256x8xf32>
      %c0_102 = arith.constant 0 : index
      %c0_103 = arith.constant 0 : index
      %88 = vector.load %arg7[%c0_102, %c0_103] : memref<256x8xf32, #tpu.memory_space<vmem>>, vector<256x8xf32>
      tpu.vector_store %arg7[%c0_102, %c0_103], %87 {strides = array<i32>} : memref<256x8xf32, #tpu.memory_space<vmem>>, vector<256x8xf32>,
    } else {
    }
    %c0 = arith.constant 0 : index
    %c0_1 = arith.constant 0 : index
    %c0_2 = arith.constant 0 : index
    %c0_3 = arith.constant 0 : index
    %3 = vector.load %arg3[%c0, %c0_1, %c0_2, %c0_3] : memref<1x20x20x4xbf16, #tpu.memory_space<vmem>>, vector<1x16x16x4xbf16>
    %4 = vector.shape_cast %3 : vector<1x16x16x4xbf16> to vector<16x16x4xbf16>
    %5 = vector.shape_cast %4 : vector<16x16x4xbf16> to vector<256x4xbf16>
    %c0_4 = arith.constant 0 : index
    %c0_5 = arith.constant 0 : index
    %6 = vector.load %arg7[%c0_4, %c0_5] : memref<256x8xf32, #tpu.memory_space<vmem>>, vector<256x8xf32>
    %c0_6 = arith.constant 0 : index
    %c0_7 = arith.constant 0 : index
    %c0_8 = arith.constant 0 : index
    %7 = vector.load %arg4[%c0_6, %c0_7, %c0_8] : memref<9x4x8xbf16, #tpu.memory_space<vmem>>, vector<1x4x8xbf16>
    %8 = vector.shape_cast %7 : vector<1x4x8xbf16> to vector<4x8xbf16>
    %cst = arith.constant dense<0.000000e+00> : vector<256x8xf32>
    %9 = tpu.matmul %5, %8, %cst {dimension_numbers = #tpu.dot_dimension_numbers<[1], [0], [0], [1], [0, 0, 1, 1], [], []>} : vector<256x4xbf16>, vector<4x8xbf16>, vector<256x8xf32> -> vector<256x8xf32>
    %10 = arith.addf %6, %9 : vector<256x8xf32>
    %c0_9 = arith.constant 0 : index
    %c0_10 = arith.constant 0 : index
    %11 = vector.load %arg7[%c0_9, %c0_10] : memref<256x8xf32, #tpu.memory_space<vmem>>, vector<256x8xf32>
    tpu.vector_store %arg7[%c0_9, %c0_10], %10 {strides = array<i32>} : memref<256x8xf32, #tpu.memory_space<vmem>>, vector<256x8xf32>,
    %c0_11 = arith.constant 0 : index
    %c0_12 = arith.constant 0 : index
    %c2 = arith.constant 2 : index
    %c0_13 = arith.constant 0 : index
    %12 = vector.load %arg3[%c0_11, %c0_12, %c2, %c0_13] : memref<1x20x20x4xbf16, #tpu.memory_space<vmem>>, vector<1x16x16x4xbf16>
    %13 = vector.shape_cast %12 : vector<1x16x16x4xbf16> to vector<16x16x4xbf16>
    %14 = vector.shape_cast %13 : vector<16x16x4xbf16> to vector<256x4xbf16>
    %c0_14 = arith.constant 0 : index
    %c0_15 = arith.constant 0 : index
    %15 = vector.load %arg7[%c0_14, %c0_15] : memref<256x8xf32, #tpu.memory_space<vmem>>, vector<256x8xf32>
    %c1 = arith.constant 1 : index
    %c0_16 = arith.constant 0 : index
    %c0_17 = arith.constant 0 : index
    %16 = vector.load %arg4[%c1, %c0_16, %c0_17] : memref<9x4x8xbf16, #tpu.memory_space<vmem>>, vector<1x4x8xbf16>
    %17 = vector.shape_cast %16 : vector<1x4x8xbf16> to vector<4x8xbf16>
    %cst_18 = arith.constant dense<0.000000e+00> : vector<256x8xf32>
    %18 = tpu.matmul %14, %17, %cst_18 {dimension_numbers = #tpu.dot_dimension_numbers<[1], [0], [0], [1], [0, 0, 1, 1], [], []>} : vector<256x4xbf16>, vector<4x8xbf16>, vector<256x8xf32> -> vector<256x8xf32>
    %19 = arith.addf %15, %18 : vector<256x8xf32>
    %c0_19 = arith.constant 0 : index
    %c0_20 = arith.constant 0 : index
    %20 = vector.load %arg7[%c0_19, %c0_20] : memref<256x8xf32, #tpu.memory_space<vmem>>, vector<256x8xf32>
    tpu.vector_store %arg7[%c0_19, %c0_20], %19 {strides = array<i32>} : memref<256x8xf32, #tpu.memory_space<vmem>>, vector<256x8xf32>,
    %c0_21 = arith.constant 0 : index
    %c0_22 = arith.constant 0 : index
    %c4 = arith.constant 4 : index
    %c0_23 = arith.constant 0 : index
    %21 = vector.load %arg3[%c0_21, %c0_22, %c4, %c0_23] : memref<1x20x20x4xbf16, #tpu.memory_space<vmem>>, vector<1x16x16x4xbf16>
    %22 = vector.shape_cast %21 : vector<1x16x16x4xbf16> to vector<16x16x4xbf16>
    %23 = vector.shape_cast %22 : vector<16x16x4xbf16> to vector<256x4xbf16>
    %c0_24 = arith.constant 0 : index
    %c0_25 = arith.constant 0 : index
    %24 = vector.load %arg7[%c0_24, %c0_25] : memref<256x8xf32, #tpu.memory_space<vmem>>, vector<256x8xf32>
    %c2_26 = arith.constant 2 : index
    %c0_27 = arith.constant 0 : index
    %c0_28 = arith.constant 0 : index
    %25 = vector.load %arg4[%c2_26, %c0_27, %c0_28] : memref<9x4x8xbf16, #tpu.memory_space<vmem>>, vector<1x4x8xbf16>
    %26 = vector.shape_cast %25 : vector<1x4x8xbf16> to vector<4x8xbf16>
    %cst_29 = arith.constant dense<0.000000e+00> : vector<256x8xf32>
    %27 = tpu.matmul %23, %26, %cst_29 {dimension_numbers = #tpu.dot_dimension_numbers<[1], [0], [0], [1], [0, 0, 1, 1], [], []>} : vector<256x4xbf16>, vector<4x8xbf16>, vector<256x8xf32> -> vector<256x8xf32>
    %28 = arith.addf %24, %27 : vector<256x8xf32>
    %c0_30 = arith.constant 0 : index
    %c0_31 = arith.constant 0 : index
    %29 = vector.load %arg7[%c0_30, %c0_31] : memref<256x8xf32, #tpu.memory_space<vmem>>, vector<256x8xf32>
    tpu.vector_store %arg7[%c0_30, %c0_31], %28 {strides = array<i32>} : memref<256x8xf32, #tpu.memory_space<vmem>>, vector<256x8xf32>,
    %c0_32 = arith.constant 0 : index
    %c2_33 = arith.constant 2 : index
    %c0_34 = arith.constant 0 : index
    %c0_35 = arith.constant 0 : index
    %30 = vector.load %arg3[%c0_32, %c2_33, %c0_34, %c0_35] : memref<1x20x20x4xbf16, #tpu.memory_space<vmem>>, vector<1x16x16x4xbf16>
    %31 = vector.shape_cast %30 : vector<1x16x16x4xbf16> to vector<16x16x4xbf16>
    %32 = vector.shape_cast %31 : vector<16x16x4xbf16> to vector<256x4xbf16>
    %c0_36 = arith.constant 0 : index
    %c0_37 = arith.constant 0 : index
    %33 = vector.load %arg7[%c0_36, %c0_37] : memref<256x8xf32, #tpu.memory_space<vmem>>, vector<256x8xf32>
    %c3 = arith.constant 3 : index
    %c0_38 = arith.constant 0 : index
    %c0_39 = arith.constant 0 : index
    %34 = vector.load %arg4[%c3, %c0_38, %c0_39] : memref<9x4x8xbf16, #tpu.memory_space<vmem>>, vector<1x4x8xbf16>
    %35 = vector.shape_cast %34 : vector<1x4x8xbf16> to vector<4x8xbf16>
    %cst_40 = arith.constant dense<0.000000e+00> : vector<256x8xf32>
    %36 = tpu.matmul %32, %35, %cst_40 {dimension_numbers = #tpu.dot_dimension_numbers<[1], [0], [0], [1], [0, 0, 1, 1], [], []>} : vector<256x4xbf16>, vector<4x8xbf16>, vector<256x8xf32> -> vector<256x8xf32>
    %37 = arith.addf %33, %36 : vector<256x8xf32>
    %c0_41 = arith.constant 0 : index
    %c0_42 = arith.constant 0 : index
    %38 = vector.load %arg7[%c0_41, %c0_42] : memref<256x8xf32, #tpu.memory_space<vmem>>, vector<256x8xf32>
    tpu.vector_store %arg7[%c0_41, %c0_42], %37 {strides = array<i32>} : memref<256x8xf32, #tpu.memory_space<vmem>>, vector<256x8xf32>,
    %c0_43 = arith.constant 0 : index
    %c2_44 = arith.constant 2 : index
    %c2_45 = arith.constant 2 : index
    %c0_46 = arith.constant 0 : index
    %39 = vector.load %arg3[%c0_43, %c2_44, %c2_45, %c0_46] : memref<1x20x20x4xbf16, #tpu.memory_space<vmem>>, vector<1x16x16x4xbf16>
    %40 = vector.shape_cast %39 : vector<1x16x16x4xbf16> to vector<16x16x4xbf16>
    %41 = vector.shape_cast %40 : vector<16x16x4xbf16> to vector<256x4xbf16>
    %c0_47 = arith.constant 0 : index
    %c0_48 = arith.constant 0 : index
    %42 = vector.load %arg7[%c0_47, %c0_48] : memref<256x8xf32, #tpu.memory_space<vmem>>, vector<256x8xf32>
    %c4_49 = arith.constant 4 : index
    %c0_50 = arith.constant 0 : index
    %c0_51 = arith.constant 0 : index
    %43 = vector.load %arg4[%c4_49, %c0_50, %c0_51] : memref<9x4x8xbf16, #tpu.memory_space<vmem>>, vector<1x4x8xbf16>
    %44 = vector.shape_cast %43 : vector<1x4x8xbf16> to vector<4x8xbf16>
    %cst_52 = arith.constant dense<0.000000e+00> : vector<256x8xf32>
    %45 = tpu.matmul %41, %44, %cst_52 {dimension_numbers = #tpu.dot_dimension_numbers<[1], [0], [0], [1], [0, 0, 1, 1], [], []>} : vector<256x4xbf16>, vector<4x8xbf16>, vector<256x8xf32> -> vector<256x8xf32>
    %46 = arith.addf %42, %45 : vector<256x8xf32>
    %c0_53 = arith.constant 0 : index
    %c0_54 = arith.constant 0 : index
    %47 = vector.load %arg7[%c0_53, %c0_54] : memref<256x8xf32, #tpu.memory_space<vmem>>, vector<256x8xf32>
    tpu.vector_store %arg7[%c0_53, %c0_54], %46 {strides = array<i32>} : memref<256x8xf32, #tpu.memory_space<vmem>>, vector<256x8xf32>,
    %c0_55 = arith.constant 0 : index
    %c2_56 = arith.constant 2 : index
    %c4_57 = arith.constant 4 : index
    %c0_58 = arith.constant 0 : index
    %48 = vector.load %arg3[%c0_55, %c2_56, %c4_57, %c0_58] : memref<1x20x20x4xbf16, #tpu.memory_space<vmem>>, vector<1x16x16x4xbf16>
    %49 = vector.shape_cast %48 : vector<1x16x16x4xbf16> to vector<16x16x4xbf16>
    %50 = vector.shape_cast %49 : vector<16x16x4xbf16> to vector<256x4xbf16>
    %c0_59 = arith.constant 0 : index
    %c0_60 = arith.constant 0 : index
    %51 = vector.load %arg7[%c0_59, %c0_60] : memref<256x8xf32, #tpu.memory_space<vmem>>, vector<256x8xf32>
    %c5 = arith.constant 5 : index
    %c0_61 = arith.constant 0 : index
    %c0_62 = arith.constant 0 : index
    %52 = vector.load %arg4[%c5, %c0_61, %c0_62] : memref<9x4x8xbf16, #tpu.memory_space<vmem>>, vector<1x4x8xbf16>
    %53 = vector.shape_cast %52 : vector<1x4x8xbf16> to vector<4x8xbf16>
    %cst_63 = arith.constant dense<0.000000e+00> : vector<256x8xf32>
    %54 = tpu.matmul %50, %53, %cst_63 {dimension_numbers = #tpu.dot_dimension_numbers<[1], [0], [0], [1], [0, 0, 1, 1], [], []>} : vector<256x4xbf16>, vector<4x8xbf16>, vector<256x8xf32> -> vector<256x8xf32>
    %55 = arith.addf %51, %54 : vector<256x8xf32>
    %c0_64 = arith.constant 0 : index
    %c0_65 = arith.constant 0 : index
    %56 = vector.load %arg7[%c0_64, %c0_65] : memref<256x8xf32, #tpu.memory_space<vmem>>, vector<256x8xf32>
    tpu.vector_store %arg7[%c0_64, %c0_65], %55 {strides = array<i32>} : memref<256x8xf32, #tpu.memory_space<vmem>>, vector<256x8xf32>,
    %c0_66 = arith.constant 0 : index
    %c4_67 = arith.constant 4 : index
    %c0_68 = arith.constant 0 : index
    %c0_69 = arith.constant 0 : index
    %57 = vector.load %arg3[%c0_66, %c4_67, %c0_68, %c0_69] : memref<1x20x20x4xbf16, #tpu.memory_space<vmem>>, vector<1x16x16x4xbf16>
    %58 = vector.shape_cast %57 : vector<1x16x16x4xbf16> to vector<16x16x4xbf16>
    %59 = vector.shape_cast %58 : vector<16x16x4xbf16> to vector<256x4xbf16>
    %c0_70 = arith.constant 0 : index
    %c0_71 = arith.constant 0 : index
    %60 = vector.load %arg7[%c0_70, %c0_71] : memref<256x8xf32, #tpu.memory_space<vmem>>, vector<256x8xf32>
    %c6 = arith.constant 6 : index
    %c0_72 = arith.constant 0 : index
    %c0_73 = arith.constant 0 : index
    %61 = vector.load %arg4[%c6, %c0_72, %c0_73] : memref<9x4x8xbf16, #tpu.memory_space<vmem>>, vector<1x4x8xbf16>
    %62 = vector.shape_cast %61 : vector<1x4x8xbf16> to vector<4x8xbf16>
    %cst_74 = arith.constant dense<0.000000e+00> : vector<256x8xf32>
    %63 = tpu.matmul %59, %62, %cst_74 {dimension_numbers = #tpu.dot_dimension_numbers<[1], [0], [0], [1], [0, 0, 1, 1], [], []>} : vector<256x4xbf16>, vector<4x8xbf16>, vector<256x8xf32> -> vector<256x8xf32>
    %64 = arith.addf %60, %63 : vector<256x8xf32>
    %c0_75 = arith.constant 0 : index
    %c0_76 = arith.constant 0 : index
    %65 = vector.load %arg7[%c0_75, %c0_76] : memref<256x8xf32, #tpu.memory_space<vmem>>, vector<256x8xf32>
    tpu.vector_store %arg7[%c0_75, %c0_76], %64 {strides = array<i32>} : memref<256x8xf32, #tpu.memory_space<vmem>>, vector<256x8xf32>,
    %c0_77 = arith.constant 0 : index
    %c4_78 = arith.constant 4 : index
    %c2_79 = arith.constant 2 : index
    %c0_80 = arith.constant 0 : index
    %66 = vector.load %arg3[%c0_77, %c4_78, %c2_79, %c0_80] : memref<1x20x20x4xbf16, #tpu.memory_space<vmem>>, vector<1x16x16x4xbf16>
    %67 = vector.shape_cast %66 : vector<1x16x16x4xbf16> to vector<16x16x4xbf16>
    %68 = vector.shape_cast %67 : vector<16x16x4xbf16> to vector<256x4xbf16>
    %c0_81 = arith.constant 0 : index
    %c0_82 = arith.constant 0 : index
    %69 = vector.load %arg7[%c0_81, %c0_82] : memref<256x8xf32, #tpu.memory_space<vmem>>, vector<256x8xf32>
    %c7 = arith.constant 7 : index
    %c0_83 = arith.constant 0 : index
    %c0_84 = arith.constant 0 : index
    %70 = vector.load %arg4[%c7, %c0_83, %c0_84] : memref<9x4x8xbf16, #tpu.memory_space<vmem>>, vector<1x4x8xbf16>
    %71 = vector.shape_cast %70 : vector<1x4x8xbf16> to vector<4x8xbf16>
    %cst_85 = arith.constant dense<0.000000e+00> : vector<256x8xf32>
    %72 = tpu.matmul %68, %71, %cst_85 {dimension_numbers = #tpu.dot_dimension_numbers<[1], [0], [0], [1], [0, 0, 1, 1], [], []>} : vector<256x4xbf16>, vector<4x8xbf16>, vector<256x8xf32> -> vector<256x8xf32>
    %73 = arith.addf %69, %72 : vector<256x8xf32>
    %c0_86 = arith.constant 0 : index
    %c0_87 = arith.constant 0 : index
    %74 = vector.load %arg7[%c0_86, %c0_87] : memref<256x8xf32, #tpu.memory_space<vmem>>, vector<256x8xf32>
    tpu.vector_store %arg7[%c0_86, %c0_87], %73 {strides = array<i32>} : memref<256x8xf32, #tpu.memory_space<vmem>>, vector<256x8xf32>,
    %c0_88 = arith.constant 0 : index
    %c4_89 = arith.constant 4 : index
    %c4_90 = arith.constant 4 : index
    %c0_91 = arith.constant 0 : index
    %75 = vector.load %arg3[%c0_88, %c4_89, %c4_90, %c0_91] : memref<1x20x20x4xbf16, #tpu.memory_space<vmem>>, vector<1x16x16x4xbf16>
    %76 = vector.shape_cast %75 : vector<1x16x16x4xbf16> to vector<16x16x4xbf16>
    %77 = vector.shape_cast %76 : vector<16x16x4xbf16> to vector<256x4xbf16>
    %c0_92 = arith.constant 0 : index
    %c0_93 = arith.constant 0 : index
    %78 = vector.load %arg7[%c0_92, %c0_93] : memref<256x8xf32, #tpu.memory_space<vmem>>, vector<256x8xf32>
    %c8 = arith.constant 8 : index
    %c0_94 = arith.constant 0 : index
    %c0_95 = arith.constant 0 : index
    %79 = vector.load %arg4[%c8, %c0_94, %c0_95] : memref<9x4x8xbf16, #tpu.memory_space<vmem>>, vector<1x4x8xbf16>
    %80 = vector.shape_cast %79 : vector<1x4x8xbf16> to vector<4x8xbf16>
    %cst_96 = arith.constant dense<0.000000e+00> : vector<256x8xf32>
    %81 = tpu.matmul %77, %80, %cst_96 {dimension_numbers = #tpu.dot_dimension_numbers<[1], [0], [0], [1], [0, 0, 1, 1], [], []>} : vector<256x4xbf16>, vector<4x8xbf16>, vector<256x8xf32> -> vector<256x8xf32>
    %82 = arith.addf %78, %81 : vector<256x8xf32>
    %c0_97 = arith.constant 0 : index
    %c0_98 = arith.constant 0 : index
    %83 = vector.load %arg7[%c0_97, %c0_98] : memref<256x8xf32, #tpu.memory_space<vmem>>, vector<256x8xf32>
    tpu.vector_store %arg7[%c0_97, %c0_98], %82 {strides = array<i32>} : memref<256x8xf32, #tpu.memory_space<vmem>>, vector<256x8xf32>,
    %c0_i32_99 = arith.constant 0 : i32
    %84 = arith.cmpi eq, %arg2, %c0_i32_99 : i32
    %85 = arith.extui %84 : i1 to i32
    %c0_i32_100 = arith.constant 0 : i32
    %86 = arith.cmpi ne, %85, %c0_i32_100 : i32
    scf.if %86 {
      %c0_101 = arith.constant 0 : index
      %c0_102 = arith.constant 0 : index
      %87 = vector.load %arg7[%c0_101, %c0_102] : memref<256x8xf32, #tpu.memory_space<vmem>>, vector<256x8xf32>
      %c0_103 = arith.constant 0 : index
      %c0_104 = arith.constant 0 : index
      %88 = vector.load %arg5[%c0_103, %c0_104] : memref<1x8xf32, #tpu.memory_space<vmem>>, vector<1x8xf32>
      %89 = vector.broadcast %88 : vector<1x8xf32> to vector<256x8xf32>
      %90 = arith.addf %87, %89 : vector<256x8xf32>
      %cst_105 = arith.constant 0.000000e+00 : f32
      %91 = vector.broadcast %cst_105 : f32 to vector<256x8xf32>
      %92 = arith.maximumf %90, %91 : vector<256x8xf32>
      %93 = vector.shape_cast %92 : vector<256x8xf32> to vector<1x256x8xf32>
      %c0_106 = arith.constant 0 : index
      %c0_107 = arith.constant 0 : index
      %c0_108 = arith.constant 0 : index
      %94 = vector.load %arg6[%c0_106, %c0_107, %c0_108] : memref<1x256x8xf32, #tpu.memory_space<vmem>>, vector<1x256x8xf32>
      tpu.vector_store %arg6[%c0_106, %c0_107, %c0_108], %93 {strides = array<i32>} : memref<1x256x8xf32, #tpu.memory_space<vmem>>, vector<1x256x8xf32>,
    } else {
    }
    return
  }
  func.func @transform_0(%arg0: i32, %arg1: i32, %arg2: i32) -> (i32, i32, i32, i32) {
    %c0_i32 = arith.constant 0 : i32
    %c0_i32_0 = arith.constant 0 : i32
    %c0_i32_1 = arith.constant 0 : i32
    return %arg0, %c0_i32, %c0_i32_0, %arg2 : i32, i32, i32, i32
  }
  func.func @transform_1(%arg0: i32, %arg1: i32, %arg2: i32) -> (i32, i32, i32) {
    %c0_i32 = arith.constant 0 : i32
    %c0_i32_0 = arith.constant 0 : i32
    return %c0_i32, %arg2, %arg1 : i32, i32, i32
  }
  func.func @transform_2(%arg0: i32, %arg1: i32, %arg2: i32) -> (i32, i32) {
    %c0_i32 = arith.constant 0 : i32
    %c0_i32_0 = arith.constant 0 : i32
    return %c0_i32, %arg1 : i32, i32
  }
  func.func @transform_3(%arg0: i32, %arg1: i32, %arg2: i32) -> (i32, i32, i32) {
    %c0_i32 = arith.constant 0 : i32
    %c0_i32_0 = arith.constant 0 : i32
    return %arg0, %c0_i32, %arg1 : i32, i32, i32
  }
}

</mosaic_0001>

<bundles_post_ra>
// kernel: tpu_custom_call.1
= control target key start
LH: loop header
LB: loop body
LE: loop exit
PB: predicated region body
PF: predicated region fallthrough
CT: control target
= control target key end

     0   :  { %s6468_s12 = smov 0   ;;  %s6470_s13 = smov 0   ;;  %s8546_s0 = inlined_call_operand.vmem [shape: bf16[2,20,20,4], index: 0, kind: input, shape index: {}]   ;;  %s8547_s1 = inlined_call_operand.vmem [shape: bf16[9,4,8], index: 1, kind: input, shape index: {}]   ;;  %s8548_s2 = inlined_call_operand.vmem [shape: f32[1,8], index: 2, kind: input, shape index: {}]   ;;  %s8549_s3 = inlined_call_operand.vmem [shape: f32[2,256,8], index: 3, kind: output, shape index: {}]  }
   0x1   :  { %s6472_s14 = smov 0  }
   0x2 LB: > { %s32_s15 = sadd.s32 1, %s6441_s13  ;;  %p5222_p0 = scmp.ge.s32.totalorder %s6445_s14, 1  ;;  %s6445_s14 = sphi %s6472_s14, %s13_s14   ;;  %s6441_s13 = sphi %s6470_s13, %s8555_s13   ;;  %s6437_s12 = sphi %s6468_s12, %s8554_s12  }
   0x3   : > { %p34_p1 = scmp.ge.s32.totalorder %s32_s15, 2  ;;  %p185_p2 = scmp.lt.s32.totalorder %s6445_s14, 3 }
   0x5   : > { %s8557_s15 = smov (%p34_p1, %s32_s15), 0  ;;  %p186_p3 = pnand %p5222_p0, %p185_p2 }
   0x6   : > { %p225_p4 = scmp.lt.s32.totalorder (!%p186_p3), %s6437_s12, 1 }
   0x7   : > { %189 = sbr.rel (%p186_p3) target bundleno = 523 (0x20b), region = 32 }
   0xc   : > { %v353_v0 = vld [vmem:[%s8547_s1] sm:$0x3]  ;;  %vm483_vm0 = vcmask 1041408   ;;  %v5274_v2 = vld [vmem:[%s8547_s1 + $0x2] sm:$0x3]  ;;  %s8559_s12 = smov (!%p225_p4, %s6437_s12), 1 }
   0xd   : > { %6340 = vmatprep.subr.msk.bf16.mxu1 %vm483_vm0, %v353_v0  ;;  %v485_v1 = vsel %vm483_vm0, %v353_v0, 0  ;;  %6339 = vmatprep.subr.msk.bf16.mxu0 %vm483_vm0, %v353_v0  ;;  %v5323_v3 = vld [vmem:[%s8547_s1 + $0x4] sm:$0x3]  ;;  %s6349_s22 = smul.u32 240, %s8559_s12  ;;  %vm434_vm1 = vcmask 31744   ;;  %v1055_v7 = vsel %vm483_vm0, %v5274_v2, 0 }
   0xe   : > { %6338 = vmatpush3.bf16.msra.mxu1 %v485_v1  ;;  %6032 = vmatpush3.bf16.msra.mxu0 %v485_v1  ;;  %v5388_v5 = vld [vmem:[%s8547_s1 + $0x6] sm:$0x3]  ;;  %v5485_v9 = vld [vmem:[%s8547_s1 + $0x8] sm:$0x3]  ;;  %v1624_v11 = vsel %vm483_vm0, %v5323_v3, 0  ;;  %vm809_vm2 = vcmask 1042432  }
   0xf   : > { %6341 = vmatprep.subr.msk.bf16.mxu1 %vm483_vm0, %v5274_v2  ;;  %6342 = vmatprep.subr.msk.bf16.mxu0 %vm483_vm0, %v5323_v3  ;;  %s6506_s25 = scalar_lea.vmem %s8546_s0, %s6349_s22  ;;  %vm810_vm3 = vcmask 1046532   ;;  %vm1379_vm4 = vcmask 1045508   ;;  %v6552_v31 = vsel %vm483_vm0, %v5388_v5, 0  ;;  %v6567_v40 = vsel %vm483_vm0, %v5485_v9, 0  ;;  %s5877_s17 = sshll.u32 %s8559_s12, 8 }
  0x10   : > { %v6375_v4 = vld [vmem:[%s6506_s25 + $0x60] sm:$0xff]   ;;  %v6376_v6 = vld [vmem:[%s6506_s25 + $0x6c] sm:$0xff]   ;;  %v6379_v12 = vld [vmem:[%s6506_s25 + $0x78] sm:$0xff]   ;;  %vm256_vm7 = vcmask 64512   ;;  %s8391_s19 = scalar_lea.vmem %s8549_s3, %s5877_s17 }
  0x11   : > { %6049 = vmatprep.mubr.msk.bf16.mxu1 %vm434_vm1, %v6375_v4  ;;  %v6377_v8 = vld [vmem:[%s6506_s25] sm:$0xff]   ;;  %v6378_v10 = vld [vmem:[%s6506_s25 + $0xc] sm:$0xff]   ;;  %v6381_v13 = vld [vmem:[%s6506_s25 + $0x18] sm:$0xff]  }
  0x12   : > { %6050 = vmatmul.mubr.msk.bf16.vlgmr.msra.gmra.mxu1 %vm434_vm1, %v6376_v6  ;;  %6033 = vmatprep.mubr.msk.bf16.mxu0 %vm434_vm1, %v6377_v8  ;;  %v6380_v14 = vld [vmem:[%s6506_s25 + $0x84] sm:$0xff]   ;;  %v6383_v15 = vld [vmem:[%s6506_s25 + $0x90] sm:$0xff]   ;;  %v6384_v18 = vld [vmem:[%s6506_s25 + $0x9c] sm:$0xff]  }
  0x13   : > { %6066 = vmatpush3.bf16.msra.mxu1 %v1055_v7  ;;  %6034 = vmatmul.mubr.msk.bf16.vlgmr.msra.gmra.mxu0 %vm434_vm1, %v6378_v10  ;;  %v6382_v16 = vld [vmem:[%s6506_s25 + $0x24] sm:$0xff]   ;;  %v6385_v17 = vld [vmem:[%s6506_s25 + $0x30] sm:$0xff]   ;;  %v713_v20 = vld [vmem:[%s6506_s25] sm:$0xe] }
  0x14   : > { %6343 = vmatprep.subr.msk.bf16.mxu1 %vm483_vm0, %v5388_v5  ;;  %6053 = vmatprep.mubr.msk.bf16.mxu1 %vm434_vm1, %v6379_v12  ;;  %v6387_v19 = vld [vmem:[%s6506_s25 + $0xa8] sm:$0xff]   ;;  %v714_v21 = vld [vmem:[%s6506_s25 + $0x4] sm:$0xf]  ;;  %v6386_v23 = vld [vmem:[%s6506_s25 + $0x3c] sm:$0xff]   ;;  %v5258_v25 = vrot.slane %v713_v20, 9 }
  0x15   : > { %6100 = vmatpush3.bf16.msra.mxu0 %v1624_v11  ;;  %6037 = vmatprep.mubr.msk.bf16.mxu0 %vm434_vm1, %v6381_v13  ;;  %v715_v22 = vld [vmem:[%s6506_s25 + $0x8] sm:$0x1]  ;;  %vm6544_vm5 = vmor %vm809_vm2, %vm810_vm3  ;;  %v814_v26 = vrot.slane %v714_v21, 5  ;;  %v716_v29 = vld [vmem:[%s6506_s25 + $0xc] sm:$0xe] }
  0x16   : > { %6344 = vmatprep.subr.msk.bf16.mxu0 %vm483_vm0, %v5485_v9  ;;  %v817_v27 = vrot.slane %v715_v22, 5  ;;  %v6389_v28 = vld [vmem:[%s6506_s25 + $0x48] sm:$0xff]   ;;  %v717_v30 = vld [vmem:[%s6506_s25 + $0x10] sm:$0xf]  ;;  %v718_v33 = vld [vmem:[%s6506_s25 + $0x14] sm:$0x1] }
  0x17   : > { %v816_v32 = vrot.slane %v814_v26, 4  ;;  %v821_v34 = vrot.slane %v717_v30, 5  ;;  %v1282_v35 = vld [vmem:[%s6506_s25] sm:$0xc]  ;;  %vm6559_vm6 = vmor %vm483_vm0, %vm1379_vm4  ;;  %v1283_v37 = vld [vmem:[%s6506_s25 + $0x4] sm:$0xf]  ;;  %v815_v42 = vsel %vm6544_vm5, %v5258_v25, %v814_v26 }
  0x18   : > { %v1284_v38 = vld [vmem:[%s6506_s25 + $0x8] sm:$0x3]  ;;  %v5307_v39 = vrot.slane %v1282_v35, 10  ;;  %v6388_v41 = vld [vmem:[%s6506_s25 + $0xb4] sm:$0xff]   ;;  %v5259_v44 = vrot.slane %v716_v29, 9  ;;  %v1383_v45 = vrot.slane %v1283_v37, 6 }
  0x19   : > { %v818_v43 = vsel %vm6544_vm5, %v816_v32, %v817_v27  ;;  %v1285_v46 = vld [vmem:[%s6506_s25 + $0xc] sm:$0xc]  ;;  %v1286_v47 = vld [vmem:[%s6506_s25 + $0x10] sm:$0xf]  ;;  %v823_v48 = vrot.slane %v821_v34, 4  ;;  %v824_v49 = vrot.slane %v718_v33, 5 }
  0x1a   : > { %6054 = vmatmul.mubr.msk.bf16.gmra.mxu1 %vm434_vm1, %v6380_v14  ;;  %v1386_v50 = vrot.slane %v1284_v38, 6  ;;  %v1287_v51 = vld [vmem:[%s6506_s25 + $0x14] sm:$0x3]  ;;  %v1390_v52 = vrot.slane %v1286_v47, 6  ;;  %v1384_v54 = vsel %vm6559_vm6, %v5307_v39, %v1383_v45  ;;  %v1385_v55 = vrot.slane %v1383_v45, 4 }
  0x1b   : > { %6057 = vmatprep.mubr.msk.bf16.mxu1 %vm434_vm1, %v6383_v15  ;;  %6038 = vmatmul.mubr.msk.bf16.gmra.mxu0 %vm434_vm1, %v6382_v16  ;;  %v6390_v53 = vld [vmem:[%s6506_s25 + $0x54] sm:$0xff]   ;;  %v5308_v56 = vrot.slane %v1285_v46, 10  ;;  %v720_v58 = vld [vmem:[%s6506_s25 + $0x1c] sm:$0xf]  ;;  %v5275_v59 = vcombine.low %v815_v42, %v818_v43  ;;  %v1393_v60 = vrot.slane %v1287_v51, 6  ;;  %v822_v10 = vsel %vm6544_vm5, %v5259_v44, %v821_v34 }
  0x1c   : > { %6041 = vmatprep.mubr.msk.bf16.mxu0 %vm434_vm1, %v6385_v17  ;;  %v719_v57 = vld [vmem:[%s6506_s25 + $0x18] sm:$0xe]  ;;  %v721_v61 = vld [vmem:[%s6506_s25 + $0x20] sm:$0x1]  ;;  %v722_v63 = vld [vmem:[%s6506_s25 + $0x24] sm:$0xe]  ;;  %v1387_v0 = vsel %vm6559_vm6, %v1385_v55, %v1386_v50  ;;  %v825_v11 = vsel %vm6544_vm5, %v823_v48, %v824_v49 }
  0x1d   : > { %v5260_v62 = vrot.slane %v719_v57, 9  ;;  %v828_v1 = vrot.slane %v720_v58, 5  ;;  %v831_v2 = vrot.slane %v721_v61, 5  ;;  %v723_v3 = vld [vmem:[%s6506_s25 + $0x28] sm:$0xf]  ;;  %v5324_v5 = vcombine.low %v1384_v54, %v1387_v0 }
  0x1e   : > { %v724_v4 = vld [vmem:[%s6506_s25 + $0x2c] sm:$0x1]  ;;  %v1392_v6 = vrot.slane %v1390_v52, 4  ;;  %v835_v7 = vrot.slane %v723_v3, 5  ;;  %v1288_v8 = vld [vmem:[%s6506_s25 + $0x18] sm:$0xc]  ;;  %v1391_v27 = vsel %vm6559_vm6, %v5308_v56, %v1390_v52  ;;  %v5276_v34 = vcombine.low %v822_v10, %v825_v11 }
  0x1f   : > { %v1289_v9 = vld [vmem:[%s6506_s25 + $0x1c] sm:$0xf]  ;;  %v830_v12 = vrot.slane %v828_v1, 4  ;;  %v5261_v13 = vrot.slane %v722_v63, 9  ;;  %v1290_v14 = vld [vmem:[%s6506_s25 + $0x20] sm:$0x3]  ;;  %v829_v16 = vsel %vm6544_vm5, %v5260_v62, %v828_v1 }
  0x20   : > { %v1291_v15 = vld [vmem:[%s6506_s25 + $0x24] sm:$0xc]  ;;  %v838_v17 = vrot.slane %v724_v4, 5  ;;  %v1292_v20 = vld [vmem:[%s6506_s25 + $0x28] sm:$0xf]  ;;  %v837_v22 = vrot.slane %v835_v7, 4 }
  0x21   : > { %v832_v21 = vsel %vm6544_vm5, %v830_v12, %v831_v2  ;;  %v1293_v25 = vld [vmem:[%s6506_s25 + $0x2c] sm:$0x3]  ;;  %v1404_v26 = vrot.slane %v1292_v20, 6  ;;  %v5310_v30 = vrot.slane %v1291_v15, 10  ;;  %v725_v32 = vld [vmem:[%s6506_s25 + $0x30] sm:$0xe]  ;;  %v6628_v49 = vsel %vm6544_vm5, %v5261_v13, %v835_v7 }
  0x22   : > { %6058 = vmatmul.mubr.msk.bf16.gmra.mxu1 %vm434_vm1, %v6384_v18  ;;  %v5309_v18 = vrot.slane %v1288_v8, 10  ;;  %v726_v33 = vld [vmem:[%s6506_s25 + $0x34] sm:$0xf]  ;;  %v1407_v38 = vrot.slane %v1293_v25, 6  ;;  %v727_v39 = vld [vmem:[%s6506_s25 + $0x38] sm:$0x1]  ;;  %v839_v54 = vsel %vm6544_vm5, %v837_v22, %v838_v17 }
  0x23   : > { %6061 = vmatprep.mubr.msk.bf16.mxu1 %vm434_vm1, %v6387_v19  ;;  %6042 = vmatmul.mubr.msk.bf16.gmra.mxu0 %vm434_vm1, %v6386_v23  ;;  %v1397_v19 = vrot.slane %v1289_v9, 6  ;;  %v1400_v23 = vrot.slane %v1290_v14, 6  ;;  %v1406_v37 = vrot.slane %v1404_v26, 4  ;;  %v5262_v43 = vrot.slane %v725_v32, 9  ;;  %v728_v45 = vld [vmem:[%s6506_s25 + $0x3c] sm:$0xe] }
  0x24   : > { %6045 = vmatprep.mubr.msk.bf16.mxu0 %vm434_vm1, %v6389_v28  ;;  %v1394_v28 = vsel %vm6559_vm6, %v1392_v6, %v1393_v60  ;;  %v842_v44 = vrot.slane %v726_v33, 5  ;;  %v729_v46 = vld [vmem:[%s6506_s25 + $0x40] sm:$0xf]  ;;  %v6624_v47 = vld [vmem:[%s8547_s1 + $0xa] sm:$0x3]  ;;  %v845_v50 = vrot.slane %v727_v39, 5  ;;  %v6636_v56 = vsel %vm6559_vm6, %v5310_v30, %v1404_v26 }
  0x25   : > { %v1399_v29 = vrot.slane %v1397_v19, 4  ;;  %v1398_v35 = vsel %vm6559_vm6, %v5309_v18, %v1397_v19  ;;  %v5325_v48 = vcombine.low %v1391_v27, %v1394_v28  ;;  %v730_v51 = vld [vmem:[%s6506_s25 + $0x44] sm:$0x1]  ;;  %v849_v52 = vrot.slane %v729_v46, 5  ;;  %v1295_v58 = vld [vmem:[%s6506_s25 + $0x34] sm:$0xf] }
  0x26   : > { %v844_v57 = vrot.slane %v842_v44, 4  ;;  %v6643_v60 = vld [vmem:[%s8547_s1 + $0xc] sm:$0x3]  ;;  %v1408_v61 = vsel %vm6559_vm6, %v1406_v37, %v1407_v38  ;;  %v5263_v62 = vrot.slane %v728_v45, 9  ;;  %v1411_v0 = vrot.slane %v1295_v58, 6 }
  0x27   : > { %v1401_v42 = vsel %vm6559_vm6, %v1399_v29, %v1400_v23  ;;  %v1297_v1 = vld [vmem:[%s6506_s25 + $0x3c] sm:$0xc]  ;;  %v852_v2 = vrot.slane %v730_v51, 5  ;;  %v1298_v4 = vld [vmem:[%s6506_s25 + $0x40] sm:$0xf]  ;;  %v843_v6 = vsel %vm6544_vm5, %v5262_v43, %v842_v44  ;;  %v851_v8 = vrot.slane %v849_v52, 4 }
  0x28   : > { %v5326_v55 = vcombine.low %v1398_v35, %v1401_v42  ;;  %v846_v7 = vsel %vm6544_vm5, %v844_v57, %v845_v50  ;;  %v1413_v9 = vrot.slane %v1411_v0, 4  ;;  %v732_v10 = vld [vmem:[%s6506_s25 + $0x4c] sm:$0xf]  ;;  %v5278_v11 = vcombine.low %v6628_v49, %v839_v54  ;;  %v733_v15 = vld [vmem:[%s6506_s25 + $0x50] sm:$0x1] }
  0x29   : > { %v5327_v12 = vcombine.low %v6636_v56, %v1408_v61  ;;  %v1418_v14 = vrot.slane %v1298_v4, 6  ;;  %v856_v18 = vrot.slane %v732_v10, 5  ;;  %v734_v19 = vld [vmem:[%s6506_s25 + $0x54] sm:$0xe]  ;;  %v735_v20 = vld [vmem:[%s6506_s25 + $0x58] sm:$0xf]  ;;  %v853_v27 = vsel %vm6544_vm5, %v851_v8, %v852_v2 }
  0x2a   : > { %6062 = vmatmul.mubr.msk.bf16.gmra.mxu1 %vm434_vm1, %v6388_v41  ;;  %v5277_v41 = vcombine.low %v829_v16, %v832_v21  ;;  %v6671_v16 = vsel %vm6544_vm5, %v5263_v62, %v849_v52  ;;  %v5279_v21 = vcombine.low %v843_v6, %v846_v7  ;;  %v859_v25 = vrot.slane %v733_v15, 5  ;;  %v1300_v26 = vld [vmem:[%s6506_s25 + $0x48] sm:$0xc]  ;;  %v736_v32 = vld [vmem:[%s6506_s25 + $0x5c] sm:$0x1] }
  0x2b   : > { %6067 = vmatprep.mubr.msk.bf16.mxu1 %vm434_vm1, %v5275_v59  ;;  %6046 = vmatmul.mubr.msk.bf16.gmra.mxu0 %vm434_vm1, %v6390_v53  ;;  %v1294_v53 = vld [vmem:[%s6506_s25 + $0x30] sm:$0xc]  ;;  %v1296_v59 = vld [vmem:[%s6506_s25 + $0x38] sm:$0x3]  ;;  %v1420_v29 = vrot.slane %v1418_v14, 4  ;;  %v858_v30 = vrot.slane %v856_v18, 4  ;;  %v5280_v44 = vcombine.low %v6671_v16, %v853_v27 }
  0x2c   : > { %6101 = vmatprep.mubr.msk.bf16.mxu0 %vm434_vm1, %v5324_v5  ;;  %v5311_v63 = vrot.slane %v1294_v53, 10  ;;  %v1414_v3 = vrot.slane %v1296_v59, 6  ;;  %v1299_v5 = vld [vmem:[%s6506_s25 + $0x44] sm:$0x3]  ;;  %v1301_v33 = vld [vmem:[%s6506_s25 + $0x4c] sm:$0xf] }
  0x2d   : > { %v1421_v22 = vrot.slane %v1299_v5, 6  ;;  %v863_v35 = vrot.slane %v735_v20, 5  ;;  %v1302_v37 = vld [vmem:[%s6506_s25 + $0x50] sm:$0x3]  ;;  %v5313_v38 = vrot.slane %v1300_v26, 10  ;;  %v1425_v39 = vrot.slane %v1301_v33, 6 }
  0x2e   : > { %v1412_v13 = vsel %vm6559_vm6, %v5311_v63, %v1411_v0  ;;  %v1415_v17 = vsel %vm6559_vm6, %v1413_v9, %v1414_v3  ;;  %v1304_v42 = vld [vmem:[%s6506_s25 + $0x58] sm:$0xf]  ;;  %v1305_v43 = vld [vmem:[%s6506_s25 + $0x5c] sm:$0x3]  ;;  %v737_v49 = vld [vmem:[%s6506_s25 + $0x60] sm:$0xe]  ;;  %v860_v53 = vsel %vm6544_vm5, %v858_v30, %v859_v25 }
  0x2f   : > { %v5328_v28 = vcombine.low %v1412_v13, %v1415_v17  ;;  %v1427_v46 = vrot.slane %v1425_v39, 4  ;;  %v738_v50 = vld [vmem:[%s6506_s25 + $0x64] sm:$0xf]  ;;  %v1422_v51 = vsel %vm6559_vm6, %v1420_v29, %v1421_v22  ;;  %v1432_v54 = vrot.slane %v1304_v42, 6  ;;  %v739_v58 = vld [vmem:[%s6506_s25 + $0x68] sm:$0x1] }
  0x30   : > { %v866_v56 = vrot.slane %v736_v32, 5  ;;  %v1426_v57 = vsel %vm6559_vm6, %v5313_v38, %v1425_v39  ;;  %v870_v59 = vrot.slane %v738_v50, 5  ;;  %v1435_v63 = vrot.slane %v1305_v43, 6  ;;  %v740_v4 = vld [vmem:[%s6506_s25 + $0x6c] sm:$0xe] }
  0x31   : > { %v5266_v0 = vrot.slane %v737_v49, 9  ;;  %v1306_v5 = vld [vmem:[%s6506_s25 + $0x60] sm:$0xc]  ;;  %v1307_v6 = vld [vmem:[%s6506_s25 + $0x64] sm:$0xf]  ;;  %v1434_v7 = vrot.slane %v1432_v54, 4 }
  0x32   : > { %6068 = vmatmul.mubr.msk.bf16.vlgmr.msra.gmra.mxu1 %vm434_vm1, %v5276_v34  ;;  %v5265_v34 = vrot.slane %v734_v19, 9  ;;  %v872_v8 = vrot.slane %v870_v59, 4  ;;  %v873_v9 = vrot.slane %v739_v58, 5  ;;  %v1439_v10 = vrot.slane %v1307_v6, 6  ;;  %v1310_v15 = vld [vmem:[%s6506_s25 + $0x70] sm:$0xf] }
  0x33   : > { %6134 = vmatpush3.bf16.msra.mxu1 %v6552_v31  ;;  %6071 = vmatprep.mubr.msk.bf16.mxu1 %vm434_vm1, %v5277_v41  ;;  %v731_v31 = vld [vmem:[%s6506_s25 + $0x48] sm:$0xe]  ;;  %v1303_v41 = vld [vmem:[%s6506_s25 + $0x54] sm:$0xc]  ;;  %v742_v16 = vld [vmem:[%s6506_s25 + $0x74] sm:$0x1]  ;;  %v1436_v26 = vsel %vm6559_vm6, %v1434_v7, %v1435_v63 }
  0x34   : > { %6102 = vmatmul.mubr.msk.bf16.vlgmr.msra.gmra.mxu0 %vm434_vm1, %v5325_v48  ;;  %6345 = vmatprep.subr.msk.bf16.mxu1 %vm483_vm0, %v6624_v47  ;;  %v5264_v23 = vrot.slane %v731_v31, 9  ;;  %v1428_v48 = vrot.slane %v1302_v37, 6  ;;  %v5314_v62 = vrot.slane %v1303_v41, 10  ;;  %v1308_v31 = vld [vmem:[%s6506_s25 + $0x68] sm:$0x3]  ;;  %v5267_v17 = vrot.slane %v740_v4, 9 }
  0x35   : > { %6168 = vmatpush3.bf16.msra.mxu0 %v6567_v40  ;;  %6105 = vmatprep.mubr.msk.bf16.mxu0 %vm434_vm1, %v5326_v55  ;;  %v5312_v40 = vrot.slane %v1297_v1, 10  ;;  %v865_v55 = vrot.slane %v863_v35, 4  ;;  %v741_v1 = vld [vmem:[%s6506_s25 + $0x70] sm:$0xf]  ;;  %v1442_v19 = vrot.slane %v1308_v31, 6  ;;  %v874_v27 = vsel %vm6544_vm5, %v872_v8, %v873_v9 }
  0x36   : > { %6346 = vmatprep.subr.msk.bf16.mxu0 %vm483_vm0, %v6643_v60  ;;  %v857_v52 = vsel %vm6544_vm5, %v5264_v23, %v856_v18  ;;  %v1429_v61 = vsel %vm6559_vm6, %v1427_v46, %v1428_v48  ;;  %v1441_v18 = vrot.slane %v1439_v10, 4  ;;  %v1433_v20 = vsel %vm6559_vm6, %v5314_v62, %v1432_v54  ;;  %v1309_v22 = vld [vmem:[%s6506_s25 + $0x6c] sm:$0xc]  ;;  %v743_v23 = vld [vmem:[%s6506_s25 + $0x78] sm:$0xe] }
  0x37   : > { %v1419_v45 = vsel %vm6559_vm6, %v5312_v40, %v1418_v14  ;;  %v5281_v3 = vcombine.low %v857_v52, %v860_v53  ;;  %v5330_v13 = vcombine.low %v1426_v57, %v1429_v61  ;;  %v877_v14 = vrot.slane %v741_v1, 5  ;;  %v744_v25 = vld [vmem:[%s6506_s25 + $0x7c] sm:$0xf]  ;;  %v747_v42 = vld [vmem:[%s6506_s25 + $0x88] sm:$0xf] }
  0x38   : > { %v5329_v2 = vcombine.low %v1419_v45, %v1422_v51  ;;  %v5315_v40 = vrot.slane %v1306_v5, 10  ;;  %v884_v29 = vrot.slane %v744_v25, 5  ;;  %v880_v33 = vrot.slane %v742_v16, 5  ;;  %v1312_v45 = vld [vmem:[%s6506_s25 + $0x78] sm:$0xc] }
  0x39   : > { %v879_v32 = vrot.slane %v877_v14, 4  ;;  %v1443_v38 = vsel %vm6559_vm6, %v1441_v18, %v1442_v19  ;;  %v5316_v39 = vrot.slane %v1309_v22, 10  ;;  %v5268_v41 = vrot.slane %v743_v23, 9  ;;  %v1313_v46 = vld [vmem:[%s6506_s25 + $0x7c] sm:$0xf] }
  0x3a   : > { %6072 = vmatmul.mubr.msk.bf16.gmra.mxu1 %vm434_vm1, %v5278_v11  ;;  %v864_v11 = vsel %vm6544_vm5, %v5265_v34, %v863_v35  ;;  %v1311_v34 = vld [vmem:[%s6506_s25 + $0x74] sm:$0x3]  ;;  %v745_v35 = vld [vmem:[%s6506_s25 + $0x80] sm:$0x1]  ;;  %v1440_v37 = vsel %vm6559_vm6, %v5315_v40, %v1439_v10  ;;  %v5331_v43 = vcombine.low %v1433_v20, %v1436_v26  ;;  %v886_v51 = vrot.slane %v884_v29, 4 }
  0x3b   : > { %6075 = vmatprep.mubr.msk.bf16.mxu1 %vm434_vm1, %v5279_v21  ;;  %v871_v21 = vsel %vm6544_vm5, %v5266_v0, %v870_v59  ;;  %v1314_v48 = vld [vmem:[%s6506_s25 + $0x80] sm:$0x3]  ;;  %v1449_v50 = vrot.slane %v1311_v34, 6  ;;  %v887_v52 = vrot.slane %v745_v35, 5  ;;  %v746_v53 = vld [vmem:[%s6506_s25 + $0x84] sm:$0xe]  ;;  %v5332_v54 = vcombine.low %v1440_v37, %v1443_v38 }
  0x3c   : > { %6106 = vmatmul.mubr.msk.bf16.gmra.mxu0 %vm434_vm1, %v5327_v12  ;;  %v867_v12 = vsel %vm6544_vm5, %v865_v55, %v866_v56  ;;  %v748_v55 = vld [vmem:[%s6506_s25 + $0x8c] sm:$0x1]  ;;  %v891_v56 = vrot.slane %v747_v42, 5  ;;  %v1453_v57 = vrot.slane %v1313_v46, 6  ;;  %v878_v58 = vsel %vm6544_vm5, %v5267_v17, %v877_v14  ;;  %v1316_v63 = vld [vmem:[%s6506_s25 + $0x88] sm:$0xf] }
  0x3d   : > { %6109 = vmatprep.mubr.msk.bf16.mxu0 %vm434_vm1, %v5328_v28  ;;  %v1446_v28 = vrot.slane %v1310_v15, 6  ;;  %v5282_v30 = vcombine.low %v864_v11, %v867_v12  ;;  %v881_v59 = vsel %vm6544_vm5, %v879_v32, %v880_v33  ;;  %v5317_v61 = vrot.slane %v1312_v45, 10  ;;  %v750_v0 = vld [vmem:[%s6506_s25 + $0x94] sm:$0xf]  ;;  %v749_v5 = vld [vmem:[%s6506_s25 + $0x90] sm:$0xe] }
  0x3e   : > { %v1456_v62 = vrot.slane %v1314_v48, 6  ;;  %v1455_v4 = vrot.slane %v1453_v57, 4  ;;  %v888_v7 = vsel %vm6544_vm5, %v886_v51, %v887_v52  ;;  %v894_v8 = vrot.slane %v748_v55, 5  ;;  %v751_v9 = vld [vmem:[%s6506_s25 + $0x98] sm:$0x1] }
  0x3f   : > { %v1448_v49 = vrot.slane %v1446_v28, 4  ;;  %v1447_v1 = vsel %vm6559_vm6, %v5316_v39, %v1446_v28  ;;  %v898_v31 = vrot.slane %v750_v0, 5  ;;  %v893_v10 = vrot.slane %v891_v56, 4  ;;  %v1315_v11 = vld [vmem:[%s6506_s25 + $0x84] sm:$0xc] }
  0x40   : > { %v1317_v12 = vld [vmem:[%s6506_s25 + $0x8c] sm:$0x3]  ;;  %v5284_v14 = vcombine.low %v878_v58, %v881_v59  ;;  %v1454_v15 = vsel %vm6559_vm6, %v5317_v61, %v1453_v57  ;;  %v1457_v16 = vsel %vm6559_vm6, %v1455_v4, %v1456_v62  ;;  %v5270_v17 = vrot.slane %v749_v5, 9  ;;  %v753_v40 = vld [vmem:[%s6506_s25 + $0xa0] sm:$0xf] }
  0x41   : > { %v1450_v6 = vsel %vm6559_vm6, %v1448_v49, %v1449_v50  ;;  %v1319_v18 = vld [vmem:[%s6506_s25 + $0x94] sm:$0xf]  ;;  %v901_v22 = vrot.slane %v751_v9, 5  ;;  %v1318_v23 = vld [vmem:[%s6506_s25 + $0x90] sm:$0xc]  ;;  %v1463_v28 = vrot.slane %v1317_v12, 6  ;;  %v895_v32 = vsel %vm6544_vm5, %v893_v10, %v894_v8 }
  0x42   : > { %6076 = vmatmul.mubr.msk.bf16.gmra.mxu1 %vm434_vm1, %v5280_v44  ;;  %v5283_v44 = vcombine.low %v871_v21, %v874_v27  ;;  %v5333_v19 = vcombine.low %v1447_v1, %v1450_v6  ;;  %v900_v21 = vrot.slane %v898_v31, 4  ;;  %v1320_v25 = vld [vmem:[%s6506_s25 + $0x98] sm:$0x3]  ;;  %v5318_v27 = vrot.slane %v1315_v11, 10  ;;  %v752_v35 = vld [vmem:[%s6506_s25 + $0x9c] sm:$0xe] }
  0x43   : > { %6079 = vmatprep.mubr.msk.bf16.mxu1 %vm434_vm1, %v5281_v3  ;;  %v5269_v3 = vrot.slane %v746_v53, 9  ;;  %v5334_v33 = vcombine.low %v1454_v15, %v1457_v16  ;;  %v905_v37 = vrot.slane %v753_v40, 5  ;;  %v756_v38 = vld [vmem:[%s6506_s25 + $0xac] sm:$0xf]  ;;  %v754_v39 = vld [vmem:[%s6506_s25 + $0xa4] sm:$0x1] }
  0x44   : > { %6110 = vmatmul.mubr.msk.bf16.gmra.mxu0 %vm434_vm1, %v5329_v2  ;;  %v885_v2 = vsel %vm6544_vm5, %v5268_v41, %v884_v29  ;;  %v1467_v29 = vrot.slane %v1319_v18, 6  ;;  %v5319_v41 = vrot.slane %v1318_v23, 10  ;;  %v902_v45 = vsel %vm6544_vm5, %v900_v21, %v901_v22  ;;  %v6793_v46 = vld [vmem:[%s6506_s25 + $0x9c] sm:$0xc]  ;;  %v6798_v51 = vld [vmem:[%s6506_s25 + $0xa4] sm:$0x3] }
  0x45   : > { %6113 = vmatprep.mubr.msk.bf16.mxu0 %vm434_vm1, %v5330_v13  ;;  %v1460_v13 = vrot.slane %v1316_v63, 6  ;;  %v5285_v20 = vcombine.low %v885_v2, %v888_v7  ;;  %v892_v26 = vsel %vm6544_vm5, %v5269_v3, %v891_v56  ;;  %v5271_v50 = vrot.slane %v752_v35, 9  ;;  %v755_v52 = vld [vmem:[%s6506_s25 + $0xa8] sm:$0xe]  ;;  %v757_v58 = vld [vmem:[%s6506_s25 + $0xb0] sm:$0x1] }
  0x46   : > { %v1469_v42 = vrot.slane %v1467_v29, 4  ;;  %v5286_v49 = vcombine.low %v892_v26, %v895_v32  ;;  %v912_v53 = vrot.slane %v756_v38, 5  ;;  %v907_v56 = vrot.slane %v905_v37, 4  ;;  %v6808_v59 = vld [vmem:[%s6506_s25 + $0xac] sm:$0xf] }
  0x47   : > { %v1462_v34 = vrot.slane %v1460_v13, 4  ;;  %v908_v57 = vrot.slane %v754_v39, 5  ;;  %v6812_v62 = vsel %vm6559_vm6, %v5319_v41, %v1467_v29  ;;  %v5320_v0 = vrot.slane %v6793_v46, 10  ;;  %v6820_v1 = vld [vmem:[%s6506_s25 + $0xa8] sm:$0xc] }
  0x48   : > { %v6823_v2 = vld [vmem:[%s6506_s25 + $0xb0] sm:$0x3]  ;;  %v1477_v4 = vrot.slane %v6798_v51, 6  ;;  %v5272_v5 = vrot.slane %v755_v52, 9  ;;  %v1481_v6 = vrot.slane %v6808_v59, 6  ;;  %v914_v8 = vrot.slane %v912_v53, 4 }
  0x49   : > { %v1464_v55 = vsel %vm6559_vm6, %v1462_v34, %v1463_v28  ;;  %v915_v9 = vrot.slane %v757_v58, 5  ;;  %v5321_v11 = vrot.slane %v6820_v1, 10  ;;  %v1484_v12 = vrot.slane %v6823_v2, 6  ;;  %v6850_v16 = vld [vmem:[%s6506_s25 + $0xb8] sm:$0xf] }
  0x4a   : > { %6080 = vmatmul.mubr.msk.bf16.gmra.mxu1 %vm434_vm1, %v5282_v30  ;;  %v6779_v30 = vld [vmem:[%s6506_s25 + $0xa0] sm:$0xf]  ;;  %v1483_v15 = vrot.slane %v1481_v6, 4  ;;  %v6858_v18 = vld [vmem:[%s6506_s25 + $0x1c] sm:$0xf]  ;;  %v1488_v29 = vrot.slane %v6850_v16, 6 }
  0x4b   : > { %6083 = vmatprep.mubr.msk.bf16.mxu1 %vm434_vm1, %v5283_v44  ;;  %v899_v44 = vsel %vm6544_vm5, %v5270_v17, %v898_v31  ;;  %v1474_v48 = vrot.slane %v6779_v30, 6  ;;  %v6832_v31 = vld [vmem:[%s6506_s25 + $0xb8] sm:$0xf]  ;;  %v6854_v17 = vld [vmem:[%s6506_s25 + $0xb4] sm:$0xe]  ;;  %v1482_v30 = vsel %vm6559_vm6, %v5321_v11, %v1481_v6  ;;  %v2372_v35 = vrot.slane %v6858_v18, 5 }
  0x4c   : > { %6114 = vmatmul.mubr.msk.bf16.gmra.mxu0 %vm434_vm1, %v5331_v43  ;;  %v1470_v43 = vrot.slane %v1320_v25, 6  ;;  %v5287_v61 = vcombine.low %v899_v44, %v902_v45  ;;  %v919_v40 = vrot.slane %v6832_v31, 5  ;;  %v6868_v21 = vld [vmem:[%s6506_s25 + $0xbc] sm:$0x1]  ;;  %v6871_v22 = vld [vmem:[%s6506_s25 + $0xb4] sm:$0xc]  ;;  %v1485_v34 = vsel %vm6559_vm6, %v1483_v15, %v1484_v12 }
  0x4d   : > { %6117 = vmatprep.mubr.msk.bf16.mxu0 %vm434_vm1, %v5332_v54  ;;  %v1461_v54 = vsel %vm6559_vm6, %v5318_v27, %v1460_v13  ;;  %v6827_v3 = vrot.slane %v1474_v48, 4  ;;  %v6841_v13 = vsel %vm6544_vm5, %v5271_v50, %v905_v37  ;;  %v6874_v23 = vld [vmem:[%s6506_s25 + $0xbc] sm:$0x3]  ;;  %v6447_v25 = vmov 0.0   ;;  %v5421_v32 = vld [vmem:[%s6506_s25 + $0x18] sm:$0xe] }
  0x4e   : > { %v6816_v63 = vsel %vm6559_vm6, %v1469_v42, %v1470_v43  ;;  %v5335_v7 = vcombine.low %v1461_v54, %v1464_v55  ;;  %275 = vst.msk [vmem:[#allocation2 + $0x90] sm:$0xff] %vm256_vm7, %v6447_v25  ;;  %257 = vst.msk [vmem:[#allocation2] sm:$0xff] %vm256_vm7, %v6447_v25  ;;  %v1475_v27 = vsel %vm6559_vm6, %v5320_v0, %v1474_v48  ;;  %v921_v38 = vrot.slane %v919_v40, 4  ;;  %v5423_v41 = vld [vmem:[%s6506_s25 + $0x20] sm:$0x1]  ;;  %v6391_v59 = vld [vmem:[%s6506_s25 + $0x18] sm:$0xff]  }
  0x4f   : > { %v5336_v10 = vcombine.low %v6812_v62, %v6816_v63  ;;  %258 = vst.msk [vmem:[#allocation2 + $0x8] sm:$0xff] %vm256_vm7, %v6447_v25  ;;  %259 = vst.msk [vmem:[#allocation2 + $0x10] sm:$0xff] %vm256_vm7, %v6447_v25  ;;  %v1478_v28 = vsel %vm6559_vm6, %v6827_v3, %v1477_v4  ;;  %v922_v39 = vrot.slane %v6868_v21, 5  ;;  %v5322_v43 = vrot.slane %v6871_v22, 10  ;;  %v5425_v51 = vld [vmem:[%s6506_s25 + $0x28] sm:$0xf] }
  0x50   : > { %260 = vst.msk [vmem:[#allocation2 + $0x18] sm:$0xff] %vm256_vm7, %v6447_v25  ;;  %261 = vst.msk [vmem:[#allocation2 + $0x20] sm:$0xff] %vm256_vm7, %v6447_v25  ;;  %v5337_v42 = vcombine.low %v1475_v27, %v1478_v28  ;;  %v5338_v44 = vcombine.low %v1482_v30, %v1485_v34  ;;  %v1490_v45 = vrot.slane %v1488_v29, 4  ;;  %v1491_v46 = vrot.slane %v6874_v23, 6  ;;  %v5428_v54 = vld [vmem:[%s6506_s25 + $0x34] sm:$0xf] }
  0x51   : > { %262 = vst.msk [vmem:[#allocation2 + $0x28] sm:$0xff] %vm256_vm7, %v6447_v25  ;;  %263 = vst.msk [vmem:[#allocation2 + $0x30] sm:$0xff] %vm256_vm7, %v6447_v25  ;;  %v5469_v48 = vrot.slane %v5421_v32, 9  ;;  %v2375_v50 = vrot.slane %v5423_v41, 5  ;;  %v1489_v55 = vsel %vm6559_vm6, %v5322_v43, %v1488_v29  ;;  %v5424_v63 = vld [vmem:[%s6506_s25 + $0x24] sm:$0xe] }
  0x52   : > { %6084 = vmatmul.mubr.msk.bf16.gmra.mxu1 %vm434_vm1, %v5284_v14  ;;  %v6845_v14 = vsel %vm6544_vm5, %v907_v56, %v908_v57  ;;  %264 = vst.msk [vmem:[#allocation2 + $0x38] sm:$0xff] %vm256_vm7, %v6447_v25  ;;  %265 = vst.msk [vmem:[#allocation2 + $0x40] sm:$0xff] %vm256_vm7, %v6447_v25  ;;  %v1492_v56 = vsel %vm6559_vm6, %v1490_v45, %v1491_v46  ;;  %v2379_v57 = vrot.slane %v5425_v51, 5  ;;  %v5426_v0 = vld [vmem:[%s6506_s25 + $0x2c] sm:$0x1]  ;;  %v2386_v1 = vrot.slane %v5428_v54, 5 }
  0x53   : > { %6087 = vmatprep.mubr.msk.bf16.mxu1 %vm434_vm1, %v5285_v20  ;;  %v916_v20 = vsel %vm6544_vm5, %v914_v8, %v915_v9  ;;  %266 = vst.msk [vmem:[#allocation2 + $0x48] sm:$0xff] %vm256_vm7, %v6447_v25  ;;  %267 = vst.msk [vmem:[#allocation2 + $0x50] sm:$0xff] %vm256_vm7, %v6447_v25  ;;  %v5288_v26 = vcombine.low %v6841_v13, %v6845_v14  ;;  %v5427_v2 = vld [vmem:[%s6506_s25 + $0x30] sm:$0xe]  ;;  %v5429_v3 = vld [vmem:[%s6506_s25 + $0x38] sm:$0x1]  ;;  %v5339_v4 = vcombine.low %v1489_v55, %v1492_v56 }
  0x54   : > { %6118 = vmatmul.mubr.msk.bf16.gmra.mxu0 %vm434_vm1, %v5333_v19  ;;  %v6863_v19 = vsel %vm6544_vm5, %v5272_v5, %v912_v53  ;;  %268 = vst.msk [vmem:[#allocation2 + $0x58] sm:$0xff] %vm256_vm7, %v6447_v25  ;;  %269 = vst.msk [vmem:[#allocation2 + $0x60] sm:$0xff] %vm256_vm7, %v6447_v25  ;;  %v923_v53 = vsel %vm6544_vm5, %v921_v38, %v922_v39  ;;  %v5470_v6 = vrot.slane %v5424_v63, 9  ;;  %v2382_v8 = vrot.slane %v5426_v0, 5  ;;  %v5431_v11 = vld [vmem:[%s6506_s25 + $0x40] sm:$0xf] }
  0x55   : > { %6121 = vmatprep.mubr.msk.bf16.mxu0 %vm434_vm1, %v5334_v33  ;;  %270 = vst.msk [vmem:[#allocation2 + $0x68] sm:$0xff] %vm256_vm7, %v6447_v25  ;;  %271 = vst.msk [vmem:[#allocation2 + $0x70] sm:$0xff] %vm256_vm7, %v6447_v25  ;;  %v5273_v33 = vrot.slane %v6854_v17, 9  ;;  %v5289_v37 = vcombine.low %v6863_v19, %v916_v20  ;;  %v5471_v9 = vrot.slane %v5427_v2, 9  ;;  %v2388_v31 = vrot.slane %v2386_v1, 4  ;;  %v6393_v23 = vld [vmem:[%s6506_s25 + $0x30] sm:$0xff]  }
  0x56   : > { %272 = vst.msk [vmem:[#allocation2 + $0x78] sm:$0xff] %vm256_vm7, %v6447_v25  ;;  %273 = vst.msk [vmem:[#allocation2 + $0x80] sm:$0xff] %vm256_vm7, %v6447_v25  ;;  %v5434_v12 = vld [vmem:[%s6506_s25 + $0x4c] sm:$0xf]  ;;  %v5430_v13 = vld [vmem:[%s6506_s25 + $0x3c] sm:$0xe]  ;;  %v2380_v15 = vsel %vm6544_vm5, %v5470_v6, %v2379_v57 }
  0x57   : > { %274 = vst.msk [vmem:[#allocation2 + $0x88] sm:$0xff] %vm256_vm7, %v6447_v25  ;;  %276 = vst.msk [vmem:[#allocation2 + $0x98] sm:$0xff] %vm256_vm7, %v6447_v25  ;;  %v920_v52 = vsel %vm6544_vm5, %v5273_v33, %v919_v40  ;;  %v5432_v14 = vld [vmem:[%s6506_s25 + $0x44] sm:$0x1]  ;;  %v2393_v17 = vrot.slane %v5431_v11, 5  ;;  %v2387_v18 = vsel %vm6544_vm5, %v5471_v9, %v2386_v1  ;;  %v2400_v21 = vrot.slane %v5434_v12, 5 }
  0x58   : > { %277 = vst.msk [vmem:[#allocation2 + $0xa0] sm:$0xff] %vm256_vm7, %v6447_v25  ;;  %278 = vst.msk [vmem:[#allocation2 + $0xa8] sm:$0xff] %vm256_vm7, %v6447_v25  ;;  %v5290_v58 = vcombine.low %v920_v52, %v923_v53  ;;  %v6392_v40 = vld [vmem:[%s6506_s25 + $0x24] sm:$0xff]   ;;  %v3179_v22 = vsel %vm483_vm0, %v6624_v47, 0  ;;  %v3602_v27 = vsel %vm483_vm0, %v6643_v60, 0  ;;  %v5472_v28 = vrot.slane %v5430_v13, 9 }
  0x59   : > { %279 = vst.msk [vmem:[#allocation2 + $0xb0] sm:$0xff] %vm256_vm7, %v6447_v25  ;;  %280 = vst.msk [vmem:[#allocation2 + $0xb8] sm:$0xff] %vm256_vm7, %v6447_v25  ;;  %v5433_v20 = vld [vmem:[%s6506_s25 + $0x48] sm:$0xe]  ;;  %v2396_v29 = vrot.slane %v5432_v14, 5  ;;  %v2395_v33 = vrot.slane %v2393_v17, 4 }
  0x5a   : > { %6088 = vmatmul.mubr.msk.bf16.gmra.mxu1 %vm434_vm1, %v5286_v49  ;;  %281 = vst.msk [vmem:[#allocation2 + $0xc0] sm:$0xff] %vm256_vm7, %v6447_v25  ;;  %282 = vst.msk [vmem:[#allocation2 + $0xc8] sm:$0xff] %vm256_vm7, %v6447_v25  ;;  %v2374_v49 = vrot.slane %v2372_v35, 4  ;;  %v5473_v30 = vrot.slane %v5433_v20, 9  ;;  %v5437_v34 = vld [vmem:[%s6506_s25 + $0x58] sm:$0xf]  ;;  %v2394_v38 = vsel %vm6544_vm5, %v5472_v28, %v2393_v17 }
  0x5b   : > { %6091 = vmatprep.mubr.msk.bf16.mxu1 %vm434_vm1, %v5287_v61  ;;  %283 = vst.msk [vmem:[#allocation2 + $0xd0] sm:$0xff] %vm256_vm7, %v6447_v25  ;;  %284 = vst.msk [vmem:[#allocation2 + $0xd8] sm:$0xff] %vm256_vm7, %v6447_v25  ;;  %v2373_v61 = vsel %vm6544_vm5, %v5469_v48, %v2372_v35  ;;  %v2402_v47 = vrot.slane %v2400_v21, 4  ;;  %v6394_v60 = vld [vmem:[%s6506_s25 + $0x3c] sm:$0xff]   ;;  %v2397_v39 = vsel %vm6544_vm5, %v2395_v33, %v2396_v29  ;;  %v5436_v41 = vld [vmem:[%s6506_s25 + $0x54] sm:$0xe] }
  0x5c   : > { %6122 = vmatmul.mubr.msk.bf16.gmra.mxu0 %vm434_vm1, %v5335_v7  ;;  %285 = vst.msk [vmem:[#allocation2 + $0xe0] sm:$0xff] %vm256_vm7, %v6447_v25  ;;  %286 = vst.msk [vmem:[#allocation2 + $0xe8] sm:$0xff] %vm256_vm7, %v6447_v25  ;;  %v2376_v62 = vsel %vm6544_vm5, %v2374_v49, %v2375_v50  ;;  %v2381_v7 = vrot.slane %v2379_v57, 4  ;;  %v2407_v43 = vrot.slane %v5437_v34, 5  ;;  %v2401_v45 = vsel %vm6544_vm5, %v5473_v30, %v2400_v21  ;;  %v5439_v48 = vld [vmem:[%s6506_s25 + $0x60] sm:$0xe] }
  0x5d   : > { %287 = vst.msk [vmem:[#allocation2 + $0xf0] sm:$0xff] %vm256_vm7, %v6447_v25  ;;  %288 = vst.msk [vmem:[#allocation2 + $0xf8] sm:$0xff] %vm256_vm7, %v6447_v25  ;;  %6125 = vmatprep.mubr.msk.bf16.mxu0 %vm434_vm1, %v5336_v10  ;;  %v5486_v5 = vcombine.low %v2373_v61, %v2376_v62  ;;  %v2389_v10 = vrot.slane %v5429_v3, 5  ;;  %v5435_v25 = vld [vmem:[%s6506_s25 + $0x50] sm:$0x1]  ;;  %v5489_v51 = vcombine.low %v2394_v38, %v2397_v39  ;;  %v5474_v53 = vrot.slane %v5436_v41, 9 }
  0x5e   : > { %v2383_v16 = vsel %vm6544_vm5, %v2381_v7, %v2382_v8  ;;  %v2403_v35 = vrot.slane %v5435_v25, 5  ;;  %v5441_v50 = vld [vmem:[%s6506_s25 + $0x68] sm:$0x1]  ;;  %v2409_v54 = vrot.slane %v2407_v43, 4  ;;  %v5443_v56 = vld [vmem:[%s6506_s25 + $0x70] sm:$0xf] }
  0x5f   : > { %v2390_v19 = vsel %vm6544_vm5, %v2388_v31, %v2389_v10  ;;  %v5475_v57 = vrot.slane %v5439_v48, 9  ;;  %v5446_v61 = vld [vmem:[%s6506_s25 + $0x7c] sm:$0xf]  ;;  %v2421_v62 = vrot.slane %v5443_v56, 5  ;;  %v2408_v63 = vsel %vm6544_vm5, %v5474_v53, %v2407_v43  ;;  %v5442_v1 = vld [vmem:[%s6506_s25 + $0x6c] sm:$0xe] }
  0x60   : > { %v5488_v32 = vcombine.low %v2387_v18, %v2390_v19  ;;  %v2404_v46 = vsel %vm6544_vm5, %v2402_v47, %v2403_v35  ;;  %v5444_v2 = vld [vmem:[%s6506_s25 + $0x74] sm:$0x1]  ;;  %v2428_v6 = vrot.slane %v5446_v61, 5  ;;  %v6397_v7 = vld [vmem:[%s6506_s25 + $0x60] sm:$0xff]   ;;  %v5445_v8 = vld [vmem:[%s6506_s25 + $0x78] sm:$0xe] }
  0x61   : > { %v5490_v52 = vcombine.low %v2401_v45, %v2404_v46  ;;  %v6396_v3 = vld [vmem:[%s6506_s25 + $0x54] sm:$0xff]   ;;  %v5447_v9 = vld [vmem:[%s6506_s25 + $0x80] sm:$0x1]  ;;  %v5476_v10 = vrot.slane %v5442_v1, 9  ;;  %v2423_v11 = vrot.slane %v2421_v62, 4  ;;  %v2424_v12 = vrot.slane %v5444_v2, 5 }
  0x62   : > { %6092 = vmatmul.mubr.msk.bf16.gmra.mxu1 %vm434_vm1, %v5288_v26  ;;  %v5487_v26 = vcombine.low %v2380_v15, %v2383_v16  ;;  %v5449_v14 = vld [vmem:[%s6506_s25 + $0x88] sm:$0xf]  ;;  %v5477_v15 = vrot.slane %v5445_v8, 9  ;;  %v2430_v16 = vrot.slane %v2428_v6, 4  ;;  %v2431_v17 = vrot.slane %v5447_v9, 5  ;;  %v6399_v33 = vld [vmem:[%s6506_s25 + $0x78] sm:$0xff]  }
  0x63   : > { %6095 = vmatprep.mubr.msk.bf16.mxu1 %vm434_vm1, %v5289_v37  ;;  %v5440_v37 = vld [vmem:[%s6506_s25 + $0x64] sm:$0xf]  ;;  %v5452_v18 = vld [vmem:[%s6506_s25 + $0x94] sm:$0xf]  ;;  %v2422_v19 = vsel %vm6544_vm5, %v5476_v10, %v2421_v62  ;;  %v2425_v20 = vsel %vm6544_vm5, %v2423_v11, %v2424_v12  ;;  %v5451_v25 = vld [vmem:[%s6506_s25 + $0x90] sm:$0xe] }
  0x64   : > { %6126 = vmatmul.mubr.msk.bf16.gmra.mxu0 %vm434_vm1, %v5337_v42  ;;  %v5438_v42 = vld [vmem:[%s6506_s25 + $0x5c] sm:$0x1]  ;;  %v2414_v49 = vrot.slane %v5440_v37, 5  ;;  %v5448_v21 = vld [vmem:[%s6506_s25 + $0x84] sm:$0xe]  ;;  %v2432_v28 = vsel %vm6544_vm5, %v2430_v16, %v2431_v17  ;;  %v2442_v29 = vrot.slane %v5452_v18, 5 }
  0x65   : > { %6129 = vmatprep.mubr.msk.bf16.mxu0 %vm434_vm1, %v5338_v44  ;;  %v6395_v44 = vld [vmem:[%s6506_s25 + $0x48] sm:$0xff]   ;;  %v2410_v55 = vrot.slane %v5438_v42, 5  ;;  %v5453_v30 = vld [vmem:[%s6506_s25 + $0x98] sm:$0x1]  ;;  %v5478_v34 = vrot.slane %v5448_v21, 9  ;;  %v5479_v37 = vrot.slane %v5451_v25, 9 }
  0x66   : > { %v5454_v38 = vld [vmem:[%s6506_s25 + $0x9c] sm:$0xe]  ;;  %v5455_v39 = vld [vmem:[%s6506_s25 + $0xa0] sm:$0xf]  ;;  %v7060_v41 = vld [vmem:[%s8547_s1 + $0x10] sm:$0x3] }
  0x67   : > { %v2411_v0 = vsel %vm6544_vm5, %v2409_v54, %v2410_v55  ;;  %v2444_v42 = vrot.slane %v2442_v29, 4  ;;  %v2445_v43 = vrot.slane %v5453_v30, 5  ;;  %v2449_v45 = vrot.slane %v5455_v39, 5  ;;  %v5457_v55 = vld [vmem:[%s6506_s25 + $0xa8] sm:$0xe] }
  0x68   : > { %v5491_v31 = vcombine.low %v2408_v63, %v2411_v0  ;;  %v5480_v54 = vrot.slane %v5454_v38, 9  ;;  %v5461_v63 = vld [vmem:[%s6506_s25 + $0xb8] sm:$0xf]  ;;  %v5481_v0 = vrot.slane %v5457_v55, 9  ;;  %v5463_v9 = vld [vmem:[%s6506_s25 + $0xc0] sm:$0xe] }
  0x69   : > { %v2446_v53 = vsel %vm6544_vm5, %v2444_v42, %v2445_v43  ;;  %v2463_v8 = vrot.slane %v5461_v63, 5  ;;  %v5522_v38 = vld [vmem:[%s6506_s25 + $0x28] sm:$0xf] }
  0x6a   : > { %6096 = vmatmul.mubr.msk.bf16.gmra.mxu1 %vm434_vm1, %v5290_v58  ;;  %v2416_v58 = vrot.slane %v2414_v49, 4 }
  0x6b   : > { %6135 = vmatprep.mubr.msk.bf16.mxu1 %vm434_vm1, %v6391_v59  ;;  %v2417_v59 = vrot.slane %v5441_v50, 5  ;;  %v6400_v50 = vld [vmem:[%s6506_s25 + $0x84] sm:$0xff]   ;;  %v2465_v17 = vrot.slane %v2463_v8, 4 }
  0x6c   : > { %6130 = vmatmul.mubr.msk.bf16.gmra.mxu0 %vm434_vm1, %v5339_v4  ;;  %v2415_v4 = vsel %vm6544_vm5, %v5475_v57, %v2414_v49  ;;  %v5456_v49 = vld [vmem:[%s6506_s25 + $0xa4] sm:$0x1]  ;;  %v5459_v57 = vld [vmem:[%s6506_s25 + $0xb0] sm:$0x1] }
  0x6d   : > { %6169 = vmatprep.mubr.msk.bf16.mxu0 %vm434_vm1, %v5486_v5  ;;  %v2418_v5 = vsel %vm6544_vm5, %v2416_v58, %v2417_v59  ;;  %v2451_v59 = vrot.slane %v2449_v45, 4  ;;  %v2452_v61 = vrot.slane %v5456_v49, 5  ;;  %v2459_v2 = vrot.slane %v5459_v57, 5 }
  0x6e   : > { %v5492_v13 = vcombine.low %v2415_v4, %v2418_v5  ;;  %v5462_v4 = vld [vmem:[%s6506_s25 + $0xbc] sm:$0x1]  ;;  %v5464_v5 = vld [vmem:[%s6506_s25 + $0xc4] sm:$0xf] }
  0x6f   : > { %v2470_v12 = vrot.slane %v5464_v5, 5  ;;  %v2466_v18 = vrot.slane %v5462_v4, 5 }
  0x72   : > { %6136 = vmatmul.mubr.msk.bf16.vlgmr.msra.gmra.mxu1 %vm434_vm1, %v6392_v40  ;;  %v7033_v40 = vld [vmem:[%s8547_s1 + $0xe] sm:$0x3] }
  0x73   : > { %6202 = vmatpush3.bf16.msra.mxu1 %v3179_v22  ;;  %6139 = vmatprep.mubr.msk.bf16.mxu1 %vm434_vm1, %v6393_v23  ;;  %v2435_v22 = vrot.slane %v5449_v14, 5  ;;  %v5450_v23 = vld [vmem:[%s6506_s25 + $0x8c] sm:$0x1] }
  0x74   : > { %6170 = vmatmul.mubr.msk.bf16.vlgmr.msra.gmra.mxu0 %vm434_vm1, %v5487_v26  ;;  %6347 = vmatprep.subr.msk.bf16.mxu1 %vm483_vm0, %v7033_v40  ;;  %v6398_v26 = vld [vmem:[%s6506_s25 + $0x6c] sm:$0xff]   ;;  %v2438_v35 = vrot.slane %v5450_v23, 5  ;;  %v2472_v23 = vrot.slane %v2470_v12, 4 }
  0x75   : > { %6236 = vmatpush3.bf16.msra.mxu0 %v3602_v27  ;;  %6173 = vmatprep.mubr.msk.bf16.mxu0 %vm434_vm1, %v5488_v32  ;;  %v2429_v27 = vsel %vm6544_vm5, %v5477_v15, %v2428_v6  ;;  %v5493_v32 = vcombine.low %v2422_v19, %v2425_v20  ;;  %v2437_v47 = vrot.slane %v2435_v22, 4  ;;  %v2436_v46 = vsel %vm6544_vm5, %v5478_v34, %v2435_v22  ;;  %v6403_v14 = vld [vmem:[%s6506_s25 + $0xa8] sm:$0xff]   ;;  %v5467_v20 = vld [vmem:[%s6506_s25 + $0xd0] sm:$0xf]  ;;  %v5519_v22 = vld [vmem:[%s6506_s25 + $0x1c] sm:$0xf] }
  0x76   : > { %6348 = vmatprep.subr.msk.bf16.mxu0 %vm483_vm0, %v7060_v41  ;;  %v2450_v6 = vsel %vm6544_vm5, %v5480_v54, %v2449_v45  ;;  %v5465_v15 = vld [vmem:[%s6506_s25 + $0xc8] sm:$0x1]  ;;  %v5483_v19 = vrot.slane %v5463_v9, 9  ;;  %v2477_v30 = vrot.slane %v5467_v20, 5  ;;  %v5518_v34 = vld [vmem:[%s6506_s25 + $0x18] sm:$0xc] }
  0x77   : > { %v2439_v48 = vsel %vm6544_vm5, %v2437_v47, %v2438_v35  ;;  %v2473_v25 = vrot.slane %v5465_v15, 5  ;;  %v5520_v47 = vld [vmem:[%s6506_s25 + $0x20] sm:$0x3]  ;;  %v5566_v42 = vrot.slane %v5518_v34, 10  ;;  %v5524_v54 = vld [vmem:[%s6506_s25 + $0x30] sm:$0xc] }
  0x78   : > { %v5495_v58 = vcombine.low %v2436_v46, %v2439_v48  ;;  %v2471_v35 = vsel %vm6544_vm5, %v5483_v19, %v2470_v12  ;;  %v2479_v48 = vrot.slane %v2477_v30, 4  ;;  %v5531_v9 = vld [vmem:[%s6506_s25 + $0x4c] sm:$0xf]  ;;  %v5529_v15 = vld [vmem:[%s6506_s25 + $0x44] sm:$0x3]  ;;  %v6408_v20 = vld [vmem:[%s6506_s25 + $0x3c] sm:$0xff]  }
  0x79   : > { %v4734_v34 = vsel %vm483_vm0, %v7060_v41, 0  ;;  %v5533_v41 = vld [vmem:[%s6506_s25 + $0x54] sm:$0xc] }
  0x7a   : > { %6140 = vmatmul.mubr.msk.bf16.gmra.mxu1 %vm434_vm1, %v6394_v60  ;;  %v5494_v60 = vcombine.low %v2429_v27, %v2432_v28  ;;  %v5466_v27 = vld [vmem:[%s6506_s25 + $0xcc] sm:$0xe]  ;;  %v2938_v28 = vrot.slane %v5519_v22, 6 }
  0x7b   : > { %6143 = vmatprep.mubr.msk.bf16.mxu1 %vm434_vm1, %v6395_v44  ;;  %v5458_v44 = vld [vmem:[%s6506_s25 + $0xac] sm:$0xf]  ;;  %v5484_v46 = vrot.slane %v5466_v27, 9 }
  0x7c   : > { %6174 = vmatmul.mubr.msk.bf16.gmra.mxu0 %vm434_vm1, %v5489_v51  ;;  %v6401_v51 = vld [vmem:[%s6506_s25 + $0x90] sm:$0xff]   ;;  %v2456_v56 = vrot.slane %v5458_v44, 5  ;;  %v2940_v43 = vrot.slane %v2938_v28, 4  ;;  %v2941_v44 = vrot.slane %v5520_v47, 6  ;;  %v2939_v55 = vsel %vm6559_vm6, %v5566_v42, %v2938_v28  ;;  %v5536_v42 = vld [vmem:[%s6506_s25 + $0x60] sm:$0xc] }
  0x7d   : > { %6177 = vmatprep.mubr.msk.bf16.mxu0 %vm434_vm1, %v5490_v52  ;;  %v2443_v52 = vsel %vm6544_vm5, %v5479_v37, %v2442_v29  ;;  %v2474_v37 = vsel %vm6544_vm5, %v2472_v23, %v2473_v25  ;;  %v2962_v25 = vrot.slane %v5529_v15, 6 }
  0x7e   : > { %v5496_v62 = vcombine.low %v2443_v52, %v2446_v53  ;;  %v2458_v1 = vrot.slane %v2456_v56, 4  ;;  %v2457_v10 = vsel %vm6544_vm5, %v5481_v0, %v2456_v56  ;;  %v5500_v45 = vcombine.low %v2471_v35, %v2474_v37  ;;  %v5523_v52 = vld [vmem:[%s6506_s25 + $0x2c] sm:$0x3] }
  0x7f   : > { %v2945_v53 = vrot.slane %v5522_v38, 6  ;;  %v2942_v56 = vsel %vm6559_vm6, %v2940_v43, %v2941_v44  ;;  %v5535_v38 = vld [vmem:[%s6506_s25 + $0x5c] sm:$0x3]  ;;  %v5538_v43 = vld [vmem:[%s6506_s25 + $0x68] sm:$0x3] }
  0x80   : > { %v2460_v11 = vsel %vm6544_vm5, %v2458_v1, %v2459_v2  ;;  %v5583_v0 = vcombine.low %v2939_v55, %v2942_v56  ;;  %v2948_v2 = vrot.slane %v5523_v52, 6  ;;  %v6411_v55 = vld [vmem:[%s6506_s25 + $0x60] sm:$0xff]   ;;  %v5543_v56 = vld [vmem:[%s6506_s25 + $0x7c] sm:$0xf] }
  0x81   : > { %v5498_v21 = vcombine.low %v2457_v10, %v2460_v11  ;;  %v2947_v1 = vrot.slane %v2945_v53, 4 }
  0x82   : > { %6144 = vmatmul.mubr.msk.bf16.gmra.mxu1 %vm434_vm1, %v6396_v3  ;;  %v5460_v3 = vld [vmem:[%s6506_s25 + $0xb4] sm:$0xe] }
  0x83   : > { %6147 = vmatprep.mubr.msk.bf16.mxu1 %vm434_vm1, %v6397_v7  ;;  %v2453_v7 = vsel %vm6544_vm5, %v2451_v59, %v2452_v61  ;;  %v5482_v16 = vrot.slane %v5460_v3, 9  ;;  %v5526_v61 = vld [vmem:[%s6506_s25 + $0x38] sm:$0x3]  ;;  %v5568_v3 = vrot.slane %v5524_v54, 10  ;;  %v2949_v10 = vsel %vm6559_vm6, %v2947_v1, %v2948_v2  ;;  %v5540_v54 = vld [vmem:[%s6506_s25 + $0x70] sm:$0xf] }
  0x84   : > { %6178 = vmatmul.mubr.msk.bf16.gmra.mxu0 %vm434_vm1, %v5491_v31  ;;  %v6402_v31 = vld [vmem:[%s6506_s25 + $0x9c] sm:$0xff]   ;;  %v2994_v1 = vrot.slane %v5543_v56, 6  ;;  %v5542_v2 = vld [vmem:[%s6506_s25 + $0x78] sm:$0xc]  ;;  %v7248_v56 = vld [vmem:[%s6506_s25 + $0xc4] sm:$0xf] }
  0x85   : > { %6181 = vmatprep.mubr.msk.bf16.mxu0 %vm434_vm1, %v5492_v13  ;;  %v5497_v13 = vcombine.low %v2450_v6, %v2453_v7  ;;  %v2464_v29 = vsel %vm6544_vm5, %v5482_v16, %v2463_v8  ;;  %v2955_v6 = vrot.slane %v5526_v61, 6  ;;  %v5528_v7 = vld [vmem:[%s6506_s25 + $0x40] sm:$0xf]  ;;  %v6407_v8 = vld [vmem:[%s6506_s25 + $0x30] sm:$0xff]   ;;  %v2966_v16 = vrot.slane %v5531_v9, 6 }
  0x86   : > { %v2959_v11 = vrot.slane %v5528_v7, 6  ;;  %v5546_v9 = vld [vmem:[%s6506_s25 + $0x88] sm:$0xf] }
  0x87   : > { %v2968_v28 = vrot.slane %v2966_v16, 4  ;;  %v3001_v15 = vrot.slane %v5546_v9, 6 }
  0x88   : > { %v2961_v23 = vrot.slane %v2959_v11, 4 }
  0x8a   : > { %6148 = vmatmul.mubr.msk.bf16.gmra.mxu1 %vm434_vm1, %v6398_v26  ;;  %v6404_v26 = vld [vmem:[%s6506_s25 + $0xb4] sm:$0xff]   ;;  %v2963_v47 = vsel %vm6559_vm6, %v2961_v23, %v2962_v25  ;;  %v5548_v23 = vld [vmem:[%s6506_s25 + $0x90] sm:$0xc] }
  0x8b   : > { %6151 = vmatprep.mubr.msk.bf16.mxu1 %vm434_vm1, %v6399_v33  ;;  %v6405_v33 = vld [vmem:[%s6506_s25 + $0xc0] sm:$0xff]   ;;  %v5550_v25 = vld [vmem:[%s6506_s25 + $0x98] sm:$0x3] }
  0x8c   : > { %6182 = vmatmul.mubr.msk.bf16.gmra.mxu0 %vm434_vm1, %v5493_v32  ;;  %v2467_v32 = vsel %vm6544_vm5, %v2465_v17, %v2466_v18  ;;  %v5530_v17 = vld [vmem:[%s6506_s25 + $0x48] sm:$0xc]  ;;  %v5532_v18 = vld [vmem:[%s6506_s25 + $0x50] sm:$0x3] }
  0x8d   : > { %6185 = vmatprep.mubr.msk.bf16.mxu0 %vm434_vm1, %v5494_v60  ;;  %v5468_v60 = vld [vmem:[%s6506_s25 + $0xd4] sm:$0x1]  ;;  %v5499_v39 = vcombine.low %v2464_v29, %v2467_v32  ;;  %v5570_v27 = vrot.slane %v5530_v17, 10  ;;  %v2969_v29 = vrot.slane %v5532_v18, 6  ;;  %v5534_v32 = vld [vmem:[%s6506_s25 + $0x58] sm:$0xf] }
  0x8e   : > { %v2480_v49 = vrot.slane %v5468_v60, 5  ;;  %v2973_v35 = vrot.slane %v5534_v32, 6  ;;  %v5545_v18 = vld [vmem:[%s6506_s25 + $0x84] sm:$0xc] }
  0x8f   : > { %v2967_v37 = vsel %vm6559_vm6, %v5570_v27, %v2966_v16  ;;  %v2970_v60 = vsel %vm6559_vm6, %v2968_v28, %v2969_v29  ;;  %v5575_v27 = vrot.slane %v5545_v18, 10  ;;  %v3003_v28 = vrot.slane %v3001_v15, 4 }
  0x90   : > { %v2481_v59 = vsel %vm6544_vm5, %v2479_v48, %v2480_v49  ;;  %v2975_v48 = vrot.slane %v2973_v35, 4  ;;  %v2976_v49 = vrot.slane %v5535_v38, 6 }
  0x92   : > { %6152 = vmatmul.mubr.msk.bf16.gmra.mxu1 %vm434_vm1, %v6400_v50  ;;  %v5525_v50 = vld [vmem:[%s6506_s25 + $0x34] sm:$0xf] }
  0x93   : > { %6155 = vmatprep.mubr.msk.bf16.mxu1 %vm434_vm1, %v6401_v51  ;;  %v5521_v51 = vld [vmem:[%s6506_s25 + $0x24] sm:$0xc]  ;;  %v2952_v57 = vrot.slane %v5525_v50, 6  ;;  %v6410_v50 = vld [vmem:[%s6506_s25 + $0x54] sm:$0xff]  }
  0x94   : > { %6186 = vmatmul.mubr.msk.bf16.gmra.mxu0 %vm434_vm1, %v5495_v58  ;;  %v2478_v58 = vsel %vm6544_vm5, %v5484_v46, %v2477_v30  ;;  %v5567_v63 = vrot.slane %v5521_v51, 10  ;;  %v5537_v30 = vld [vmem:[%s6506_s25 + $0x64] sm:$0xf]  ;;  %v5571_v46 = vrot.slane %v5533_v41, 10  ;;  %v5572_v51 = vrot.slane %v5536_v42, 10 }
  0x95   : > { %6189 = vmatprep.mubr.msk.bf16.mxu0 %vm434_vm1, %v5496_v62  ;;  %v6406_v62 = vld [vmem:[%s6506_s25 + $0xcc] sm:$0xff]   ;;  %v5501_v4 = vcombine.low %v2478_v58, %v2481_v59  ;;  %v2954_v5 = vrot.slane %v2952_v57, 4  ;;  %v2953_v12 = vsel %vm6559_vm6, %v5568_v3, %v2952_v57  ;;  %v2977_v58 = vsel %vm6559_vm6, %v2975_v48, %v2976_v49  ;;  %v5544_v3 = vld [vmem:[%s6506_s25 + $0x80] sm:$0x3]  ;;  %v5553_v42 = vld [vmem:[%s6506_s25 + $0xa4] sm:$0x3] }
  0x96   : > { %v2974_v57 = vsel %vm6559_vm6, %v5571_v46, %v2973_v35  ;;  %v2987_v59 = vrot.slane %v5540_v54, 6  ;;  %v5555_v35 = vld [vmem:[%s6506_s25 + $0xac] sm:$0xf]  ;;  %v3002_v41 = vsel %vm6559_vm6, %v5575_v27, %v3001_v15  ;;  %v5554_v46 = vld [vmem:[%s6506_s25 + $0xa8] sm:$0xc] }
  0x97   : > { %v3022_v48 = vrot.slane %v5555_v35, 6  ;;  %v5557_v49 = vld [vmem:[%s6506_s25 + $0xb4] sm:$0xc]  ;;  %v7304_v35 = vld [vmem:[%s6506_s25 + $0x38] sm:$0x1] }
  0x98   : > { %v2989_v7 = vrot.slane %v2987_v59, 4  ;;  %v7276_v15 = vld [vmem:[%s6506_s25 + $0x34] sm:$0xf] }
  0x9a   : > { %6156 = vmatmul.mubr.msk.bf16.gmra.mxu1 %vm434_vm1, %v6402_v31  ;;  %v2946_v31 = vsel %vm6559_vm6, %v5567_v63, %v2945_v53  ;;  %v2983_v53 = vrot.slane %v5538_v43, 6  ;;  %v5539_v63 = vld [vmem:[%s6506_s25 + $0x6c] sm:$0xc] }
  0x9b   : > { %6159 = vmatprep.mubr.msk.bf16.mxu1 %vm434_vm1, %v6403_v14  ;;  %v5527_v14 = vld [vmem:[%s6506_s25 + $0x3c] sm:$0xc]  ;;  %v5584_v19 = vcombine.low %v2946_v31, %v2949_v10  ;;  %v6412_v31 = vld [vmem:[%s6506_s25 + $0x6c] sm:$0xff]   ;;  %v5574_v10 = vrot.slane %v5542_v2, 10 }
  0x9c   : > { %6190 = vmatmul.mubr.msk.bf16.gmra.mxu0 %vm434_vm1, %v5497_v13  ;;  %v2956_v13 = vsel %vm6559_vm6, %v2954_v5, %v2955_v6  ;;  %v5569_v22 = vrot.slane %v5527_v14, 10  ;;  %v5573_v6 = vrot.slane %v5539_v63, 10  ;;  %v6413_v14 = vld [vmem:[%s6506_s25 + $0x78] sm:$0xff]   ;;  %v339_v2 = vld [vmem:[#allocation2 + $0x90] sm:$0xff] }
  0x9d   : > { %6193 = vmatprep.mubr.msk.bf16.mxu0 %vm434_vm1, %v5498_v21  ;;  %v5585_v21 = vcombine.low %v2953_v12, %v2956_v13  ;;  %v2997_v12 = vrot.slane %v5544_v3, 6  ;;  %v5549_v13 = vld [vmem:[%s6506_s25 + $0x94] sm:$0xf]  ;;  %v6416_v3 = vld [vmem:[%s6506_s25 + $0x9c] sm:$0xff]  }
  0x9e   : > { %v2988_v16 = vsel %vm6559_vm6, %v5573_v6, %v2987_v59  ;;  %v5578_v59 = vrot.slane %v5554_v46, 10  ;;  %v6417_v6 = vld [vmem:[%s6506_s25 + $0xa8] sm:$0xff]   ;;  %v7313_v46 = vld [vmem:[%s6506_s25 + $0x3c] sm:$0xe] }
  0xa2   : > { %6160 = vmatmul.mubr.msk.bf16.gmra.mxu1 %vm434_vm1, %v6404_v26  ;;  %v4168_v26 = vsel %vm483_vm0, %v7033_v40, 0  ;;  %v2960_v40 = vsel %vm6559_vm6, %v5569_v22, %v2959_v11  ;;  %v2996_v11 = vrot.slane %v2994_v1, 4 }
  0xa3   : > { %6163 = vmatprep.mubr.msk.bf16.mxu1 %vm434_vm1, %v6405_v33  ;;  %v6409_v33 = vld [vmem:[%s6506_s25 + $0x48] sm:$0xff]   ;;  %v5586_v44 = vcombine.low %v2960_v40, %v2963_v47  ;;  %v5552_v40 = vld [vmem:[%s6506_s25 + $0xa0] sm:$0xf] }
  0xa4   : > { %6194 = vmatmul.mubr.msk.bf16.gmra.mxu0 %vm434_vm1, %v5499_v39  ;;  %v2980_v39 = vrot.slane %v5537_v30, 6  ;;  %v2998_v22 = vsel %vm6559_vm6, %v2996_v11, %v2997_v12  ;;  %v6414_v47 = vld [vmem:[%s6506_s25 + $0x84] sm:$0xff]   ;;  %v3015_v43 = vrot.slane %v5552_v40, 6 }
  0xa5   : > { %6197 = vmatprep.mubr.msk.bf16.mxu0 %vm434_vm1, %v5500_v45  ;;  %v5587_v45 = vcombine.low %v2967_v37, %v2970_v60  ;;  %v5558_v37 = vld [vmem:[%s6506_s25 + $0xb8] sm:$0xf]  ;;  %v6415_v60 = vld [vmem:[%s6506_s25 + $0x90] sm:$0xff]  }
  0xa6   : > { %v2982_v52 = vrot.slane %v2980_v39, 4  ;;  %v2981_v61 = vsel %vm6559_vm6, %v5572_v51, %v2980_v39  ;;  %v5551_v39 = vld [vmem:[%s6506_s25 + $0x9c] sm:$0xc]  ;;  %v5556_v51 = vld [vmem:[%s6506_s25 + $0xb0] sm:$0x3] }
  0xa7   : > { %v5577_v54 = vrot.slane %v5551_v39, 10  ;;  %v3025_v63 = vrot.slane %v5556_v51, 6  ;;  %v343_v39 = vld [vmem:[#allocation2 + $0xb0] sm:$0xff]  ;;  %v322_v51 = vld [vmem:[#allocation2 + $0x8] sm:$0xff] }
  0xa9   : > { %v7261_v11 = vsel %vm6559_vm6, %v5577_v54, %v3015_v43  ;;  %v5685_v54 = vld [vmem:[%s6506_s25 + $0x44] sm:$0x1] }
  0xaa   : > { %6164 = vmatmul.mubr.msk.bf16.gmra.mxu1 %vm434_vm1, %v6406_v62  ;;  %v2984_v62 = vsel %vm6559_vm6, %v2982_v52, %v2983_v53  ;;  %v5559_v52 = vld [vmem:[%s6506_s25 + $0xbc] sm:$0x3] }
  0xab   : > { %6203 = vmatprep.mubr.msk.bf16.mxu1 %vm434_vm1, %v5583_v0  ;;  %v5541_v0 = vld [vmem:[%s6506_s25 + $0x74] sm:$0x3]  ;;  %v5589_v5 = vcombine.low %v2981_v61, %v2984_v62  ;;  %v5579_v61 = vrot.slane %v5557_v49, 10  ;;  %v3024_v62 = vrot.slane %v3022_v48, 4 }
  0xac   : > { %6198 = vmatmul.mubr.msk.bf16.gmra.mxu0 %vm434_vm1, %v5501_v4  ;;  %v5588_v4 = vcombine.low %v2974_v57, %v2977_v58  ;;  %v3017_v58 = vrot.slane %v3015_v43, 4 }
  0xad   : > { %6237 = vmatprep.mubr.msk.bf16.mxu0 %vm434_vm1, %v6407_v8  ;;  %v2990_v8 = vrot.slane %v5541_v0, 6  ;;  %v7281_v18 = vsel %vm6559_vm6, %v3024_v62, %v3025_v63  ;;  %v3930_v63 = vrot.slane %v7304_v35, 5 }
  0xaf   : > { %v2991_v17 = vsel %vm6559_vm6, %v2989_v7, %v2990_v8  ;;  %v5562_v7 = vld [vmem:[%s6506_s25 + $0xc8] sm:$0x3]  ;;  %v7256_v8 = vld [vmem:[%s6506_s25 + $0xd0] sm:$0xf] }
  0xb2   : > { %6204 = vmatmul.mubr.msk.bf16.vlgmr.msra.gmra.mxu1 %vm434_vm1, %v5584_v19  ;;  %v5547_v19 = vld [vmem:[%s6506_s25 + $0x8c] sm:$0x3] }
  0xb3   : > { %6270 = vmatpush3.bf16.msra.mxu1 %v4168_v26  ;;  %6207 = vmatprep.mubr.msk.bf16.mxu1 %vm434_vm1, %v5585_v21  ;;  %v2995_v21 = vsel %vm6559_vm6, %v5574_v10, %v2994_v1  ;;  %v5590_v26 = vcombine.low %v2988_v16, %v2991_v17  ;;  %v3004_v29 = vrot.slane %v5547_v19, 6  ;;  %v3032_v1 = vrot.slane %v5559_v52, 6  ;;  %v323_v10 = vld [vmem:[#allocation2 + $0x10] sm:$0xff]  ;;  %v340_v17 = vld [vmem:[#allocation2 + $0x98] sm:$0xff] }
  0xb4   : > { %6238 = vmatmul.mubr.msk.bf16.vlgmr.msra.gmra.mxu0 %vm434_vm1, %v6408_v20  ;;  %v3008_v20 = vrot.slane %v5549_v13, 6  ;;  %v5591_v32 = vcombine.low %v2995_v21, %v2998_v22  ;;  %v7269_v13 = vsel %vm6559_vm6, %v5578_v59, %v3022_v48  ;;  %v5563_v21 = vld [vmem:[%s6506_s25 + $0xcc] sm:$0xc]  ;;  %v7289_v22 = vld [vmem:[%s6506_s25 + $0x40] sm:$0xf] }
  0xb5   : > { %6304 = vmatpush3.bf16.msra.mxu0 %v4734_v34  ;;  %6241 = vmatprep.mubr.msk.bf16.mxu0 %vm434_vm1, %v6409_v33  ;;  %v5576_v33 = vrot.slane %v5548_v23, 10  ;;  %v3011_v34 = vrot.slane %v5550_v25, 6  ;;  %v3005_v38 = vsel %vm6559_vm6, %v3003_v28, %v3004_v29  ;;  %v3039_v28 = vrot.slane %v5562_v7, 6  ;;  %v7293_v29 = vld [vmem:[%s6506_s25 + $0xd4] sm:$0x3] }
  0xb6   : > { %v3010_v30 = vrot.slane %v3008_v20, 4  ;;  %v5592_v53 = vcombine.low %v3002_v41, %v3005_v38  ;;  %v324_v38 = vld [vmem:[#allocation2 + $0x18] sm:$0xff]  ;;  %v5595_v43 = vcombine.low %v7269_v13, %v7281_v18  ;;  %v3934_v48 = vrot.slane %v7289_v22, 5 }
  0xb7   : > { %v7358_v18 = vld [vmem:[%s6506_s25 + $0x38] sm:$0x3] }
  0xba   : > { %6208 = vmatmul.mubr.msk.bf16.gmra.mxu1 %vm434_vm1, %v5586_v44  ;;  %v3009_v44 = vsel %vm6559_vm6, %v5576_v33, %v3008_v20 }
  0xbb   : > { %6211 = vmatprep.mubr.msk.bf16.mxu1 %vm434_vm1, %v5587_v45  ;;  %v3012_v45 = vsel %vm6559_vm6, %v3010_v30, %v3011_v34  ;;  %v338_v34 = vld [vmem:[#allocation2 + $0x88] sm:$0xff] }
  0xbc   : > { %6242 = vmatmul.mubr.msk.bf16.gmra.mxu0 %vm434_vm1, %v6410_v50  ;;  %v3029_v50 = vrot.slane %v5558_v37, 6  ;;  %v5593_v57 = vcombine.low %v3009_v44, %v3012_v45  ;;  %v3927_v37 = vrot.slane %v7276_v15, 5  ;;  %v5581_v45 = vrot.slane %v5563_v21, 10 }
  0xbd   : > { %6245 = vmatprep.mubr.msk.bf16.mxu0 %vm434_vm1, %v6411_v55  ;;  %v3018_v55 = vrot.slane %v5553_v42, 6  ;;  %v6418_v42 = vld [vmem:[%s6506_s25 + $0xb4] sm:$0xff]  }
  0xbe   : > { %v3031_v0 = vrot.slane %v3029_v50, 4 }
  0xbf   : > { %v7265_v12 = vsel %vm6559_vm6, %v3017_v58, %v3018_v55  ;;  %v7325_v55 = vld [vmem:[%s6506_s25 + $0x34] sm:$0xf]  ;;  %v6419_v58 = vld [vmem:[%s6506_s25 + $0xc0] sm:$0xff]  }
  0xc0   : > { %v7285_v19 = vsel %vm6559_vm6, %v3031_v0, %v3032_v1  ;;  %v5594_v40 = vcombine.low %v7261_v11, %v7265_v12  ;;  %v7335_v0 = vld [vmem:[%s6506_s25 + $0x40] sm:$0xf]  ;;  %v3936_v11 = vrot.slane %v3934_v48, 4  ;;  %v3937_v12 = vrot.slane %v5685_v54, 5  ;;  %v7406_v54 = vld [vmem:[%s6506_s25 + $0x58] sm:$0xf] }
  0xc1   : > { %v4493_v13 = vrot.slane %v7325_v55, 6  ;;  %v4500_v21 = vrot.slane %v7335_v0, 6 }
  0xc2   : > { %6212 = vmatmul.mubr.msk.bf16.gmra.mxu1 %vm434_vm1, %v5588_v4  ;;  %v5560_v4 = vld [vmem:[%s6506_s25 + $0xc0] sm:$0xc] }
  0xc3   : > { %6215 = vmatprep.mubr.msk.bf16.mxu1 %vm434_vm1, %v5589_v5  ;;  %v3036_v5 = vrot.slane %v7248_v56, 6  ;;  %v5580_v20 = vrot.slane %v5560_v4, 10  ;;  %v5729_v4 = vrot.slane %v7313_v46, 9 }
  0xc4   : > { %6246 = vmatmul.mubr.msk.bf16.gmra.mxu0 %vm434_vm1, %v6412_v31  ;;  %v337_v31 = vld [vmem:[#allocation2 + $0x80] sm:$0xff] }
  0xc5   : > { %6249 = vmatprep.mubr.msk.bf16.mxu0 %vm434_vm1, %v6413_v14  ;;  %v7273_v14 = vsel %vm6559_vm6, %v5579_v61, %v3029_v50  ;;  %v3038_v27 = vrot.slane %v3036_v5, 4  ;;  %v7320_v52 = vsel %vm6559_vm6, %v5580_v20, %v3036_v5  ;;  %v7341_v5 = vld [vmem:[%s6506_s25 + $0x30] sm:$0xc]  ;;  %v7361_v20 = vld [vmem:[%s6506_s25 + $0x3c] sm:$0xc]  ;;  %v7387_v35 = vsel %vm6544_vm5, %v5729_v4, %v3934_v48 }
  0xc6   : > { %v5596_v44 = vcombine.low %v7273_v14, %v7285_v19  ;;  %v5826_v46 = vrot.slane %v7361_v20, 10  ;;  %v7400_v48 = vld [vmem:[%s6506_s25 + $0x4c] sm:$0xf]  ;;  %v3948_v14 = vrot.slane %v7406_v54, 5  ;;  %v7443_v19 = vld [vmem:[%s6506_s25 + $0x50] sm:$0x3] }
  0xc7   : > { %v7330_v59 = vsel %vm6559_vm6, %v3038_v27, %v3039_v28  ;;  %v7495_v54 = vld [vmem:[%s6506_s25 + $0x70] sm:$0xf] }
  0xca   : > { %6216 = vmatmul.mubr.msk.bf16.gmra.mxu1 %vm434_vm1, %v5590_v26  ;;  %v321_v26 = vld [vmem:[#allocation2] sm:$0xff] }
  0xcb   : > { %6219 = vmatprep.mubr.msk.bf16.mxu1 %vm434_vm1, %v5591_v32  ;;  %v3043_v32 = vrot.slane %v7256_v8, 6 }
  0xcc   : > { %6250 = vmatmul.mubr.msk.bf16.gmra.mxu0 %vm434_vm1, %v6414_v47  ;;  %v7301_v47 = vld [vmem:[%s6506_s25 + $0x30] sm:$0xe] }
  0xcd   : > { %6253 = vmatprep.mubr.msk.bf16.mxu0 %vm434_vm1, %v6415_v60  ;;  %v3045_v61 = vrot.slane %v3043_v32, 4  ;;  %v5728_v62 = vrot.slane %v7301_v47, 9 }
  0xcf   : > { %v7371_v28 = vsel %vm6544_vm5, %v5728_v62, %v3927_v37  ;;  %v6420_v62 = vld [vmem:[%s6506_s25 + $0xcc] sm:$0xff]  }
  0xd2   : > { %v6051_v9 = vpop.f32.mrf.mxu1  ;;  %6220 = vmatmul.mubr.msk.bf16.gmra.mxu1 %vm434_vm1, %v5592_v53  ;;  %v3046_v53 = vrot.slane %v7293_v29, 6  ;;  %v5825_v29 = vrot.slane %v7341_v5, 10  ;;  %v6421_v5 = vld [vmem:[%s6506_s25 + $0xd8] sm:$0xff]  }
  0xd3   : > { %v666_v16 = vadd.f32 %v6051_v9, %v339_v2  ;;  %6223 = vmatprep.mubr.msk.bf16.mxu1 %vm434_vm1, %v5593_v57  ;;  %v6035_v25 = vpop.f32.mrf.mxu0  ;;  %v341_v9 = vld [vmem:[#allocation2 + $0xa0] sm:$0xff] }
  0xd4   : > { %v585_v23 = vpop.f32.mrf.mxu1  ;;  %6254 = vmatmul.mubr.msk.bf16.gmra.mxu0 %vm434_vm1, %v6416_v3  ;;  %v650_v30 = vadd.f32 %v6035_v25, %v323_v10  ;;  %v3929_v3 = vrot.slane %v3927_v37, 4  ;;  %v7349_v10 = vsel %vm6559_vm6, %v5581_v45, %v3043_v32  ;;  %v344_v25 = vld [vmem:[#allocation2 + $0xb8] sm:$0xff]  ;;  %v7367_v27 = vsel %vm6559_vm6, %v3045_v61, %v3046_v53  ;;  %v7375_v32 = vld [vmem:[%s6506_s25 + $0x44] sm:$0x3]  ;;  %v5686_v37 = vld [vmem:[%s6506_s25 + $0x48] sm:$0xe] }
  0xd5   : > { %699 = vst.msk [vmem:[#allocation2 + $0x90] sm:$0xff] %vm256_vm7, %v666_v16  ;;  %v664_v33 = vadd.f32 %v585_v23, %v337_v31  ;;  %6257 = vmatprep.mubr.msk.bf16.mxu0 %vm434_vm1, %v6417_v6  ;;  %v521_v41 = vpop.f32.mrf.mxu0  ;;  %v7344_v6 = vld [vmem:[%s6506_s25 + $0x4c] sm:$0xf]  ;;  %v327_v31 = vld [vmem:[#allocation2 + $0x30] sm:$0xff]  ;;  %v4496_v45 = vrot.slane %v7358_v18, 6  ;;  %v4503_v53 = vrot.slane %v7375_v32, 6  ;;  %v7435_v20 = vsel %vm6559_vm6, %v5825_v29, %v4493_v13 }
  0xd6   : > { %v6052_v60 = vpop.f32.mrf.mxu1  ;;  %683 = vst.msk [vmem:[#allocation2 + $0x10] sm:$0xff] %vm256_vm7, %v650_v30  ;;  %v648_v50 = vadd.f32 %v521_v41, %v321_v26  ;;  %v325_v26 = vld [vmem:[#allocation2 + $0x20] sm:$0xff]  ;;  %v7383_v47 = vsel %vm6544_vm5, %v3929_v3, %v3930_v63  ;;  %v326_v61 = vld [vmem:[#allocation2 + $0x28] sm:$0xff]  ;;  %v5598_v63 = vcombine.low %v7349_v10, %v7367_v27  ;;  %v5730_v0 = vrot.slane %v5686_v37, 9  ;;  %v348_v32 = vld [vmem:[#allocation2 + $0xd8] sm:$0xff] }
  0xd7   : > { %697 = vst.msk [vmem:[#allocation2 + $0x80] sm:$0xff] %vm256_vm7, %v664_v33  ;;  %v667_v49 = vadd.f32 %v6052_v60, %v340_v17  ;;  %v6036_v57 = vpop.f32.mrf.mxu0  ;;  %v5597_v17 = vcombine.low %v7320_v52, %v7330_v59  ;;  %v3941_v33 = vrot.slane %v7344_v6, 5  ;;  %v5688_v60 = vld [vmem:[%s6506_s25 + $0x50] sm:$0x1]  ;;  %v329_v52 = vld [vmem:[#allocation2 + $0x40] sm:$0xff] }
  0xd8   : > { %v588_v56 = vpop.f32.mrf.mxu1  ;;  %681 = vst.msk [vmem:[#allocation2] sm:$0xff] %vm256_vm7, %v648_v50  ;;  %v651_v2 = vadd.f32 %v6036_v57, %v324_v38 }
  0xd9   : > { %700 = vst.msk [vmem:[#allocation2 + $0x98] sm:$0xff] %vm256_vm7, %v667_v49  ;;  %v665_v1 = vadd.f32 %v588_v56, %v338_v34  ;;  %v524_v8 = vpop.f32.mrf.mxu0  ;;  %v7470_v59 = vsel %vm6544_vm5, %v5730_v0, %v3941_v33  ;;  %v7505_v0 = vld [vmem:[%s6506_s25 + $0x60] sm:$0xe] }
  0xda   : > { %v6055_v7 = vpop.f32.mrf.mxu1  ;;  %6224 = vmatmul.mubr.msk.bf16.gmra.mxu1 %vm434_vm1, %v5594_v40  ;;  %684 = vst.msk [vmem:[#allocation2 + $0x18] sm:$0xff] %vm256_vm7, %v651_v2  ;;  %v649_v16 = vadd.f32 %v524_v8, %v322_v51  ;;  %v342_v40 = vld [vmem:[#allocation2 + $0xa8] sm:$0xff]  ;;  %v4502_v51 = vrot.slane %v4500_v21, 4  ;;  %v3944_v2 = vrot.slane %v5688_v60, 5  ;;  %v7419_v8 = vld [vmem:[%s6506_s25 + $0x54] sm:$0xe] }
  0xdb   : > { %698 = vst.msk [vmem:[#allocation2 + $0x88] sm:$0xff] %vm256_vm7, %v665_v1  ;;  %v670_v15 = vadd.f32 %v6055_v7, %v343_v39  ;;  %6227 = vmatprep.mubr.msk.bf16.mxu1 %vm434_vm1, %v5595_v43  ;;  %v6039_v23 = vpop.f32.mrf.mxu0  ;;  %v328_v39 = vld [vmem:[#allocation2 + $0x38] sm:$0xff]  ;;  %v4495_v43 = vrot.slane %v4493_v13, 4  ;;  %v3943_v1 = vrot.slane %v3941_v33, 4  ;;  %v5745_v7 = vcombine.low %v7371_v28, %v7383_v47  ;;  %v346_v60 = vld [vmem:[#allocation2 + $0xc8] sm:$0xff] }
  0xdc   : > { %v601_v22 = vpop.f32.mrf.mxu1  ;;  %6258 = vmatmul.mubr.msk.bf16.gmra.mxu0 %vm434_vm1, %v6418_v42  ;;  %682 = vst.msk [vmem:[#allocation2 + $0x8] sm:$0xff] %vm256_vm7, %v649_v16  ;;  %v654_v34 = vadd.f32 %v6039_v23, %v327_v31  ;;  %v7393_v42 = vsel %vm6544_vm5, %v3936_v11, %v3937_v12  ;;  %v4507_v31 = vrot.slane %v7400_v48, 6  ;;  %v331_v16 = vld [vmem:[#allocation2 + $0x50] sm:$0xff]  ;;  %v7457_v13 = vsel %vm6559_vm6, %v4502_v51, %v4503_v53  ;;  %v332_v33 = vld [vmem:[#allocation2 + $0x58] sm:$0xff]  ;;  %v7532_v48 = vld [vmem:[%s6506_s25 + $0x6c] sm:$0xe] }
  0xdd   : > { %703 = vst.msk [vmem:[#allocation2 + $0xb0] sm:$0xff] %vm256_vm7, %v670_v15  ;;  %v668_v30 = vadd.f32 %v601_v22, %v341_v9  ;;  %6261 = vmatprep.mubr.msk.bf16.mxu0 %vm434_vm1, %v6419_v58  ;;  %v537_v38 = vpop.f32.mrf.mxu0  ;;  %v347_v58 = vld [vmem:[#allocation2 + $0xd0] sm:$0xff]  ;;  %v7422_v9 = vld [vmem:[%s6506_s25 + $0x48] sm:$0xc]  ;;  %v345_v15 = vld [vmem:[#allocation2 + $0xc0] sm:$0xff]  ;;  %v5746_v18 = vcombine.low %v7387_v35, %v7393_v42  ;;  %v7439_v22 = vsel %vm6559_vm6, %v5826_v46, %v4500_v21 }
  0xde   : > { %v6056_v41 = vpop.f32.mrf.mxu1  ;;  %687 = vst.msk [vmem:[#allocation2 + $0x30] sm:$0xff] %vm256_vm7, %v654_v34  ;;  %v652_v50 = vadd.f32 %v537_v38, %v325_v26  ;;  %v7453_v55 = vsel %vm6559_vm6, %v4495_v43, %v4496_v45  ;;  %v7460_v21 = vld [vmem:[%s6506_s25 + $0x5c] sm:$0x1]  ;;  %v5827_v34 = vrot.slane %v7422_v9, 10  ;;  %v4510_v38 = vrot.slane %v7443_v19, 6  ;;  %v351_v46 = vld [vmem:[#allocation2 + $0xf0] sm:$0xff] }
  0xdf   : > { %701 = vst.msk [vmem:[#allocation2 + $0xa0] sm:$0xff] %vm256_vm7, %v668_v30  ;;  %v671_v49 = vadd.f32 %v6056_v41, %v344_v25  ;;  %v6040_v57 = vpop.f32.mrf.mxu0  ;;  %v7463_v25 = vld [vmem:[%s6506_s25 + $0x58] sm:$0xf]  ;;  %v5731_v30 = vrot.slane %v7419_v8, 9  ;;  %v4509_v41 = vrot.slane %v4507_v31, 4  ;;  %v3951_v51 = vrot.slane %v7460_v21, 5 }
  0xe0   : > { %v604_v56 = vpop.f32.mrf.mxu1  ;;  %685 = vst.msk [vmem:[#allocation2 + $0x20] sm:$0xff] %vm256_vm7, %v652_v50  ;;  %v655_v4 = vadd.f32 %v6040_v57, %v328_v39  ;;  %v7488_v39 = vld [vmem:[%s6506_s25 + $0x54] sm:$0xc]  ;;  %v3950_v50 = vrot.slane %v3948_v14, 4  ;;  %v4514_v53 = vrot.slane %v7463_v25, 6 }
  0xe1   : > { %704 = vst.msk [vmem:[#allocation2 + $0xb8] sm:$0xff] %vm256_vm7, %v671_v49  ;;  %v669_v3 = vadd.f32 %v604_v56, %v342_v40  ;;  %v540_v12 = vpop.f32.mrf.mxu0  ;;  %v7479_v40 = vld [vmem:[%s6506_s25 + $0x64] sm:$0xf]  ;;  %v5842_v49 = vcombine.low %v7435_v20, %v7453_v55  ;;  %v7513_v9 = vsel %vm6544_vm5, %v5731_v30, %v3948_v14  ;;  %v7529_v14 = vsel %vm6559_vm6, %v4509_v41, %v4510_v38  ;;  %v350_v38 = vld [vmem:[#allocation2 + $0xe8] sm:$0xff] }
  0xe2   : > { %v6059_v11 = vpop.f32.mrf.mxu1  ;;  %6228 = vmatmul.mubr.msk.bf16.gmra.mxu1 %vm434_vm1, %v5596_v44  ;;  %688 = vst.msk [vmem:[#allocation2 + $0x38] sm:$0xff] %vm256_vm7, %v655_v4  ;;  %v653_v23 = vadd.f32 %v540_v12, %v326_v61  ;;  %v5843_v61 = vcombine.low %v7439_v22, %v7457_v13  ;;  %v349_v4 = vld [vmem:[#allocation2 + $0xe0] sm:$0xff]  ;;  %v5828_v12 = vrot.slane %v7488_v39, 10  ;;  %v336_v39 = vld [vmem:[#allocation2 + $0x78] sm:$0xff]  ;;  %v7652_v42 = vld [vmem:[%s6506_s25 + $0x8c] sm:$0x1] }
  0xe3   : > { %702 = vst.msk [vmem:[#allocation2 + $0xa8] sm:$0xff] %vm256_vm7, %v669_v3  ;;  %v674_v44 = vadd.f32 %v6059_v11, %v347_v58  ;;  %6231 = vmatprep.mubr.msk.bf16.mxu1 %vm434_vm1, %v5597_v17  ;;  %v6043_v29 = vpop.f32.mrf.mxu0  ;;  %v7474_v17 = vsel %vm6544_vm5, %v3943_v1, %v3944_v2  ;;  %v330_v58 = vld [vmem:[#allocation2 + $0x48] sm:$0xff]  ;;  %v3955_v1 = vrot.slane %v7479_v40, 5  ;;  %v7519_v11 = vsel %vm6559_vm6, %v5827_v34, %v4507_v31  ;;  %v7549_v40 = vld [vmem:[%s6506_s25 + $0x74] sm:$0x1] }
  0xe4   : > { %v617_v26 = vpop.f32.mrf.mxu1  ;;  %6262 = vmatmul.mubr.msk.bf16.gmra.mxu0 %vm434_vm1, %v6420_v62  ;;  %686 = vst.msk [vmem:[#allocation2 + $0x28] sm:$0xff] %vm256_vm7, %v653_v23  ;;  %v658_v37 = vadd.f32 %v6043_v29, %v331_v16  ;;  %v7502_v62 = vld [vmem:[%s6506_s25 + $0x5c] sm:$0x3]  ;;  %v5747_v8 = vcombine.low %v7470_v59, %v7474_v17  ;;  %v3962_v31 = vrot.slane %v7495_v54, 5  ;;  %v7536_v23 = vld [vmem:[%s6506_s25 + $0x64] sm:$0xf]  ;;  %v5844_v28 = vcombine.low %v7519_v11, %v7529_v14 }
  0xe5   : > { %707 = vst.msk [vmem:[#allocation2 + $0xd0] sm:$0xff] %vm256_vm7, %v674_v44  ;;  %v672_v6 = vadd.f32 %v617_v26, %v345_v15  ;;  %6265 = vmatprep.mubr.msk.bf16.mxu0 %vm434_vm1, %v6421_v5  ;;  %v553_v45 = vpop.f32.mrf.mxu0  ;;  %v6422_v5 = vld [vmem:[%s6506_s25 + $0xe4] sm:$0xff]   ;;  %v335_v44 = vld [vmem:[#allocation2 + $0x70] sm:$0xff]  ;;  %v352_v26 = vld [vmem:[#allocation2 + $0xf8] sm:$0xff]  ;;  %v4517_v30 = vrot.slane %v7502_v62, 6  ;;  %v5732_v34 = vrot.slane %v7505_v0, 9  ;;  %v7569_v47 = vsel %vm6559_vm6, %v5828_v12, %v4514_v53 }
  0xe6   : > { %v6060_v43 = vpop.f32.mrf.mxu1  ;;  %691 = vst.msk [vmem:[#allocation2 + $0x50] sm:$0xff] %vm256_vm7, %v658_v37  ;;  %v656_v57 = vadd.f32 %v553_v45, %v329_v52  ;;  %v7523_v15 = vld [vmem:[%s6506_s25 + $0x68] sm:$0x1]  ;;  %v333_v29 = vld [vmem:[#allocation2 + $0x60] sm:$0xff]  ;;  %v4516_v52 = vrot.slane %v4514_v53, 4  ;;  %v4521_v45 = vrot.slane %v7536_v23, 6 }
  0xe7   : > { %705 = vst.msk [vmem:[#allocation2 + $0xc0] sm:$0xff] %vm256_vm7, %v672_v6  ;;  %v675_v56 = vadd.f32 %v6060_v43, %v348_v32  ;;  %v6044_v3 = vpop.f32.mrf.mxu0  ;;  %v7544_v32 = vsel %vm6544_vm5, %v3950_v50, %v3951_v51  ;;  %v3958_v6 = vrot.slane %v7523_v15, 5  ;;  %v7559_v37 = vld [vmem:[%s6506_s25 + $0x60] sm:$0xc]  ;;  %v7573_v43 = vld [vmem:[%s6506_s25 + $0x68] sm:$0x3]  ;;  %v7600_v20 = vsel %vm6544_vm5, %v5732_v34, %v3955_v1 }
  0xe8   : > { %v620_v2 = vpop.f32.mrf.mxu1  ;;  %689 = vst.msk [vmem:[#allocation2 + $0x40] sm:$0xff] %vm256_vm7, %v656_v57  ;;  %v659_v19 = vadd.f32 %v6044_v3, %v332_v33  ;;  %v3964_v53 = vrot.slane %v3962_v31, 4  ;;  %v7589_v57 = vld [vmem:[%s6506_s25 + $0x6c] sm:$0xc]  ;;  %v5829_v55 = vrot.slane %v7559_v37, 10  ;;  %v5748_v37 = vcombine.low %v7513_v9, %v7544_v32 }
  0xe9   : > { %708 = vst.msk [vmem:[#allocation2 + $0xd8] sm:$0xff] %vm256_vm7, %v675_v56  ;;  %v673_v16 = vadd.f32 %v620_v2, %v346_v60  ;;  %v556_v25 = vpop.f32.mrf.mxu0  ;;  %v7562_v60 = vld [vmem:[%s6506_s25 + $0x70] sm:$0xf]  ;;  %v3965_v56 = vrot.slane %v7549_v40, 5  ;;  %v7596_v2 = vsel %vm6559_vm6, %v4516_v52, %v4517_v30  ;;  %v7605_v3 = vld [vmem:[%s6506_s25 + $0x78] sm:$0xe] }
  0xea   : > { %v6063_v21 = vpop.f32.mrf.mxu1  ;;  %6232 = vmatmul.mubr.msk.bf16.gmra.mxu1 %vm434_vm1, %v5598_v63  ;;  %692 = vst.msk [vmem:[#allocation2 + $0x58] sm:$0xff] %vm256_vm7, %v659_v19  ;;  %v657_v27 = vadd.f32 %v556_v25, %v330_v58  ;;  %v3957_v63 = vrot.slane %v3955_v1, 4  ;;  %v7592_v58 = vld [vmem:[%s6506_s25 + $0x74] sm:$0x3]  ;;  %v334_v15 = vld [vmem:[#allocation2 + $0x68] sm:$0xff]  ;;  %v5830_v25 = vrot.slane %v7589_v57, 10 }
  0xeb   : > { %706 = vst.msk [vmem:[#allocation2 + $0xc8] sm:$0xff] %vm256_vm7, %v673_v16  ;;  %v678_v10 = vadd.f32 %v6063_v21, %v351_v46  ;;  %6271 = vmatprep.mubr.msk.bf16.mxu1 %vm434_vm1, %v5745_v7  ;;  %v6047_v41 = vpop.f32.mrf.mxu0  ;;  %v5733_v7 = vrot.slane %v7532_v48, 9  ;;  %v7577_v46 = vld [vmem:[%s6506_s25 + $0x7c] sm:$0xf]  ;;  %v4523_v48 = vrot.slane %v4521_v45, 4  ;;  %v4524_v21 = vrot.slane %v7573_v43, 6 }
  0xec   : > { %v633_v33 = vpop.f32.mrf.mxu1  ;;  %6266 = vmatmul.mubr.msk.bf16.gmra.mxu0 %vm434_vm1, %v6422_v5  ;;  %690 = vst.msk [vmem:[#allocation2 + $0x48] sm:$0xff] %vm256_vm7, %v657_v27  ;;  %v662_v51 = vadd.f32 %v6047_v41, %v335_v44  ;;  %v7614_v1 = vsel %vm6544_vm5, %v3957_v63, %v3958_v6  ;;  %v3969_v16 = vrot.slane %v7577_v46, 5  ;;  %v5734_v34 = vrot.slane %v7605_v3, 9  ;;  %v926_v27 = vld [vmem:[#allocation2 + $0x10] sm:$0xff]  ;;  %v7649_v35 = vld [vmem:[%s6506_s25 + $0x84] sm:$0xe] }
  0xed   : > { %711 = vst.msk [vmem:[#allocation2 + $0xf0] sm:$0xff] %vm256_vm7, %v678_v10  ;;  %v676_v50 = vadd.f32 %v633_v33, %v349_v4  ;;  %6305 = vmatprep.mubr.msk.bf16.mxu0 %vm434_vm1, %v5842_v49  ;;  %v569_v0 = vpop.f32.mrf.mxu0  ;;  %v4528_v49 = vrot.slane %v7562_v60, 6  ;;  %v7608_v4 = vld [vmem:[%s6506_s25 + $0x80] sm:$0x1]  ;;  %v7630_v10 = vld [vmem:[%s6506_s25 + $0x7c] sm:$0xf]  ;;  %v5845_v33 = vcombine.low %v7569_v47, %v7596_v2  ;;  %v7644_v41 = vsel %vm6544_vm5, %v5733_v7, %v3962_v31 }
  0xee   : > { %v6064_v62 = vpop.f32.mrf.mxu1  ;;  %695 = vst.msk [vmem:[#allocation2 + $0x70] sm:$0xff] %vm256_vm7, %v662_v51  ;;  %v660_v12 = vadd.f32 %v569_v0, %v333_v29  ;;  %v7623_v29 = vld [vmem:[%s6506_s25 + $0x88] sm:$0xf]  ;;  %v3972_v40 = vrot.slane %v7608_v4, 5  ;;  %v3971_v54 = vrot.slane %v3969_v16, 4  ;;  %v924_v43 = vld [vmem:[#allocation2] sm:$0xff]  ;;  %v5749_v59 = vcombine.low %v7600_v20, %v7614_v1 }
  0xef   : > { %709 = vst.msk [vmem:[#allocation2 + $0xe0] sm:$0xff] %vm256_vm7, %v676_v50  ;;  %v679_v5 = vadd.f32 %v6064_v62, %v352_v26  ;;  %v6048_v44 = vpop.f32.mrf.mxu0  ;;  %v4531_v26 = vrot.slane %v7592_v58, 6  ;;  %v3976_v31 = vrot.slane %v7623_v29, 5  ;;  %v7662_v7 = vld [vmem:[%s6506_s25 + $0x88] sm:$0xf]  ;;  %v7674_v17 = vsel %vm6544_vm5, %v3964_v53, %v3965_v56  ;;  %v927_v56 = vld [vmem:[#allocation2 + $0x18] sm:$0xff] }
  0xf0   : > { %v636_v19 = vpop.f32.mrf.mxu1  ;;  %693 = vst.msk [vmem:[#allocation2 + $0x60] sm:$0xff] %vm256_vm7, %v660_v12  ;;  %v663_v30 = vadd.f32 %v6048_v44, %v336_v39  ;;  %v5795_v51 = vld [vmem:[%s6506_s25 + $0x78] sm:$0xc]  ;;  %v4535_v57 = vrot.slane %v7630_v10, 6  ;;  %v7692_v13 = vsel %vm6559_vm6, %v4523_v48, %v4524_v21  ;;  %v3979_v23 = vrot.slane %v7652_v42, 5 }
  0xf1   : > { %712 = vst.msk [vmem:[#allocation2 + $0xf8] sm:$0xff] %vm256_vm7, %v679_v5  ;;  %v677_v52 = vadd.f32 %v636_v19, %v350_v38  ;;  %v572_v6 = vpop.f32.mrf.mxu0  ;;  %v4530_v38 = vrot.slane %v4528_v49, 4  ;;  %v5798_v53 = vld [vmem:[%s6506_s25 + $0x84] sm:$0xc]  ;;  %v7704_v11 = vsel %vm6559_vm6, %v5830_v25, %v4528_v49  ;;  %v7715_v0 = vld [vmem:[%s6506_s25 + $0x8c] sm:$0x3]  ;;  %v7724_v49 = vsel %vm6544_vm5, %v3971_v54, %v3972_v40 }
  0xf2   : > { %v6069_v63 = vpop.f32.mrf.mxu1  ;;  %6272 = vmatmul.mubr.msk.bf16.vlgmr.msra.gmra.mxu1 %vm434_vm1, %v5746_v18  ;;  %696 = vst.msk [vmem:[#allocation2 + $0x78] sm:$0xff] %vm256_vm7, %v663_v30  ;;  %v661_v39 = vadd.f32 %v572_v6, %v334_v15  ;;  %v4542_v20 = vrot.slane %v7662_v7, 6  ;;  %v3978_v3 = vrot.slane %v3976_v31, 4  ;;  %v5831_v4 = vrot.slane %v5795_v51, 10  ;;  %v925_v5 = vld [vmem:[#allocation2 + $0x8] sm:$0xff]  ;;  %v928_v7 = vld [vmem:[#allocation2 + $0x20] sm:$0xff] }
  0xf3   : > { %710 = vst.msk [vmem:[#allocation2 + $0xe8] sm:$0xff] %vm256_vm7, %v677_v52  ;;  %v1220_v18 = vadd.f32 %v6069_v63, %v926_v27  ;;  %6275 = vmatprep.mubr.msk.bf16.mxu1 %vm434_vm1, %v5747_v8  ;;  %v7680_v8 = vsel %vm6559_vm6, %v5829_v55, %v4521_v45  ;;  %v5797_v45 = vld [vmem:[%s6506_s25 + $0x80] sm:$0x3]  ;;  %v7708_v14 = vsel %vm6559_vm6, %v4530_v38, %v4531_v26  ;;  %v7719_v55 = vld [vmem:[%s6506_s25 + $0x94] sm:$0xf]  ;;  %v5832_v44 = vrot.slane %v5798_v53, 10 }
  0xf4   : > { %v1091_v46 = vpop.f32.mrf.mxu1  ;;  %v7664_v50 = vpop.f32.mrf.mxu0  ;;  %6306 = vmatmul.mubr.msk.bf16.vlgmr.msra.gmra.mxu0 %vm434_vm1, %v5843_v61  ;;  %694 = vst.msk [vmem:[#allocation2 + $0x68] sm:$0xff] %vm256_vm7, %v661_v39  ;;  %v5735_v61 = vrot.slane %v7649_v35, 9  ;;  %v5750_v1 = vcombine.low %v7644_v41, %v7674_v17  ;;  %v4538_v19 = vrot.slane %v5797_v45, 6  ;;  %v7731_v48 = vld [vmem:[%s6506_s25 + $0xa0] sm:$0xf]  ;;  %v5846_v25 = vcombine.low %v7680_v8, %v7692_v13  ;;  %v931_v45 = vld [vmem:[#allocation2 + $0x38] sm:$0xff] }
  0xf5   : > { %1252 = vst.msk [vmem:[#allocation2 + $0x10] sm:$0xff] %vm256_vm7, %v1220_v18  ;;  %v1218_v22 = vadd.f32 %v1091_v46, %v924_v43  ;;  %6309 = vmatprep.mubr.msk.bf16.mxu0 %vm434_vm1, %v5844_v28  ;;  %v7712_v28 = vsel %vm6544_vm5, %v5734_v34, %v3969_v16  ;;  %v4537_v16 = vrot.slane %v4535_v57, 4  ;;  %v4545_v26 = vrot.slane %v7715_v0, 6  ;;  %v7738_v29 = vld [vmem:[%s6506_s25 + $0x90] sm:$0xe] }
  0xf6   : > { %v6070_v58 = vpop.f32.mrf.mxu1  ;;  %v7698_v62 = vpop.f32.mrf.mxu0  ;;  %v3983_v52 = vrot.slane %v7719_v55, 5  ;;  %v7742_v30 = vld [vmem:[%s6506_s25 + $0x94] sm:$0xf]  ;;  %v5847_v27 = vcombine.low %v7704_v11, %v7708_v14  ;;  %v5751_v63 = vcombine.low %v7712_v28, %v7724_v49  ;;  %v7756_v6 = vsel %vm6544_vm5, %v5735_v61, %v3976_v31  ;;  %v7759_v35 = vld [vmem:[%s6506_s25 + $0x98] sm:$0x1] }
  0xf7   : > { %1250 = vst.msk [vmem:[#allocation2] sm:$0xff] %vm256_vm7, %v1218_v22  ;;  %v1221_v60 = vadd.f32 %v6070_v58, %v927_v56  ;;  %v930_v34 = vld [vmem:[#allocation2 + $0x30] sm:$0xff]  ;;  %v4544_v38 = vrot.slane %v4542_v20, 4  ;;  %v7762_v42 = vld [vmem:[%s6506_s25 + $0x9c] sm:$0xe]  ;;  %v7768_v32 = vsel %vm6544_vm5, %v3978_v3, %v3979_v23  ;;  %v3990_v39 = vrot.slane %v7731_v48, 5 }
  0xf8   : > { %v1094_v12 = vpop.f32.mrf.mxu1  ;;  %v7726_v15 = vpop.f32.mrf.mxu0  ;;  %v7775_v18 = vld [vmem:[%s6506_s25 + $0xa4] sm:$0x1]  ;;  %v7779_v54 = vld [vmem:[%s6506_s25 + $0x90] sm:$0xc]  ;;  %v7793_v8 = vsel %vm6559_vm6, %v5832_v44, %v4542_v20  ;;  %v5736_v51 = vrot.slane %v7738_v29, 9  ;;  %v3985_v2 = vrot.slane %v3983_v52, 4 }
  0xf9   : > { %1253 = vst.msk [vmem:[#allocation2 + $0x18] sm:$0xff] %vm256_vm7, %v1221_v60  ;;  %v1219_v21 = vadd.f32 %v1094_v12, %v925_v5  ;;  %v7798_v22 = vld [vmem:[%s6506_s25 + $0xa0] sm:$0xf]  ;;  %v5803_v61 = vld [vmem:[%s6506_s25 + $0x98] sm:$0x3]  ;;  %v5737_v58 = vrot.slane %v7762_v42, 9 }
  0xfa   : > { %v6073_v40 = vpop.f32.mrf.mxu1  ;;  %6276 = vmatmul.mubr.msk.bf16.gmra.mxu1 %vm434_vm1, %v5748_v37  ;;  %v7748_v10 = vpop.f32.mrf.mxu0  ;;  %v7772_v37 = vsel %vm6559_vm6, %v5831_v4, %v4535_v57  ;;  %v4549_v57 = vrot.slane %v7742_v30, 6  ;;  %v3993_v0 = vrot.slane %v7775_v18, 5  ;;  %v5833_v20 = vrot.slane %v7779_v54, 10  ;;  %v7820_v5 = vld [vmem:[%s6506_s25 + $0x9c] sm:$0xc]  ;;  %v929_v44 = vld [vmem:[#allocation2 + $0x28] sm:$0xff] }
  0xfb   : > { %1251 = vst.msk [vmem:[#allocation2 + $0x8] sm:$0xff] %vm256_vm7, %v1219_v21  ;;  %v1224_v9 = vadd.f32 %v6073_v40, %v930_v34  ;;  %6279 = vmatprep.mubr.msk.bf16.mxu1 %vm434_vm1, %v5749_v59  ;;  %v7789_v59 = vsel %vm6559_vm6, %v4537_v16, %v4538_v19  ;;  %v3992_v4 = vrot.slane %v3990_v39, 4  ;;  %v4556_v12 = vrot.slane %v7798_v22, 6  ;;  %v7824_v16 = vld [vmem:[%s6506_s25 + $0xac] sm:$0xf]  ;;  %v934_v54 = vld [vmem:[#allocation2 + $0x50] sm:$0xff] }
  0xfc   : > { %v1495_v31 = vld [vmem:[#allocation2 + $0x10] sm:$0xff]  ;;  %v1107_v43 = vpop.f32.mrf.mxu1  ;;  %v7781_v46 = vpop.f32.mrf.mxu0  ;;  %6310 = vmatmul.mubr.msk.bf16.gmra.mxu0 %vm434_vm1, %v5845_v33  ;;  %v3986_v33 = vrot.slane %v7759_v35, 5  ;;  %v4552_v29 = vrot.slane %v5803_v61, 6  ;;  %v5806_v34 = vld [vmem:[%s6506_s25 + $0xa4] sm:$0x3]  ;;  %v7844_v42 = vsel %vm6544_vm5, %v5736_v51, %v3983_v52  ;;  %v7864_v52 = vsel %vm6544_vm5, %v5737_v58, %v3990_v39 }
  0xfd   : > { %v1789_v13 = vadd.f32 %v7664_v50, %v1495_v31  ;;  %1256 = vst.msk [vmem:[#allocation2 + $0x30] sm:$0xff] %vm256_vm7, %v1224_v9  ;;  %v1222_v47 = vadd.f32 %v1107_v43, %v928_v7  ;;  %6313 = vmatprep.mubr.msk.bf16.mxu0 %vm434_vm1, %v5846_v25  ;;  %v7811_v50 = vsel %vm6559_vm6, %v4544_v38, %v4545_v26  ;;  %v4551_v26 = vrot.slane %v4549_v57, 4  ;;  %v7847_v9 = vld [vmem:[%s6506_s25 + $0xa8] sm:$0xe]  ;;  %v7879_v51 = vld [vmem:[%s6506_s25 + $0xb8] sm:$0xf] }
  0xfe   : > { %v1493_v23 = vld [vmem:[#allocation2] sm:$0xff]  ;;  %v6074_v53 = vpop.f32.mrf.mxu1  ;;  %v7807_v56 = vpop.f32.mrf.mxu0  ;;  %v5848_v25 = vcombine.low %v7772_v37, %v7789_v59  ;;  %v5849_v35 = vcombine.low %v7793_v8, %v7811_v50  ;;  %v7850_v37 = vld [vmem:[%s6506_s25 + $0xb0] sm:$0x1]  ;;  %v7860_v55 = vsel %vm6544_vm5, %v3985_v2, %v3986_v33  ;;  %v5834_v7 = vrot.slane %v7820_v5, 10  ;;  %v7869_v59 = vld [vmem:[%s6506_s25 + $0xac] sm:$0xf] }
  0xff   : > { %1821 = vst.msk [vmem:[#allocation2 + $0x10] sm:$0xff] %vm256_vm7, %v1789_v13  ;;  %v1787_v60 = vadd.f32 %v7698_v62, %v1493_v23  ;;  %1254 = vst.msk [vmem:[#allocation2 + $0x20] sm:$0xff] %vm256_vm7, %v1222_v47  ;;  %v1225_v3 = vadd.f32 %v6074_v53, %v931_v45  ;;  %v5752_v62 = vcombine.low %v7756_v6, %v7768_v32  ;;  %v3997_v43 = vrot.slane %v7824_v16, 5  ;;  %v932_v13 = vld [vmem:[#allocation2 + $0x40] sm:$0xff]  ;;  %v7903_v33 = vld [vmem:[%s6506_s25 + $0xb4] sm:$0xe] }
 0x100   : > { %v1496_v19 = vld [vmem:[#allocation2 + $0x18] sm:$0xff]  ;;  %v1110_v48 = vpop.f32.mrf.mxu1  ;;  %v7826_v21 = vpop.f32.mrf.mxu0  ;;  %v4559_v39 = vrot.slane %v5806_v34, 6  ;;  %v7889_v28 = vsel %vm6544_vm5, %v3992_v4, %v3993_v0  ;;  %v7895_v49 = vsel %vm6559_vm6, %v5833_v20, %v4549_v57  ;;  %v4000_v30 = vrot.slane %v7850_v37, 5  ;;  %v7973_v6 = vld [vmem:[%s6506_s25 + $0xd0] sm:$0xf] }
 0x101   : > { %1819 = vst.msk [vmem:[#allocation2] sm:$0xff] %vm256_vm7, %v1787_v60  ;;  %v1790_v40 = vadd.f32 %v7726_v15, %v1496_v19  ;;  %1257 = vst.msk [vmem:[#allocation2 + $0x38] sm:$0xff] %vm256_vm7, %v1225_v3  ;;  %v1223_v38 = vadd.f32 %v1110_v48, %v929_v44  ;;  %v4563_v57 = vrot.slane %v7869_v59, 6  ;;  %v7913_v61 = vld [vmem:[%s6506_s25 + $0xb8] sm:$0xf]  ;;  %v7921_v0 = vsel %vm6559_vm6, %v5834_v7, %v4556_v12  ;;  %v938_v59 = vld [vmem:[#allocation2 + $0x70] sm:$0xff] }
 0x102   : > { %v1494_v18 = vld [vmem:[#allocation2 + $0x8] sm:$0xff]  ;;  %v6077_v15 = vpop.f32.mrf.mxu1  ;;  %6280 = vmatmul.mubr.msk.bf16.gmra.mxu1 %vm434_vm1, %v5750_v1  ;;  %v7856_v31 = vpop.f32.mrf.mxu0  ;;  %v4558_v1 = vrot.slane %v4556_v12, 4  ;;  %v935_v45 = vld [vmem:[#allocation2 + $0x58] sm:$0xff]  ;;  %v3999_v20 = vrot.slane %v3997_v43, 4  ;;  %v4004_v60 = vrot.slane %v7879_v51, 5  ;;  %v5739_v44 = vrot.slane %v7903_v33, 9 }
 0x103   : > { %1822 = vst.msk [vmem:[#allocation2 + $0x18] sm:$0xff] %vm256_vm7, %v1790_v40  ;;  %v1788_v41 = vadd.f32 %v7748_v10, %v1494_v18  ;;  %1255 = vst.msk [vmem:[#allocation2 + $0x28] sm:$0xff] %vm256_vm7, %v1223_v38  ;;  %v1228_v17 = vadd.f32 %v6077_v15, %v934_v54  ;;  %6283 = vmatprep.mubr.msk.bf16.mxu1 %vm434_vm1, %v5751_v63  ;;  %v7899_v10 = vsel %vm6559_vm6, %v4551_v26, %v4552_v29  ;;  %v5809_v3 = vld [vmem:[%s6506_s25 + $0xb0] sm:$0x3]  ;;  %v7935_v12 = vld [vmem:[%s6506_s25 + $0xbc] sm:$0x1] }
 0x104   : > { %v1499_v22 = vld [vmem:[#allocation2 + $0x30] sm:$0xff]  ;;  %v1123_v47 = vpop.f32.mrf.mxu1  ;;  %v7881_v2 = vpop.f32.mrf.mxu0  ;;  %6314 = vmatmul.mubr.msk.bf16.gmra.mxu0 %vm434_vm1, %v5847_v27  ;;  %v5738_v63 = vrot.slane %v7847_v9, 9  ;;  %v5807_v27 = vld [vmem:[%s6506_s25 + $0xa8] sm:$0xc]  ;;  %v7932_v19 = vsel %vm6559_vm6, %v4558_v1, %v4559_v39  ;;  %v5850_v34 = vcombine.low %v7895_v49, %v7899_v10  ;;  %v4565_v18 = vrot.slane %v4563_v57, 4  ;;  %v936_v10 = vld [vmem:[#allocation2 + $0x60] sm:$0xff] }
 0x105   : > { %1820 = vst.msk [vmem:[#allocation2 + $0x8] sm:$0xff] %vm256_vm7, %v1788_v41  ;;  %v1793_v11 = vadd.f32 %v7781_v46, %v1499_v22  ;;  %1260 = vst.msk [vmem:[#allocation2 + $0x50] sm:$0xff] %vm256_vm7, %v1228_v17  ;;  %v1226_v14 = vadd.f32 %v1123_v47, %v932_v13  ;;  %6317 = vmatprep.mubr.msk.bf16.mxu0 %vm434_vm1, %v5848_v25  ;;  %v5753_v46 = vcombine.low %v7844_v42, %v7860_v55  ;;  %v933_v25 = vld [vmem:[#allocation2 + $0x48] sm:$0xff]  ;;  %v5810_v38 = vld [vmem:[%s6506_s25 + $0xb4] sm:$0xc] }
 0x106   : > { %v1497_v23 = vld [vmem:[#allocation2 + $0x20] sm:$0xff]  ;;  %v6078_v53 = vpop.f32.mrf.mxu1  ;;  %v7915_v58 = vpop.f32.mrf.mxu0  ;;  %v5835_v40 = vrot.slane %v5807_v27, 10  ;;  %v4570_v42 = vrot.slane %v7913_v61, 6  ;;  %v4566_v54 = vrot.slane %v5809_v3, 6  ;;  %v7950_v15 = vld [vmem:[%s6506_s25 + $0xbc] sm:$0x3]  ;;  %v5851_v17 = vcombine.low %v7921_v0, %v7932_v19 }
 0x107   : > { %1825 = vst.msk [vmem:[#allocation2 + $0x30] sm:$0xff] %vm256_vm7, %v1793_v11  ;;  %v1791_v4 = vadd.f32 %v7807_v56, %v1497_v23  ;;  %1258 = vst.msk [vmem:[#allocation2 + $0x40] sm:$0xff] %vm256_vm7, %v1226_v14  ;;  %v1229_v5 = vadd.f32 %v6078_v53, %v935_v45  ;;  %v5754_v56 = vcombine.low %v7864_v52, %v7889_v28  ;;  %v7953_v55 = vld [vmem:[%s6506_s25 + $0xc4] sm:$0xf]  ;;  %v4006_v39 = vrot.slane %v4004_v60, 4  ;;  %v939_v45 = vld [vmem:[#allocation2 + $0x78] sm:$0xff] }
 0x108   : > { %v1500_v48 = vld [vmem:[#allocation2 + $0x38] sm:$0xff]  ;;  %v1126_v26 = vpop.f32.mrf.mxu1  ;;  %v7938_v29 = vpop.f32.mrf.mxu0  ;;  %v7967_v1 = vsel %vm6544_vm5, %v5738_v63, %v3997_v43  ;;  %v4007_v22 = vrot.slane %v7935_v12, 5  ;;  %v7981_v16 = vsel %vm6544_vm5, %v3999_v20, %v4000_v30  ;;  %v5836_v43 = vrot.slane %v5810_v38, 10  ;;  %v7984_v13 = vld [vmem:[%s6506_s25 + $0xc0] sm:$0xe] }
 0x109   : > { %1823 = vst.msk [vmem:[#allocation2 + $0x20] sm:$0xff] %vm256_vm7, %v1791_v4  ;;  %v1794_v9 = vadd.f32 %v7826_v21, %v1500_v48  ;;  %1261 = vst.msk [vmem:[#allocation2 + $0x58] sm:$0xff] %vm256_vm7, %v1229_v5  ;;  %v1227_v37 = vadd.f32 %v1126_v26, %v933_v25  ;;  %v7987_v47 = vld [vmem:[%s6506_s25 + $0xc4] sm:$0xf]  ;;  %v7997_v33 = vsel %vm6559_vm6, %v5835_v40, %v4563_v57  ;;  %v4572_v11 = vrot.slane %v4570_v42, 4 }
 0x10a   : > { %v1498_v7 = vld [vmem:[#allocation2 + $0x28] sm:$0xff]  ;;  %v6081_v41 = vpop.f32.mrf.mxu1  ;;  %6284 = vmatmul.mubr.msk.bf16.gmra.mxu1 %vm434_vm1, %v5752_v62  ;;  %v7959_v21 = vpop.f32.mrf.mxu0  ;;  %v4573_v14 = vrot.slane %v7950_v15, 6  ;;  %v4011_v30 = vrot.slane %v7953_v55, 5  ;;  %v8007_v8 = vsel %vm6559_vm6, %v4565_v18, %v4566_v54  ;;  %v4018_v57 = vrot.slane %v7973_v6, 5  ;;  %v8029_v4 = vld [vmem:[%s6506_s25 + $0xd4] sm:$0x1] }
 0x10b   : > { %1826 = vst.msk [vmem:[#allocation2 + $0x38] sm:$0xff] %vm256_vm7, %v1794_v9  ;;  %v1792_v32 = vadd.f32 %v7856_v31, %v1498_v7  ;;  %1259 = vst.msk [vmem:[#allocation2 + $0x48] sm:$0xff] %vm256_vm7, %v1227_v37  ;;  %v1232_v62 = vadd.f32 %v6081_v41, %v938_v59  ;;  %6287 = vmatprep.mubr.msk.bf16.mxu1 %vm434_vm1, %v5753_v46  ;;  %v5718_v50 = vld [vmem:[%s6506_s25 + $0xc8] sm:$0x1]  ;;  %v5755_v46 = vcombine.low %v7967_v1, %v7981_v16  ;;  %v8059_v59 = vld [vmem:[%s6506_s25 + $0xd0] sm:$0xf] }
 0x10c   : > { %v1503_v49 = vld [vmem:[#allocation2 + $0x50] sm:$0xff]  ;;  %v1139_v63 = vpop.f32.mrf.mxu1  ;;  %v7989_v31 = vpop.f32.mrf.mxu0  ;;  %6318 = vmatmul.mubr.msk.bf16.gmra.mxu0 %vm434_vm1, %v5849_v35  ;;  %v8011_v35 = vld [vmem:[%s6506_s25 + $0xcc] sm:$0xe]  ;;  %v8022_v20 = vsel %vm6544_vm5, %v5739_v44, %v4004_v60  ;;  %v8026_v3 = vsel %vm6544_vm5, %v4006_v39, %v4007_v22  ;;  %v4577_v5 = vrot.slane %v7987_v47, 6  ;;  %v8037_v51 = vsel %vm6559_vm6, %v5836_v43, %v4570_v42  ;;  %v5813_v44 = vld [vmem:[%s6506_s25 + $0xc0] sm:$0xc] }
 0x10d   : > { %1824 = vst.msk [vmem:[#allocation2 + $0x28] sm:$0xff] %vm256_vm7, %v1792_v32  ;;  %v1797_v27 = vadd.f32 %v7881_v2, %v1503_v49  ;;  %1264 = vst.msk [vmem:[#allocation2 + $0x70] sm:$0xff] %vm256_vm7, %v1232_v62  ;;  %v1230_v61 = vadd.f32 %v1139_v63, %v936_v10  ;;  %6321 = vmatprep.mubr.msk.bf16.mxu0 %vm434_vm1, %v5850_v34  ;;  %v5740_v60 = vrot.slane %v7984_v13, 9  ;;  %v5815_v25 = vld [vmem:[%s6506_s25 + $0xc8] sm:$0x3]  ;;  %v4013_v42 = vrot.slane %v4011_v30, 4 }
 0x10e   : > { %v1501_v23 = vld [vmem:[#allocation2 + $0x40] sm:$0xff]  ;;  %v6082_v53 = vpop.f32.mrf.mxu1  ;;  %v8014_v2 = vpop.f32.mrf.mxu0  ;;  %v937_v34 = vld [vmem:[#allocation2 + $0x68] sm:$0xff]  ;;  %v8048_v9 = vsel %vm6559_vm6, %v4572_v11, %v4573_v14  ;;  %v4014_v37 = vrot.slane %v5718_v50, 5  ;;  %v5741_v15 = vrot.slane %v8011_v35, 9  ;;  %v4020_v7 = vrot.slane %v4018_v57, 4  ;;  %v942_v39 = vld [vmem:[#allocation2 + $0x90] sm:$0xff] }
 0x10f   : > { %1829 = vst.msk [vmem:[#allocation2 + $0x50] sm:$0xff] %vm256_vm7, %v1797_v27  ;;  %v1795_v12 = vadd.f32 %v7915_v58, %v1501_v23  ;;  %1262 = vst.msk [vmem:[#allocation2 + $0x60] sm:$0xff] %vm256_vm7, %v1230_v61  ;;  %v1233_v48 = vadd.f32 %v6082_v53, %v939_v45  ;;  %v5852_v58 = vcombine.low %v7997_v33, %v8007_v8  ;;  %v8062_v41 = vld [vmem:[%s6506_s25 + $0xdc] sm:$0xf]  ;;  %v4021_v32 = vrot.slane %v8029_v4, 5  ;;  %v940_v63 = vld [vmem:[#allocation2 + $0x80] sm:$0xff] }
 0x110   : > { %v1504_v26 = vld [vmem:[#allocation2 + $0x58] sm:$0xff]  ;;  %v1142_v40 = vpop.f32.mrf.mxu1  ;;  %v8042_v38 = vpop.f32.mrf.mxu0  ;;  %v5837_v62 = vrot.slane %v5813_v44, 10  ;;  %v4579_v16 = vrot.slane %v4577_v5, 4  ;;  %v4580_v43 = vrot.slane %v5815_v25, 6  ;;  %v5756_v52 = vcombine.low %v8022_v20, %v8026_v3  ;;  %v8080_v28 = vld [vmem:[%s6506_s25 + $0xcc] sm:$0xc] }
 0x111   : > { %1827 = vst.msk [vmem:[#allocation2 + $0x40] sm:$0xff] %vm256_vm7, %v1795_v12  ;;  %v1798_v18 = vadd.f32 %v7938_v29, %v1504_v26  ;;  %1265 = vst.msk [vmem:[#allocation2 + $0x78] sm:$0xff] %vm256_vm7, %v1233_v48  ;;  %v1231_v54 = vadd.f32 %v1142_v40, %v937_v34  ;;  %v4012_v14 = vsel %vm6544_vm5, %v5740_v60, %v4011_v30  ;;  %v8100_v61 = vld [vmem:[%s6506_s25 + $0xd4] sm:$0x3]  ;;  %v4025_v8 = vrot.slane %v8062_v41, 5  ;;  %v943_v23 = vld [vmem:[#allocation2 + $0x98] sm:$0xff] }
 0x112   : > { %v1502_v1 = vld [vmem:[#allocation2 + $0x48] sm:$0xff]  ;;  %v6085_v22 = vpop.f32.mrf.mxu1  ;;  %6288 = vmatmul.mubr.msk.bf16.gmra.mxu1 %vm434_vm1, %v5754_v56  ;;  %v8068_v29 = vpop.f32.mrf.mxu0  ;;  %v8083_v56 = vld [vmem:[%s6506_s25 + $0xdc] sm:$0xf]  ;;  %v4015_v27 = vsel %vm6544_vm5, %v4013_v42, %v4014_v37  ;;  %v8111_v55 = vsel %vm6544_vm5, %v5741_v15, %v4018_v57  ;;  %v5722_v30 = vld [vmem:[%s6506_s25 + $0xd8] sm:$0xe]  ;;  %v8120_v53 = vsel %vm6544_vm5, %v4020_v7, %v4021_v32  ;;  %v4578_v6 = vsel %vm6559_vm6, %v5837_v62, %v4577_v5 }
 0x113   : > { %1830 = vst.msk [vmem:[#allocation2 + $0x58] sm:$0xff] %vm256_vm7, %v1798_v18  ;;  %v1796_v13 = vadd.f32 %v7959_v21, %v1502_v1  ;;  %1263 = vst.msk [vmem:[#allocation2 + $0x68] sm:$0xff] %vm256_vm7, %v1231_v54  ;;  %v1236_v49 = vadd.f32 %v6085_v22, %v942_v39  ;;  %6291 = vmatprep.mubr.msk.bf16.mxu1 %vm434_vm1, %v5755_v46  ;;  %v5853_v21 = vcombine.low %v8037_v51, %v8048_v9  ;;  %v5724_v50 = vld [vmem:[%s6506_s25 + $0xe0] sm:$0x1]  ;;  %v8129_v46 = vld [vmem:[%s6506_s25 + $0xe8] sm:$0xf] }
 0x114   : > { %v1507_v10 = vld [vmem:[#allocation2 + $0x70] sm:$0xff]  ;;  %v1155_v33 = vpop.f32.mrf.mxu1  ;;  %v8085_v11 = vpop.f32.mrf.mxu0  ;;  %6322 = vmatmul.mubr.msk.bf16.gmra.mxu0 %vm434_vm1, %v5851_v17  ;;  %v4584_v17 = vrot.slane %v8059_v59, 6  ;;  %v4581_v57 = vsel %vm6559_vm6, %v4579_v16, %v4580_v43  ;;  %v4591_v20 = vrot.slane %v8083_v56, 6  ;;  %v5757_v12 = vcombine.low %v4012_v14, %v4015_v27  ;;  %v5819_v48 = vld [vmem:[%s6506_s25 + $0xd8] sm:$0xc]  ;;  %v941_v44 = vld [vmem:[#allocation2 + $0x88] sm:$0xff] }
 0x115   : > { %1828 = vst.msk [vmem:[#allocation2 + $0x48] sm:$0xff] %vm256_vm7, %v1796_v13  ;;  %v1801_v0 = vadd.f32 %v7989_v31, %v1507_v10  ;;  %1268 = vst.msk [vmem:[#allocation2 + $0x90] sm:$0xff] %vm256_vm7, %v1236_v49  ;;  %v1234_v19 = vadd.f32 %v1155_v33, %v940_v63  ;;  %6325 = vmatprep.mubr.msk.bf16.mxu0 %vm434_vm1, %v5852_v58  ;;  %v5838_v47 = vrot.slane %v8080_v28, 10  ;;  %v5821_v5 = vld [vmem:[%s6506_s25 + $0xe0] sm:$0x3]  ;;  %v4587_v34 = vrot.slane %v8100_v61, 6 }
 0x116   : > { %v1505_v35 = vld [vmem:[#allocation2 + $0x60] sm:$0xff]  ;;  %v6086_v31 = vpop.f32.mrf.mxu1  ;;  %v8116_v45 = vpop.f32.mrf.mxu0  ;;  %v5742_v40 = vrot.slane %v5722_v30, 9  ;;  %v4028_v58 = vrot.slane %v5724_v50, 5  ;;  %v5854_v18 = vcombine.low %v4578_v6, %v4581_v57  ;;  %v4586_v54 = vrot.slane %v4584_v17, 4  ;;  %v8149_v15 = vld [vmem:[%s6506_s25 + $0xe8] sm:$0xf] }
 0x117   : > { %1833 = vst.msk [vmem:[#allocation2 + $0x70] sm:$0xff] %vm256_vm7, %v1801_v0  ;;  %v1799_v3 = vadd.f32 %v8014_v2, %v1505_v35  ;;  %1266 = vst.msk [vmem:[#allocation2 + $0x80] sm:$0xff] %vm256_vm7, %v1234_v19  ;;  %v1237_v4 = vadd.f32 %v6086_v31, %v943_v23  ;;  %v4027_v2 = vrot.slane %v4025_v8, 4  ;;  %v946_v1 = vld [vmem:[#allocation2 + $0xb0] sm:$0xff]  ;;  %v5839_v32 = vrot.slane %v5819_v48, 10  ;;  %v944_v10 = vld [vmem:[#allocation2 + $0xa0] sm:$0xff] }
 0x118   : > { %v1508_v60 = vld [vmem:[#allocation2 + $0x78] sm:$0xff]  ;;  %v1158_v25 = vpop.f32.mrf.mxu1  ;;  %v8138_v26 = vpop.f32.mrf.mxu0  ;;  %v4594_v62 = vrot.slane %v5821_v5, 6  ;;  %v5725_v13 = vld [vmem:[%s6506_s25 + $0xe4] sm:$0xe]  ;;  %v5727_v49 = vld [vmem:[%s6506_s25 + $0xec] sm:$0x1]  ;;  %v4026_v14 = vsel %vm6544_vm5, %v5742_v40, %v4025_v8  ;;  %v4585_v41 = vsel %vm6559_vm6, %v5838_v47, %v4584_v17 }
 0x119   : > { %1831 = vst.msk [vmem:[#allocation2 + $0x60] sm:$0xff] %vm256_vm7, %v1799_v3  ;;  %v1802_v42 = vadd.f32 %v8042_v38, %v1508_v60  ;;  %1269 = vst.msk [vmem:[#allocation2 + $0x98] sm:$0xff] %vm256_vm7, %v1237_v4  ;;  %v1235_v37 = vadd.f32 %v1158_v25, %v941_v44  ;;  %v4593_v38 = vrot.slane %v4591_v20, 4  ;;  %v4029_v27 = vsel %vm6544_vm5, %v4027_v2, %v4028_v58  ;;  %v5822_v8 = vld [vmem:[%s6506_s25 + $0xe4] sm:$0xc]  ;;  %v947_v19 = vld [vmem:[#allocation2 + $0xb8] sm:$0xff] }
 0x11a   : > { %v1506_v7 = vld [vmem:[#allocation2 + $0x68] sm:$0xff]  ;;  %v6089_v39 = vpop.f32.mrf.mxu1  ;;  %6292 = vmatmul.mubr.msk.bf16.gmra.mxu1 %vm434_vm1, %v5756_v52  ;;  %v8152_v22 = vpop.f32.mrf.mxu0  ;;  %v4032_v52 = vrot.slane %v8129_v46, 5  ;;  %v4598_v61 = vrot.slane %v8149_v15, 6  ;;  %v5743_v50 = vrot.slane %v5725_v13, 9  ;;  %v4592_v35 = vsel %vm6559_vm6, %v5839_v32, %v4591_v20  ;;  %v950_v44 = vld [vmem:[#allocation2 + $0xd0] sm:$0xff] }
 0x11b   : > { %1834 = vst.msk [vmem:[#allocation2 + $0x78] sm:$0xff] %vm256_vm7, %v1802_v42  ;;  %v1800_v16 = vadd.f32 %v8068_v29, %v1506_v7  ;;  %1267 = vst.msk [vmem:[#allocation2 + $0x88] sm:$0xff] %vm256_vm7, %v1235_v37  ;;  %v1240_v43 = vadd.f32 %v6089_v39, %v946_v1  ;;  %6295 = vmatprep.mubr.msk.bf16.mxu1 %vm434_vm1, %v5757_v12  ;;  %v5758_v29 = vcombine.low %v8111_v55, %v8120_v53  ;;  %v5824_v23 = vld [vmem:[%s6506_s25 + $0xec] sm:$0x3]  ;;  %v948_v37 = vld [vmem:[#allocation2 + $0xc0] sm:$0xff] }
 0x11c   : > { %v1511_v28 = vld [vmem:[#allocation2 + $0x90] sm:$0xff]  ;;  %v1171_v63 = vpop.f32.mrf.mxu1  ;;  %v6123_v33 = vpop.f32.mrf.mxu0  ;;  %6326 = vmatmul.mubr.msk.bf16.gmra.mxu0 %vm434_vm1, %v5853_v21  ;;  %v4588_v21 = vsel %vm6559_vm6, %v4586_v54, %v4587_v34  ;;  %v4595_v59 = vsel %vm6559_vm6, %v4593_v38, %v4594_v62  ;;  %v5759_v53 = vcombine.low %v4026_v14, %v4029_v27  ;;  %v4034_v6 = vrot.slane %v4032_v52, 4  ;;  %v945_v46 = vld [vmem:[#allocation2 + $0xa8] sm:$0xff] }
 0x11d   : > { %1832 = vst.msk [vmem:[#allocation2 + $0x68] sm:$0xff] %vm256_vm7, %v1800_v16  ;;  %v1805_v51 = vadd.f32 %v8085_v11, %v1511_v28  ;;  %1272 = vst.msk [vmem:[#allocation2 + $0xb0] sm:$0xff] %vm256_vm7, %v1240_v43  ;;  %v1238_v9 = vadd.f32 %v1171_v63, %v944_v10  ;;  %6329 = vmatprep.mubr.msk.bf16.mxu0 %vm434_vm1, %v5854_v18  ;;  %v4035_v11 = vrot.slane %v5727_v49, 5  ;;  %v5840_v12 = vrot.slane %v5822_v8, 10  ;;  %v949_v49 = vld [vmem:[#allocation2 + $0xc8] sm:$0xff] }
 0x11e   : > { %v1509_v0 = vld [vmem:[#allocation2 + $0x80] sm:$0xff]  ;;  %v6090_v55 = vpop.f32.mrf.mxu1  ;;  %v1740_v30 = vpop.f32.mrf.mxu0  ;;  %v5855_v4 = vcombine.low %v4585_v41, %v4588_v21  ;;  %v4600_v20 = vrot.slane %v4598_v61, 4  ;;  %v4601_v5 = vrot.slane %v5824_v23, 6 }
 0x11f   : > { %1837 = vst.msk [vmem:[#allocation2 + $0x90] sm:$0xff] %vm256_vm7, %v1805_v51  ;;  %v1803_v17 = vadd.f32 %v8116_v45, %v1509_v0  ;;  %1270 = vst.msk [vmem:[#allocation2 + $0xa0] sm:$0xff] %vm256_vm7, %v1238_v9  ;;  %v1241_v31 = vadd.f32 %v6090_v55, %v947_v19  ;;  %v5856_v45 = vcombine.low %v4592_v35, %v4595_v59  ;;  %v952_v41 = vld [vmem:[#allocation2 + $0xe0] sm:$0xff] }
 0x120   : > { %v1512_v57 = vld [vmem:[#allocation2 + $0x98] sm:$0xff]  ;;  %v1174_v3 = vpop.f32.mrf.mxu1  ;;  %v6124_v56 = vpop.f32.mrf.mxu0  ;;  %v4036_v58 = vsel %vm6544_vm5, %v4034_v6, %v4035_v11  ;;  %v4599_v1 = vsel %vm6559_vm6, %v5840_v12, %v4598_v61  ;;  %v4602_v24 = vsel %vm6559_vm6, %v4600_v20, %v4601_v5 }
 0x121   : > { %1835 = vst.msk [vmem:[#allocation2 + $0x80] sm:$0xff] %vm256_vm7, %v1803_v17  ;;  %v1806_v47 = vadd.f32 %v8138_v26, %v1512_v57  ;;  %1273 = vst.msk [vmem:[#allocation2 + $0xb8] sm:$0xff] %vm256_vm7, %v1241_v31  ;;  %v1239_v48 = vadd.f32 %v1174_v3, %v945_v46  ;;  %v4033_v26 = vsel %vm6544_vm5, %v5743_v50, %v4032_v52  ;;  %v953_v17 = vld [vmem:[#allocation2 + $0xe8] sm:$0xff]  ;;  %v1886_v3 = vld [vmem:[#allocation2 + $0x10] sm:$0xff] }
 0x122   : > { %v1510_v60 = vld [vmem:[#allocation2 + $0x88] sm:$0xff]  ;;  %v6093_v25 = vpop.f32.mrf.mxu1  ;;  %6296 = vmatmul.mubr.msk.bf16.gmra.mxu1 %vm434_vm1, %v5758_v29  ;;  %v1743_v34 = vpop.f32.mrf.mxu0  ;;  %v5760_v62 = vcombine.low %v4033_v26, %v4036_v58  ;;  %v5857_v10 = vcombine.low %v4599_v1, %v4602_v24  ;;  %v954_v29 = vld [vmem:[#allocation2 + $0xf0] sm:$0xff] }
 0x123   : > { %1838 = vst.msk [vmem:[#allocation2 + $0x98] sm:$0xff] %vm256_vm7, %v1806_v47  ;;  %v1804_v40 = vadd.f32 %v8152_v22, %v1510_v60  ;;  %1271 = vst.msk [vmem:[#allocation2 + $0xa8] sm:$0xff] %vm256_vm7, %v1239_v48  ;;  %v1244_v2 = vadd.f32 %v6093_v25, %v950_v44  ;;  %6299 = vmatprep.mubr.msk.bf16.mxu1 %vm434_vm1, %v5759_v53  ;;  %v951_v22 = vld [vmem:[#allocation2 + $0xd8] sm:$0xff]  ;;  %v1884_v48 = vld [vmem:[#allocation2] sm:$0xff] }
 0x124   : > { %v1515_v42 = vld [vmem:[#allocation2 + $0xb0] sm:$0xff]  ;;  %v1187_v18 = vpop.f32.mrf.mxu1  ;;  %v6127_v54 = vpop.f32.mrf.mxu0  ;;  %6330 = vmatmul.mubr.msk.bf16.gmra.mxu0 %vm434_vm1, %v5855_v4 }
 0x125   : > { %1836 = vst.msk [vmem:[#allocation2 + $0x88] sm:$0xff] %vm256_vm7, %v1804_v40  ;;  %v1809_v15 = vadd.f32 %v6123_v33, %v1515_v42  ;;  %1276 = vst.msk [vmem:[#allocation2 + $0xd0] sm:$0xff] %vm256_vm7, %v1244_v2  ;;  %v1242_v7 = vadd.f32 %v1187_v18, %v948_v37  ;;  %6333 = vmatprep.mubr.msk.bf16.mxu0 %vm434_vm1, %v5856_v45  ;;  %v1885_v37 = vld [vmem:[#allocation2 + $0x8] sm:$0xff]  ;;  %v1890_v24 = vld [vmem:[#allocation2 + $0x30] sm:$0xff] }
 0x126   : > { %v1513_v39 = vld [vmem:[#allocation2 + $0xa0] sm:$0xff]  ;;  %v6094_v32 = vpop.f32.mrf.mxu1  ;;  %v1756_v38 = vpop.f32.mrf.mxu0 }
 0x127   : > { %1841 = vst.msk [vmem:[#allocation2 + $0xb0] sm:$0xff] %vm256_vm7, %v1809_v15  ;;  %v1807_v16 = vadd.f32 %v1740_v30, %v1513_v39  ;;  %1274 = vst.msk [vmem:[#allocation2 + $0xc0] sm:$0xff] %vm256_vm7, %v1242_v7  ;;  %v1245_v43 = vadd.f32 %v6094_v32, %v951_v22  ;;  %v955_v30 = vld [vmem:[#allocation2 + $0xf8] sm:$0xff] }
 0x128   : > { %v1516_v13 = vld [vmem:[#allocation2 + $0xb8] sm:$0xff]  ;;  %v1190_v52 = vpop.f32.mrf.mxu1  ;;  %v6128_v28 = vpop.f32.mrf.mxu0 }
 0x129   : > { %1839 = vst.msk [vmem:[#allocation2 + $0xa0] sm:$0xff] %vm256_vm7, %v1807_v16  ;;  %v1810_v36 = vadd.f32 %v6124_v56, %v1516_v13  ;;  %1277 = vst.msk [vmem:[#allocation2 + $0xd8] sm:$0xff] %vm256_vm7, %v1245_v43  ;;  %v1243_v63 = vadd.f32 %v1190_v52, %v949_v49  ;;  %v1888_v16 = vld [vmem:[#allocation2 + $0x20] sm:$0xff] }
 0x12a   : > { %v1514_v33 = vld [vmem:[#allocation2 + $0xa8] sm:$0xff]  ;;  %v6097_v14 = vpop.f32.mrf.mxu1  ;;  %6300 = vmatmul.mubr.msk.bf16.gmra.mxu1 %vm434_vm1, %v5760_v62  ;;  %v1759_v27 = vpop.f32.mrf.mxu0 }
 0x12b   : > { %1842 = vst.msk [vmem:[#allocation2 + $0xb8] sm:$0xff] %vm256_vm7, %v1810_v36  ;;  %v1808_v61 = vadd.f32 %v1743_v34, %v1514_v33  ;;  %1275 = vst.msk [vmem:[#allocation2 + $0xc8] sm:$0xff] %vm256_vm7, %v1243_v63  ;;  %v1248_v51 = vadd.f32 %v6097_v14, %v954_v29  ;;  %v1887_v34 = vld [vmem:[#allocation2 + $0x18] sm:$0xff] }
 0x12c   : > { %v1519_v9 = vld [vmem:[#allocation2 + $0xd0] sm:$0xff]  ;;  %v1203_v21 = vpop.f32.mrf.mxu1  ;;  %v6131_v8 = vpop.f32.mrf.mxu0  ;;  %6334 = vmatmul.mubr.msk.bf16.gmra.mxu0 %vm434_vm1, %v5857_v10  ;;  %v1891_v10 = vld [vmem:[#allocation2 + $0x38] sm:$0xff] }
 0x12d   : > { %1840 = vst.msk [vmem:[#allocation2 + $0xa8] sm:$0xff] %vm256_vm7, %v1808_v61  ;;  %v1813_v0 = vadd.f32 %v6127_v54, %v1519_v9  ;;  %1280 = vst.msk [vmem:[#allocation2 + $0xf0] sm:$0xff] %vm256_vm7, %v1248_v51  ;;  %v1246_v19 = vadd.f32 %v1203_v21, %v952_v41 }
 0x12e   : > { %v1517_v55 = vld [vmem:[#allocation2 + $0xc0] sm:$0xff]  ;;  %v6098_v50 = vpop.f32.mrf.mxu1  ;;  %v1772_v11 = vpop.f32.mrf.mxu0 }
 0x12f   : > { %1845 = vst.msk [vmem:[#allocation2 + $0xd0] sm:$0xff] %vm256_vm7, %v1813_v0  ;;  %v1811_v35 = vadd.f32 %v1756_v38, %v1517_v55  ;;  %1278 = vst.msk [vmem:[#allocation2 + $0xe0] sm:$0xff] %vm256_vm7, %v1246_v19  ;;  %v1249_v59 = vadd.f32 %v6098_v50, %v955_v30 }
 0x130   : > { %v1520_v23 = vld [vmem:[#allocation2 + $0xd8] sm:$0xff]  ;;  %v1206_v31 = vpop.f32.mrf.mxu1  ;;  %v6132_v53 = vpop.f32.mrf.mxu0 }
 0x131   : > { %1843 = vst.msk [vmem:[#allocation2 + $0xc0] sm:$0xff] %vm256_vm7, %v1811_v35  ;;  %v1814_v6 = vadd.f32 %v6128_v28, %v1520_v23  ;;  %1281 = vst.msk [vmem:[#allocation2 + $0xf8] sm:$0xff] %vm256_vm7, %v1249_v59  ;;  %v1247_v57 = vadd.f32 %v1206_v31, %v953_v17 }
 0x132   : > { %v1518_v46 = vld [vmem:[#allocation2 + $0xc8] sm:$0xff]  ;;  %v6137_v56 = vpop.f32.mrf.mxu1  ;;  %v1775_v4 = vpop.f32.mrf.mxu0 }
 0x133   : > { %1846 = vst.msk [vmem:[#allocation2 + $0xd8] sm:$0xff] %vm256_vm7, %v1814_v6  ;;  %v1812_v12 = vadd.f32 %v1759_v27, %v1518_v46  ;;  %1279 = vst.msk [vmem:[#allocation2 + $0xe8] sm:$0xff] %vm256_vm7, %v1247_v57  ;;  %v2212_v20 = vadd.f32 %v6137_v56, %v1886_v3  ;;  %v1889_v27 = vld [vmem:[#allocation2 + $0x28] sm:$0xff] }
 0x134   : > { %v1523_v47 = vld [vmem:[#allocation2 + $0xf0] sm:$0xff]  ;;  %v2083_v45 = vpop.f32.mrf.mxu1  ;;  %v6171_v5 = vpop.f32.mrf.mxu0 }
 0x135   : > { %1844 = vst.msk [vmem:[#allocation2 + $0xc8] sm:$0xff] %vm256_vm7, %v1812_v12  ;;  %v1817_v60 = vadd.f32 %v6131_v8, %v1523_v47  ;;  %2244 = vst.msk [vmem:[#allocation2 + $0x10] sm:$0xff] %vm256_vm7, %v2212_v20  ;;  %v2210_v44 = vadd.f32 %v2083_v45, %v1884_v48  ;;  %v1894_v8 = vld [vmem:[#allocation2 + $0x50] sm:$0xff] }
 0x136   : > { %v1521_v25 = vld [vmem:[#allocation2 + $0xe0] sm:$0xff]  ;;  %v6138_v40 = vpop.f32.mrf.mxu1  ;;  %v2649_v2 = vpop.f32.mrf.mxu0 }
 0x137   : > { %1849 = vst.msk [vmem:[#allocation2 + $0xf0] sm:$0xff] %vm256_vm7, %v1817_v60  ;;  %v1815_v26 = vadd.f32 %v1772_v11, %v1521_v25  ;;  %2242 = vst.msk [vmem:[#allocation2] sm:$0xff] %vm256_vm7, %v2210_v44  ;;  %v2213_v58 = vadd.f32 %v6138_v40, %v1887_v34  ;;  %v1892_v11 = vld [vmem:[#allocation2 + $0x40] sm:$0xff] }
 0x138   : > { %v1524_v42 = vld [vmem:[#allocation2 + $0xf8] sm:$0xff]  ;;  %v2086_v18 = vpop.f32.mrf.mxu1  ;;  %v6172_v54 = vpop.f32.mrf.mxu0 }
 0x139   : > { %1847 = vst.msk [vmem:[#allocation2 + $0xe0] sm:$0xff] %vm256_vm7, %v1815_v26  ;;  %v1818_v15 = vadd.f32 %v6132_v53, %v1524_v42  ;;  %2245 = vst.msk [vmem:[#allocation2 + $0x18] sm:$0xff] %vm256_vm7, %v2213_v58  ;;  %v2211_v7 = vadd.f32 %v2086_v18, %v1885_v37  ;;  %v1895_v53 = vld [vmem:[#allocation2 + $0x58] sm:$0xff] }
 0x13a   : > { %v1522_v1 = vld [vmem:[#allocation2 + $0xe8] sm:$0xff]  ;;  %v6141_v39 = vpop.f32.mrf.mxu1  ;;  %v2652_v22 = vpop.f32.mrf.mxu0 }
 0x13b   : > { %1850 = vst.msk [vmem:[#allocation2 + $0xf8] sm:$0xff] %vm256_vm7, %v1818_v15  ;;  %v1816_v32 = vadd.f32 %v1775_v4, %v1522_v1  ;;  %2243 = vst.msk [vmem:[#allocation2 + $0x8] sm:$0xff] %vm256_vm7, %v2211_v7  ;;  %v2216_v38 = vadd.f32 %v6141_v39, %v1890_v24  ;;  %v1893_v4 = vld [vmem:[#allocation2 + $0x48] sm:$0xff] }
 0x13c   : > { %v2484_v62 = vld [vmem:[#allocation2 + $0x10] sm:$0xff]  ;;  %v2099_v43 = vpop.f32.mrf.mxu1  ;;  %v6175_v13 = vpop.f32.mrf.mxu0 }
 0x13d   : > { %1848 = vst.msk [vmem:[#allocation2 + $0xe8] sm:$0xff] %vm256_vm7, %v1816_v32  ;;  %v2778_v49 = vadd.f32 %v6171_v5, %v2484_v62  ;;  %2248 = vst.msk [vmem:[#allocation2 + $0x30] sm:$0xff] %vm256_vm7, %v2216_v38  ;;  %v2214_v52 = vadd.f32 %v2099_v43, %v1888_v16  ;;  %v1898_v5 = vld [vmem:[#allocation2 + $0x70] sm:$0xff] }
 0x13e   : > { %v2482_v28 = vld [vmem:[#allocation2] sm:$0xff]  ;;  %v6142_v36 = vpop.f32.mrf.mxu1  ;;  %v2665_v63 = vpop.f32.mrf.mxu0 }
 0x13f   : > { %2810 = vst.msk [vmem:[#allocation2 + $0x10] sm:$0xff] %vm256_vm7, %v2778_v49  ;;  %v2776_v33 = vadd.f32 %v2649_v2, %v2482_v28  ;;  %2246 = vst.msk [vmem:[#allocation2 + $0x20] sm:$0xff] %vm256_vm7, %v2214_v52  ;;  %v2217_v29 = vadd.f32 %v6142_v36, %v1891_v10  ;;  %v1896_v2 = vld [vmem:[#allocation2 + $0x60] sm:$0xff] }
 0x140   : > { %v2485_v14 = vld [vmem:[#allocation2 + $0x18] sm:$0xff]  ;;  %v2102_v61 = vpop.f32.mrf.mxu1  ;;  %v6176_v51 = vpop.f32.mrf.mxu0 }
 0x141   : > { %2808 = vst.msk [vmem:[#allocation2] sm:$0xff] %vm256_vm7, %v2776_v33  ;;  %v2779_v9 = vadd.f32 %v6172_v54, %v2485_v14  ;;  %2249 = vst.msk [vmem:[#allocation2 + $0x38] sm:$0xff] %vm256_vm7, %v2217_v29  ;;  %v2215_v41 = vadd.f32 %v2102_v61, %v1889_v27  ;;  %v1899_v54 = vld [vmem:[#allocation2 + $0x78] sm:$0xff] }
 0x142   : > { %v2483_v21 = vld [vmem:[#allocation2 + $0x8] sm:$0xff]  ;;  %v6145_v0 = vpop.f32.mrf.mxu1  ;;  %v2668_v19 = vpop.f32.mrf.mxu0 }
 0x143   : > { %2811 = vst.msk [vmem:[#allocation2 + $0x18] sm:$0xff] %vm256_vm7, %v2779_v9  ;;  %v2777_v55 = vadd.f32 %v2652_v22, %v2483_v21  ;;  %2247 = vst.msk [vmem:[#allocation2 + $0x28] sm:$0xff] %vm256_vm7, %v2215_v41  ;;  %v2220_v30 = vadd.f32 %v6145_v0, %v1894_v8  ;;  %v1897_v22 = vld [vmem:[#allocation2 + $0x68] sm:$0xff] }
 0x144   : > { %v2488_v50 = vld [vmem:[#allocation2 + $0x30] sm:$0xff]  ;;  %v2115_v35 = vpop.f32.mrf.mxu1  ;;  %v6179_v59 = vpop.f32.mrf.mxu0 }
 0x145   : > { %2809 = vst.msk [vmem:[#allocation2 + $0x8] sm:$0xff] %vm256_vm7, %v2777_v55  ;;  %v2782_v23 = vadd.f32 %v6175_v13, %v2488_v50  ;;  %2252 = vst.msk [vmem:[#allocation2 + $0x50] sm:$0xff] %vm256_vm7, %v2220_v30  ;;  %v2218_v17 = vadd.f32 %v2115_v35, %v1892_v11  ;;  %v1902_v13 = vld [vmem:[#allocation2 + $0x90] sm:$0xff] }
 0x146   : > { %v2486_v31 = vld [vmem:[#allocation2 + $0x20] sm:$0xff]  ;;  %v6146_v6 = vpop.f32.mrf.mxu1  ;;  %v2681_v57 = vpop.f32.mrf.mxu0 }
 0x147   : > { %2814 = vst.msk [vmem:[#allocation2 + $0x30] sm:$0xff] %vm256_vm7, %v2782_v23  ;;  %v2780_v46 = vadd.f32 %v2665_v63, %v2486_v31  ;;  %2250 = vst.msk [vmem:[#allocation2 + $0x40] sm:$0xff] %vm256_vm7, %v2218_v17  ;;  %v2221_v3 = vadd.f32 %v6146_v6, %v1895_v53  ;;  %v1900_v63 = vld [vmem:[#allocation2 + $0x80] sm:$0xff] }
 0x148   : > { %v2489_v56 = vld [vmem:[#allocation2 + $0x38] sm:$0xff]  ;;  %v2118_v12 = vpop.f32.mrf.mxu1  ;;  %v6180_v20 = vpop.f32.mrf.mxu0 }
 0x149   : > { %2812 = vst.msk [vmem:[#allocation2 + $0x20] sm:$0xff] %vm256_vm7, %v2780_v46  ;;  %v2783_v47 = vadd.f32 %v6176_v51, %v2489_v56  ;;  %2253 = vst.msk [vmem:[#allocation2 + $0x58] sm:$0xff] %vm256_vm7, %v2221_v3  ;;  %v2219_v48 = vadd.f32 %v2118_v12, %v1893_v4  ;;  %v1903_v51 = vld [vmem:[#allocation2 + $0x98] sm:$0xff] }
 0x14a   : > { %v2487_v45 = vld [vmem:[#allocation2 + $0x28] sm:$0xff]  ;;  %v6149_v60 = vpop.f32.mrf.mxu1  ;;  %v2684_v44 = vpop.f32.mrf.mxu0 }
 0x14b   : > { %2815 = vst.msk [vmem:[#allocation2 + $0x38] sm:$0xff] %vm256_vm7, %v2783_v47  ;;  %v2781_v25 = vadd.f32 %v2668_v19, %v2487_v45  ;;  %2251 = vst.msk [vmem:[#allocation2 + $0x48] sm:$0xff] %vm256_vm7, %v2219_v48  ;;  %v2224_v34 = vadd.f32 %v6149_v60, %v1898_v5  ;;  %v1901_v19 = vld [vmem:[#allocation2 + $0x88] sm:$0xff] }
 0x14c   : > { %v2492_v40 = vld [vmem:[#allocation2 + $0x50] sm:$0xff]  ;;  %v2131_v26 = vpop.f32.mrf.mxu1  ;;  %v6183_v58 = vpop.f32.mrf.mxu0 }
 0x14d   : > { %2813 = vst.msk [vmem:[#allocation2 + $0x28] sm:$0xff] %vm256_vm7, %v2781_v25  ;;  %v2786_v42 = vadd.f32 %v6179_v59, %v2492_v40  ;;  %2256 = vst.msk [vmem:[#allocation2 + $0x70] sm:$0xff] %vm256_vm7, %v2224_v34  ;;  %v2222_v37 = vadd.f32 %v2131_v26, %v1896_v2  ;;  %v1906_v59 = vld [vmem:[#allocation2 + $0xb0] sm:$0xff] }
 0x14e   : > { %v2490_v18 = vld [vmem:[#allocation2 + $0x40] sm:$0xff]  ;;  %v6150_v15 = vpop.f32.mrf.mxu1  ;;  %v2697_v7 = vpop.f32.mrf.mxu0 }
 0x14f   : > { %2818 = vst.msk [vmem:[#allocation2 + $0x50] sm:$0xff] %vm256_vm7, %v2786_v42  ;;  %v2784_v1 = vadd.f32 %v2681_v57, %v2490_v18  ;;  %2254 = vst.msk [vmem:[#allocation2 + $0x60] sm:$0xff] %vm256_vm7, %v2222_v37  ;;  %v2225_v24 = vadd.f32 %v6150_v15, %v1899_v54  ;;  %v1904_v57 = vld [vmem:[#allocation2 + $0xa0] sm:$0xff] }
 0x150   : > { %v2493_v39 = vld [vmem:[#allocation2 + $0x58] sm:$0xff]  ;;  %v2134_v32 = vpop.f32.mrf.mxu1  ;;  %v6184_v38 = vpop.f32.mrf.mxu0 }
 0x151   : > { %2816 = vst.msk [vmem:[#allocation2 + $0x40] sm:$0xff] %vm256_vm7, %v2784_v1  ;;  %v2787_v62 = vadd.f32 %v6180_v20, %v2493_v39  ;;  %2257 = vst.msk [vmem:[#allocation2 + $0x78] sm:$0xff] %vm256_vm7, %v2225_v24  ;;  %v2223_v16 = vadd.f32 %v2134_v32, %v1897_v22  ;;  %v1907_v20 = vld [vmem:[#allocation2 + $0xb8] sm:$0xff] }
 0x152   : > { %v2491_v43 = vld [vmem:[#allocation2 + $0x48] sm:$0xff]  ;;  %v6153_v49 = vpop.f32.mrf.mxu1  ;;  %v2700_v52 = vpop.f32.mrf.mxu0 }
 0x153   : > { %2819 = vst.msk [vmem:[#allocation2 + $0x58] sm:$0xff] %vm256_vm7, %v2787_v62  ;;  %v2785_v28 = vadd.f32 %v2684_v44, %v2491_v43  ;;  %2255 = vst.msk [vmem:[#allocation2 + $0x68] sm:$0xff] %vm256_vm7, %v2223_v16  ;;  %v2228_v10 = vadd.f32 %v6153_v49, %v1902_v13  ;;  %v1905_v44 = vld [vmem:[#allocation2 + $0xa8] sm:$0xff] }
 0x154   : > { %v2496_v36 = vld [vmem:[#allocation2 + $0x70] sm:$0xff]  ;;  %v2147_v33 = vpop.f32.mrf.mxu1  ;;  %v6187_v29 = vpop.f32.mrf.mxu0 }
 0x155   : > { %2817 = vst.msk [vmem:[#allocation2 + $0x48] sm:$0xff] %vm256_vm7, %v2785_v28  ;;  %v2790_v14 = vadd.f32 %v6183_v58, %v2496_v36  ;;  %2260 = vst.msk [vmem:[#allocation2 + $0x90] sm:$0xff] %vm256_vm7, %v2228_v10  ;;  %v2226_v27 = vadd.f32 %v2147_v33, %v1900_v63  ;;  %v1910_v58 = vld [vmem:[#allocation2 + $0xd0] sm:$0xff] }
 0x156   : > { %v2494_v61 = vld [vmem:[#allocation2 + $0x60] sm:$0xff]  ;;  %v6154_v9 = vpop.f32.mrf.mxu1  ;;  %v2713_v41 = vpop.f32.mrf.mxu0 }
 0x157   : > { %2822 = vst.msk [vmem:[#allocation2 + $0x70] sm:$0xff] %vm256_vm7, %v2790_v14  ;;  %v2788_v21 = vadd.f32 %v2697_v7, %v2494_v61  ;;  %2258 = vst.msk [vmem:[#allocation2 + $0x80] sm:$0xff] %vm256_vm7, %v2226_v27  ;;  %v2229_v8 = vadd.f32 %v6154_v9, %v1903_v51  ;;  %v1908_v7 = vld [vmem:[#allocation2 + $0xc0] sm:$0xff] }
 0x158   : > { %v2497_v0 = vld [vmem:[#allocation2 + $0x78] sm:$0xff]  ;;  %v2150_v55 = vpop.f32.mrf.mxu1  ;;  %v6188_v30 = vpop.f32.mrf.mxu0 }
 0x159   : > { %2820 = vst.msk [vmem:[#allocation2 + $0x60] sm:$0xff] %vm256_vm7, %v2788_v21  ;;  %v2791_v50 = vadd.f32 %v6184_v38, %v2497_v0  ;;  %2261 = vst.msk [vmem:[#allocation2 + $0x98] sm:$0xff] %vm256_vm7, %v2229_v8  ;;  %v2227_v11 = vadd.f32 %v2150_v55, %v1901_v19  ;;  %v1911_v38 = vld [vmem:[#allocation2 + $0xd8] sm:$0xff] }
 0x15a   : > { %v2495_v35 = vld [vmem:[#allocation2 + $0x68] sm:$0xff]  ;;  %v6157_v23 = vpop.f32.mrf.mxu1  ;;  %v2716_v17 = vpop.f32.mrf.mxu0 }
 0x15b   : > { %2823 = vst.msk [vmem:[#allocation2 + $0x78] sm:$0xff] %vm256_vm7, %v2791_v50  ;;  %v2789_v31 = vadd.f32 %v2700_v52, %v2495_v35  ;;  %2259 = vst.msk [vmem:[#allocation2 + $0x88] sm:$0xff] %vm256_vm7, %v2227_v11  ;;  %v2232_v53 = vadd.f32 %v6157_v23, %v1906_v59  ;;  %v1909_v52 = vld [vmem:[#allocation2 + $0xc8] sm:$0xff] }
 0x15c   : > { %v2500_v6 = vld [vmem:[#allocation2 + $0x90] sm:$0xff]  ;;  %v2163_v46 = vpop.f32.mrf.mxu1  ;;  %v6191_v3 = vpop.f32.mrf.mxu0 }
 0x15d   : > { %2821 = vst.msk [vmem:[#allocation2 + $0x68] sm:$0xff] %vm256_vm7, %v2789_v31  ;;  %v2794_v56 = vadd.f32 %v6187_v29, %v2500_v6  ;;  %2264 = vst.msk [vmem:[#allocation2 + $0xb0] sm:$0xff] %vm256_vm7, %v2232_v53  ;;  %v2230_v4 = vadd.f32 %v2163_v46, %v1904_v57  ;;  %v1914_v29 = vld [vmem:[#allocation2 + $0xf0] sm:$0xff] }
 0x15e   : > { %v2498_v12 = vld [vmem:[#allocation2 + $0x80] sm:$0xff]  ;;  %v6158_v47 = vpop.f32.mrf.mxu1  ;;  %v2729_v48 = vpop.f32.mrf.mxu0 }
 0x15f   : > { %2826 = vst.msk [vmem:[#allocation2 + $0x90] sm:$0xff] %vm256_vm7, %v2794_v56  ;;  %v2792_v45 = vadd.f32 %v2713_v41, %v2498_v12  ;;  %2262 = vst.msk [vmem:[#allocation2 + $0xa0] sm:$0xff] %vm256_vm7, %v2230_v4  ;;  %v2233_v5 = vadd.f32 %v6158_v47, %v1907_v20  ;;  %v1912_v41 = vld [vmem:[#allocation2 + $0xe0] sm:$0xff] }
 0x160   : > { %v2501_v60 = vld [vmem:[#allocation2 + $0x98] sm:$0xff]  ;;  %v2166_v25 = vpop.f32.mrf.mxu1  ;;  %v6192_v34 = vpop.f32.mrf.mxu0 }
 0x161   : > { %2824 = vst.msk [vmem:[#allocation2 + $0x80] sm:$0xff] %vm256_vm7, %v2792_v45  ;;  %v2795_v40 = vadd.f32 %v6188_v30, %v2501_v60  ;;  %2265 = vst.msk [vmem:[#allocation2 + $0xb8] sm:$0xff] %vm256_vm7, %v2233_v5  ;;  %v2231_v2 = vadd.f32 %v2166_v25, %v1905_v44  ;;  %v1915_v30 = vld [vmem:[#allocation2 + $0xf8] sm:$0xff] }
 0x162   : > { %v2499_v26 = vld [vmem:[#allocation2 + $0x88] sm:$0xff]  ;;  %v6161_v42 = vpop.f32.mrf.mxu1  ;;  %v2732_v37 = vpop.f32.mrf.mxu0 }
 0x163   : > { %2827 = vst.msk [vmem:[#allocation2 + $0x98] sm:$0xff] %vm256_vm7, %v2795_v40  ;;  %v2793_v18 = vadd.f32 %v2716_v17, %v2499_v26  ;;  %2263 = vst.msk [vmem:[#allocation2 + $0xa8] sm:$0xff] %vm256_vm7, %v2231_v2  ;;  %v2236_v54 = vadd.f32 %v6161_v42, %v1910_v58  ;;  %v1913_v17 = vld [vmem:[#allocation2 + $0xe8] sm:$0xff] }
 0x164   : > { %v2504_v15 = vld [vmem:[#allocation2 + $0xb0] sm:$0xff]  ;;  %v2179_v1 = vpop.f32.mrf.mxu1  ;;  %v6195_v24 = vpop.f32.mrf.mxu0 }
 0x165   : > { %2825 = vst.msk [vmem:[#allocation2 + $0x88] sm:$0xff] %vm256_vm7, %v2793_v18  ;;  %v2798_v39 = vadd.f32 %v6191_v3, %v2504_v15  ;;  %2268 = vst.msk [vmem:[#allocation2 + $0xd0] sm:$0xff] %vm256_vm7, %v2236_v54  ;;  %v2234_v22 = vadd.f32 %v2179_v1, %v1908_v7  ;;  %v3050_v3 = vld [vmem:[#allocation2 + $0x10] sm:$0xff] }
 0x166   : > { %v2502_v32 = vld [vmem:[#allocation2 + $0xa0] sm:$0xff]  ;;  %v6162_v62 = vpop.f32.mrf.mxu1  ;;  %v2745_v16 = vpop.f32.mrf.mxu0 }
 0x167   : > { %2830 = vst.msk [vmem:[#allocation2 + $0xb0] sm:$0xff] %vm256_vm7, %v2798_v39  ;;  %v2796_v43 = vadd.f32 %v2729_v48, %v2502_v32  ;;  %2266 = vst.msk [vmem:[#allocation2 + $0xc0] sm:$0xff] %vm256_vm7, %v2234_v22  ;;  %v2237_v13 = vadd.f32 %v6162_v62, %v1911_v38  ;;  %v3048_v48 = vld [vmem:[#allocation2] sm:$0xff] }
 0x168   : > { %v2505_v49 = vld [vmem:[#allocation2 + $0xb8] sm:$0xff]  ;;  %v2182_v28 = vpop.f32.mrf.mxu1  ;;  %v6196_v10 = vpop.f32.mrf.mxu0 }
 0x169   : > { %2828 = vst.msk [vmem:[#allocation2 + $0xa0] sm:$0xff] %vm256_vm7, %v2796_v43  ;;  %v2799_v36 = vadd.f32 %v6192_v34, %v2505_v49  ;;  %2269 = vst.msk [vmem:[#allocation2 + $0xd8] sm:$0xff] %vm256_vm7, %v2237_v13  ;;  %v2235_v63 = vadd.f32 %v2182_v28, %v1909_v52  ;;  %v3051_v34 = vld [vmem:[#allocation2 + $0x18] sm:$0xff] }
 0x16a   : > { %v2503_v33 = vld [vmem:[#allocation2 + $0xa8] sm:$0xff]  ;;  %v6165_v14 = vpop.f32.mrf.mxu1  ;;  %v2748_v27 = vpop.f32.mrf.mxu0 }
 0x16b   : > { %2831 = vst.msk [vmem:[#allocation2 + $0xb8] sm:$0xff] %vm256_vm7, %v2799_v36  ;;  %v2797_v61 = vadd.f32 %v2732_v37, %v2503_v33  ;;  %2267 = vst.msk [vmem:[#allocation2 + $0xc8] sm:$0xff] %vm256_vm7, %v2235_v63  ;;  %v2240_v51 = vadd.f32 %v6165_v14, %v1914_v29  ;;  %v3049_v37 = vld [vmem:[#allocation2 + $0x8] sm:$0xff] }
 0x16c   : > { %v2508_v9 = vld [vmem:[#allocation2 + $0xd0] sm:$0xff]  ;;  %v2195_v21 = vpop.f32.mrf.mxu1  ;;  %v6199_v8 = vpop.f32.mrf.mxu0 }
 0x16d   : > { %2829 = vst.msk [vmem:[#allocation2 + $0xa8] sm:$0xff] %vm256_vm7, %v2797_v61  ;;  %v2802_v0 = vadd.f32 %v6195_v24, %v2508_v9  ;;  %2272 = vst.msk [vmem:[#allocation2 + $0xf0] sm:$0xff] %vm256_vm7, %v2240_v51  ;;  %v2238_v19 = vadd.f32 %v2195_v21, %v1912_v41  ;;  %v3054_v24 = vld [vmem:[#allocation2 + $0x30] sm:$0xff] }
 0x16e   : > { %v2506_v55 = vld [vmem:[#allocation2 + $0xc0] sm:$0xff]  ;;  %v6166_v50 = vpop.f32.mrf.mxu1  ;;  %v2761_v11 = vpop.f32.mrf.mxu0 }
 0x16f   : > { %2834 = vst.msk [vmem:[#allocation2 + $0xd0] sm:$0xff] %vm256_vm7, %v2802_v0  ;;  %v2800_v35 = vadd.f32 %v2745_v16, %v2506_v55  ;;  %2270 = vst.msk [vmem:[#allocation2 + $0xe0] sm:$0xff] %vm256_vm7, %v2238_v19  ;;  %v2241_v59 = vadd.f32 %v6166_v50, %v1915_v30  ;;  %v3052_v16 = vld [vmem:[#allocation2 + $0x20] sm:$0xff] }
 0x170   : > { %v2509_v23 = vld [vmem:[#allocation2 + $0xd8] sm:$0xff]  ;;  %v2198_v31 = vpop.f32.mrf.mxu1  ;;  %v6200_v53 = vpop.f32.mrf.mxu0 }
 0x171   : > { %2832 = vst.msk [vmem:[#allocation2 + $0xc0] sm:$0xff] %vm256_vm7, %v2800_v35  ;;  %v2803_v6 = vadd.f32 %v6196_v10, %v2509_v23  ;;  %2273 = vst.msk [vmem:[#allocation2 + $0xf8] sm:$0xff] %vm256_vm7, %v2241_v59  ;;  %v2239_v57 = vadd.f32 %v2198_v31, %v1913_v17  ;;  %v3055_v10 = vld [vmem:[#allocation2 + $0x38] sm:$0xff] }
 0x172   : > { %v2507_v46 = vld [vmem:[#allocation2 + $0xc8] sm:$0xff]  ;;  %v6205_v56 = vpop.f32.mrf.mxu1  ;;  %v2764_v4 = vpop.f32.mrf.mxu0 }
 0x173   : > { %2835 = vst.msk [vmem:[#allocation2 + $0xd8] sm:$0xff] %vm256_vm7, %v2803_v6  ;;  %v2801_v12 = vadd.f32 %v2748_v27, %v2507_v46  ;;  %2271 = vst.msk [vmem:[#allocation2 + $0xe8] sm:$0xff] %vm256_vm7, %v2239_v57  ;;  %v3344_v20 = vadd.f32 %v6205_v56, %v3050_v3  ;;  %v3053_v27 = vld [vmem:[#allocation2 + $0x28] sm:$0xff] }
 0x174   : > { %v2512_v47 = vld [vmem:[#allocation2 + $0xf0] sm:$0xff]  ;;  %v3215_v45 = vpop.f32.mrf.mxu1  ;;  %v6239_v5 = vpop.f32.mrf.mxu0 }
 0x175   : > { %2833 = vst.msk [vmem:[#allocation2 + $0xc8] sm:$0xff] %vm256_vm7, %v2801_v12  ;;  %v2806_v60 = vadd.f32 %v6199_v8, %v2512_v47  ;;  %3376 = vst.msk [vmem:[#allocation2 + $0x10] sm:$0xff] %vm256_vm7, %v3344_v20  ;;  %v3342_v44 = vadd.f32 %v3215_v45, %v3048_v48  ;;  %v3058_v8 = vld [vmem:[#allocation2 + $0x50] sm:$0xff] }
 0x176   : > { %v2510_v25 = vld [vmem:[#allocation2 + $0xe0] sm:$0xff]  ;;  %v6206_v40 = vpop.f32.mrf.mxu1  ;;  %v3638_v2 = vpop.f32.mrf.mxu0 }
 0x177   : > { %2838 = vst.msk [vmem:[#allocation2 + $0xf0] sm:$0xff] %vm256_vm7, %v2806_v60  ;;  %v2804_v26 = vadd.f32 %v2761_v11, %v2510_v25  ;;  %3374 = vst.msk [vmem:[#allocation2] sm:$0xff] %vm256_vm7, %v3342_v44  ;;  %v3345_v58 = vadd.f32 %v6206_v40, %v3051_v34  ;;  %v3056_v11 = vld [vmem:[#allocation2 + $0x40] sm:$0xff] }
 0x178   : > { %v2513_v42 = vld [vmem:[#allocation2 + $0xf8] sm:$0xff]  ;;  %v3218_v18 = vpop.f32.mrf.mxu1  ;;  %v6240_v54 = vpop.f32.mrf.mxu0 }
 0x179   : > { %2836 = vst.msk [vmem:[#allocation2 + $0xe0] sm:$0xff] %vm256_vm7, %v2804_v26  ;;  %v2807_v15 = vadd.f32 %v6200_v53, %v2513_v42  ;;  %3377 = vst.msk [vmem:[#allocation2 + $0x18] sm:$0xff] %vm256_vm7, %v3345_v58  ;;  %v3343_v7 = vadd.f32 %v3218_v18, %v3049_v37  ;;  %v3059_v53 = vld [vmem:[#allocation2 + $0x58] sm:$0xff] }
 0x17a   : > { %v2511_v1 = vld [vmem:[#allocation2 + $0xe8] sm:$0xff]  ;;  %v6209_v39 = vpop.f32.mrf.mxu1  ;;  %v3641_v22 = vpop.f32.mrf.mxu0 }
 0x17b   : > { %2839 = vst.msk [vmem:[#allocation2 + $0xf8] sm:$0xff] %vm256_vm7, %v2807_v15  ;;  %v2805_v32 = vadd.f32 %v2764_v4, %v2511_v1  ;;  %3375 = vst.msk [vmem:[#allocation2 + $0x8] sm:$0xff] %vm256_vm7, %v3343_v7  ;;  %v3348_v38 = vadd.f32 %v6209_v39, %v3054_v24  ;;  %v3057_v4 = vld [vmem:[#allocation2 + $0x48] sm:$0xff] }
 0x17c   : > { %v3441_v62 = vld [vmem:[#allocation2 + $0x10] sm:$0xff]  ;;  %v3231_v43 = vpop.f32.mrf.mxu1  ;;  %v6243_v13 = vpop.f32.mrf.mxu0 }
 0x17d   : > { %2837 = vst.msk [vmem:[#allocation2 + $0xe8] sm:$0xff] %vm256_vm7, %v2805_v32  ;;  %v3767_v49 = vadd.f32 %v6239_v5, %v3441_v62  ;;  %3380 = vst.msk [vmem:[#allocation2 + $0x30] sm:$0xff] %vm256_vm7, %v3348_v38  ;;  %v3346_v52 = vadd.f32 %v3231_v43, %v3052_v16  ;;  %v3062_v5 = vld [vmem:[#allocation2 + $0x70] sm:$0xff] }
 0x17e   : > { %v3439_v28 = vld [vmem:[#allocation2] sm:$0xff]  ;;  %v6210_v36 = vpop.f32.mrf.mxu1  ;;  %v3654_v63 = vpop.f32.mrf.mxu0 }
 0x17f   : > { %3799 = vst.msk [vmem:[#allocation2 + $0x10] sm:$0xff] %vm256_vm7, %v3767_v49  ;;  %v3765_v33 = vadd.f32 %v3638_v2, %v3439_v28  ;;  %3378 = vst.msk [vmem:[#allocation2 + $0x20] sm:$0xff] %vm256_vm7, %v3346_v52  ;;  %v3349_v29 = vadd.f32 %v6210_v36, %v3055_v10  ;;  %v3060_v2 = vld [vmem:[#allocation2 + $0x60] sm:$0xff] }
 0x180   : > { %v3442_v14 = vld [vmem:[#allocation2 + $0x18] sm:$0xff]  ;;  %v3234_v61 = vpop.f32.mrf.mxu1  ;;  %v6244_v51 = vpop.f32.mrf.mxu0 }
 0x181   : > { %3797 = vst.msk [vmem:[#allocation2] sm:$0xff] %vm256_vm7, %v3765_v33  ;;  %v3768_v9 = vadd.f32 %v6240_v54, %v3442_v14  ;;  %3381 = vst.msk [vmem:[#allocation2 + $0x38] sm:$0xff] %vm256_vm7, %v3349_v29  ;;  %v3347_v41 = vadd.f32 %v3234_v61, %v3053_v27  ;;  %v3063_v54 = vld [vmem:[#allocation2 + $0x78] sm:$0xff] }
 0x182   : > { %v3440_v21 = vld [vmem:[#allocation2 + $0x8] sm:$0xff]  ;;  %v6213_v0 = vpop.f32.mrf.mxu1  ;;  %v3657_v19 = vpop.f32.mrf.mxu0 }
 0x183   : > { %3800 = vst.msk [vmem:[#allocation2 + $0x18] sm:$0xff] %vm256_vm7, %v3768_v9  ;;  %v3766_v55 = vadd.f32 %v3641_v22, %v3440_v21  ;;  %3379 = vst.msk [vmem:[#allocation2 + $0x28] sm:$0xff] %vm256_vm7, %v3347_v41  ;;  %v3352_v30 = vadd.f32 %v6213_v0, %v3058_v8  ;;  %v3061_v22 = vld [vmem:[#allocation2 + $0x68] sm:$0xff] }
 0x184   : > { %v3445_v50 = vld [vmem:[#allocation2 + $0x30] sm:$0xff]  ;;  %v3247_v35 = vpop.f32.mrf.mxu1  ;;  %v6247_v59 = vpop.f32.mrf.mxu0 }
 0x185   : > { %3798 = vst.msk [vmem:[#allocation2 + $0x8] sm:$0xff] %vm256_vm7, %v3766_v55  ;;  %v3771_v23 = vadd.f32 %v6243_v13, %v3445_v50  ;;  %3384 = vst.msk [vmem:[#allocation2 + $0x50] sm:$0xff] %vm256_vm7, %v3352_v30  ;;  %v3350_v17 = vadd.f32 %v3247_v35, %v3056_v11  ;;  %v3066_v13 = vld [vmem:[#allocation2 + $0x90] sm:$0xff] }
 0x186   : > { %v3443_v31 = vld [vmem:[#allocation2 + $0x20] sm:$0xff]  ;;  %v6214_v6 = vpop.f32.mrf.mxu1  ;;  %v3670_v57 = vpop.f32.mrf.mxu0 }
 0x187   : > { %3803 = vst.msk [vmem:[#allocation2 + $0x30] sm:$0xff] %vm256_vm7, %v3771_v23  ;;  %v3769_v46 = vadd.f32 %v3654_v63, %v3443_v31  ;;  %3382 = vst.msk [vmem:[#allocation2 + $0x40] sm:$0xff] %vm256_vm7, %v3350_v17  ;;  %v3353_v3 = vadd.f32 %v6214_v6, %v3059_v53  ;;  %v3064_v63 = vld [vmem:[#allocation2 + $0x80] sm:$0xff] }
 0x188   : > { %v3446_v56 = vld [vmem:[#allocation2 + $0x38] sm:$0xff]  ;;  %v3250_v12 = vpop.f32.mrf.mxu1  ;;  %v6248_v20 = vpop.f32.mrf.mxu0 }
 0x189   : > { %3801 = vst.msk [vmem:[#allocation2 + $0x20] sm:$0xff] %vm256_vm7, %v3769_v46  ;;  %v3772_v47 = vadd.f32 %v6244_v51, %v3446_v56  ;;  %3385 = vst.msk [vmem:[#allocation2 + $0x58] sm:$0xff] %vm256_vm7, %v3353_v3  ;;  %v3351_v48 = vadd.f32 %v3250_v12, %v3057_v4  ;;  %v3067_v51 = vld [vmem:[#allocation2 + $0x98] sm:$0xff] }
 0x18a   : > { %v3444_v45 = vld [vmem:[#allocation2 + $0x28] sm:$0xff]  ;;  %v6217_v60 = vpop.f32.mrf.mxu1  ;;  %v3673_v44 = vpop.f32.mrf.mxu0 }
 0x18b   : > { %3804 = vst.msk [vmem:[#allocation2 + $0x38] sm:$0xff] %vm256_vm7, %v3772_v47  ;;  %v3770_v25 = vadd.f32 %v3657_v19, %v3444_v45  ;;  %3383 = vst.msk [vmem:[#allocation2 + $0x48] sm:$0xff] %vm256_vm7, %v3351_v48  ;;  %v3356_v34 = vadd.f32 %v6217_v60, %v3062_v5  ;;  %v3065_v19 = vld [vmem:[#allocation2 + $0x88] sm:$0xff] }
 0x18c   : > { %v3449_v40 = vld [vmem:[#allocation2 + $0x50] sm:$0xff]  ;;  %v3263_v26 = vpop.f32.mrf.mxu1  ;;  %v6251_v58 = vpop.f32.mrf.mxu0 }
 0x18d   : > { %3802 = vst.msk [vmem:[#allocation2 + $0x28] sm:$0xff] %vm256_vm7, %v3770_v25  ;;  %v3775_v42 = vadd.f32 %v6247_v59, %v3449_v40  ;;  %3388 = vst.msk [vmem:[#allocation2 + $0x70] sm:$0xff] %vm256_vm7, %v3356_v34  ;;  %v3354_v37 = vadd.f32 %v3263_v26, %v3060_v2  ;;  %v3070_v59 = vld [vmem:[#allocation2 + $0xb0] sm:$0xff] }
 0x18e   : > { %v3447_v18 = vld [vmem:[#allocation2 + $0x40] sm:$0xff]  ;;  %v6218_v15 = vpop.f32.mrf.mxu1  ;;  %v3686_v7 = vpop.f32.mrf.mxu0 }
 0x18f   : > { %3807 = vst.msk [vmem:[#allocation2 + $0x50] sm:$0xff] %vm256_vm7, %v3775_v42  ;;  %v3773_v1 = vadd.f32 %v3670_v57, %v3447_v18  ;;  %3386 = vst.msk [vmem:[#allocation2 + $0x60] sm:$0xff] %vm256_vm7, %v3354_v37  ;;  %v3357_v24 = vadd.f32 %v6218_v15, %v3063_v54  ;;  %v3068_v57 = vld [vmem:[#allocation2 + $0xa0] sm:$0xff] }
 0x190   : > { %v3450_v39 = vld [vmem:[#allocation2 + $0x58] sm:$0xff]  ;;  %v3266_v32 = vpop.f32.mrf.mxu1  ;;  %v6252_v38 = vpop.f32.mrf.mxu0 }
 0x191   : > { %3805 = vst.msk [vmem:[#allocation2 + $0x40] sm:$0xff] %vm256_vm7, %v3773_v1  ;;  %v3776_v62 = vadd.f32 %v6248_v20, %v3450_v39  ;;  %3389 = vst.msk [vmem:[#allocation2 + $0x78] sm:$0xff] %vm256_vm7, %v3357_v24  ;;  %v3355_v16 = vadd.f32 %v3266_v32, %v3061_v22  ;;  %v3071_v20 = vld [vmem:[#allocation2 + $0xb8] sm:$0xff] }
 0x192   : > { %v3448_v43 = vld [vmem:[#allocation2 + $0x48] sm:$0xff]  ;;  %v6221_v49 = vpop.f32.mrf.mxu1  ;;  %v3689_v52 = vpop.f32.mrf.mxu0 }
 0x193   : > { %3808 = vst.msk [vmem:[#allocation2 + $0x58] sm:$0xff] %vm256_vm7, %v3776_v62  ;;  %v3774_v28 = vadd.f32 %v3673_v44, %v3448_v43  ;;  %3387 = vst.msk [vmem:[#allocation2 + $0x68] sm:$0xff] %vm256_vm7, %v3355_v16  ;;  %v3360_v10 = vadd.f32 %v6221_v49, %v3066_v13  ;;  %v3069_v44 = vld [vmem:[#allocation2 + $0xa8] sm:$0xff] }
 0x194   : > { %v3453_v36 = vld [vmem:[#allocation2 + $0x70] sm:$0xff]  ;;  %v3279_v33 = vpop.f32.mrf.mxu1  ;;  %v6255_v29 = vpop.f32.mrf.mxu0 }
 0x195   : > { %3806 = vst.msk [vmem:[#allocation2 + $0x48] sm:$0xff] %vm256_vm7, %v3774_v28  ;;  %v3779_v14 = vadd.f32 %v6251_v58, %v3453_v36  ;;  %3392 = vst.msk [vmem:[#allocation2 + $0x90] sm:$0xff] %vm256_vm7, %v3360_v10  ;;  %v3358_v27 = vadd.f32 %v3279_v33, %v3064_v63  ;;  %v3074_v58 = vld [vmem:[#allocation2 + $0xd0] sm:$0xff] }
 0x196   : > { %v3451_v61 = vld [vmem:[#allocation2 + $0x60] sm:$0xff]  ;;  %v6222_v9 = vpop.f32.mrf.mxu1  ;;  %v3702_v41 = vpop.f32.mrf.mxu0 }
 0x197   : > { %3811 = vst.msk [vmem:[#allocation2 + $0x70] sm:$0xff] %vm256_vm7, %v3779_v14  ;;  %v3777_v21 = vadd.f32 %v3686_v7, %v3451_v61  ;;  %3390 = vst.msk [vmem:[#allocation2 + $0x80] sm:$0xff] %vm256_vm7, %v3358_v27  ;;  %v3361_v8 = vadd.f32 %v6222_v9, %v3067_v51  ;;  %v3072_v7 = vld [vmem:[#allocation2 + $0xc0] sm:$0xff] }
 0x198   : > { %v3454_v0 = vld [vmem:[#allocation2 + $0x78] sm:$0xff]  ;;  %v3282_v55 = vpop.f32.mrf.mxu1  ;;  %v6256_v30 = vpop.f32.mrf.mxu0 }
 0x199   : > { %3809 = vst.msk [vmem:[#allocation2 + $0x60] sm:$0xff] %vm256_vm7, %v3777_v21  ;;  %v3780_v50 = vadd.f32 %v6252_v38, %v3454_v0  ;;  %3393 = vst.msk [vmem:[#allocation2 + $0x98] sm:$0xff] %vm256_vm7, %v3361_v8  ;;  %v3359_v11 = vadd.f32 %v3282_v55, %v3065_v19  ;;  %v3075_v38 = vld [vmem:[#allocation2 + $0xd8] sm:$0xff] }
 0x19a   : > { %v3452_v35 = vld [vmem:[#allocation2 + $0x68] sm:$0xff]  ;;  %v6225_v23 = vpop.f32.mrf.mxu1  ;;  %v3705_v17 = vpop.f32.mrf.mxu0 }
 0x19b   : > { %3812 = vst.msk [vmem:[#allocation2 + $0x78] sm:$0xff] %vm256_vm7, %v3780_v50  ;;  %v3778_v31 = vadd.f32 %v3689_v52, %v3452_v35  ;;  %3391 = vst.msk [vmem:[#allocation2 + $0x88] sm:$0xff] %vm256_vm7, %v3359_v11  ;;  %v3364_v53 = vadd.f32 %v6225_v23, %v3070_v59  ;;  %v3073_v52 = vld [vmem:[#allocation2 + $0xc8] sm:$0xff] }
 0x19c   : > { %v3457_v6 = vld [vmem:[#allocation2 + $0x90] sm:$0xff]  ;;  %v3295_v46 = vpop.f32.mrf.mxu1  ;;  %v6259_v3 = vpop.f32.mrf.mxu0 }
 0x19d   : > { %3810 = vst.msk [vmem:[#allocation2 + $0x68] sm:$0xff] %vm256_vm7, %v3778_v31  ;;  %v3783_v56 = vadd.f32 %v6255_v29, %v3457_v6  ;;  %3396 = vst.msk [vmem:[#allocation2 + $0xb0] sm:$0xff] %vm256_vm7, %v3364_v53  ;;  %v3362_v4 = vadd.f32 %v3295_v46, %v3068_v57  ;;  %v3078_v29 = vld [vmem:[#allocation2 + $0xf0] sm:$0xff] }
 0x19e   : > { %v3455_v12 = vld [vmem:[#allocation2 + $0x80] sm:$0xff]  ;;  %v6226_v47 = vpop.f32.mrf.mxu1  ;;  %v3718_v48 = vpop.f32.mrf.mxu0 }
 0x19f   : > { %3815 = vst.msk [vmem:[#allocation2 + $0x90] sm:$0xff] %vm256_vm7, %v3783_v56  ;;  %v3781_v45 = vadd.f32 %v3702_v41, %v3455_v12  ;;  %3394 = vst.msk [vmem:[#allocation2 + $0xa0] sm:$0xff] %vm256_vm7, %v3362_v4  ;;  %v3365_v5 = vadd.f32 %v6226_v47, %v3071_v20  ;;  %v3076_v41 = vld [vmem:[#allocation2 + $0xe0] sm:$0xff] }
 0x1a0   : > { %v3458_v60 = vld [vmem:[#allocation2 + $0x98] sm:$0xff]  ;;  %v3298_v25 = vpop.f32.mrf.mxu1  ;;  %v6260_v34 = vpop.f32.mrf.mxu0 }
 0x1a1   : > { %3813 = vst.msk [vmem:[#allocation2 + $0x80] sm:$0xff] %vm256_vm7, %v3781_v45  ;;  %v3784_v40 = vadd.f32 %v6256_v30, %v3458_v60  ;;  %3397 = vst.msk [vmem:[#allocation2 + $0xb8] sm:$0xff] %vm256_vm7, %v3365_v5  ;;  %v3363_v2 = vadd.f32 %v3298_v25, %v3069_v44  ;;  %v3079_v30 = vld [vmem:[#allocation2 + $0xf8] sm:$0xff] }
 0x1a2   : > { %v3456_v26 = vld [vmem:[#allocation2 + $0x88] sm:$0xff]  ;;  %v6229_v42 = vpop.f32.mrf.mxu1  ;;  %v3721_v37 = vpop.f32.mrf.mxu0 }
 0x1a3   : > { %3816 = vst.msk [vmem:[#allocation2 + $0x98] sm:$0xff] %vm256_vm7, %v3784_v40  ;;  %v3782_v18 = vadd.f32 %v3705_v17, %v3456_v26  ;;  %3395 = vst.msk [vmem:[#allocation2 + $0xa8] sm:$0xff] %vm256_vm7, %v3363_v2  ;;  %v3368_v54 = vadd.f32 %v6229_v42, %v3074_v58  ;;  %v3077_v17 = vld [vmem:[#allocation2 + $0xe8] sm:$0xff] }
 0x1a4   : > { %v3461_v15 = vld [vmem:[#allocation2 + $0xb0] sm:$0xff]  ;;  %v3311_v1 = vpop.f32.mrf.mxu1  ;;  %v6263_v24 = vpop.f32.mrf.mxu0 }
 0x1a5   : > { %3814 = vst.msk [vmem:[#allocation2 + $0x88] sm:$0xff] %vm256_vm7, %v3782_v18  ;;  %v3787_v39 = vadd.f32 %v6259_v3, %v3461_v15  ;;  %3400 = vst.msk [vmem:[#allocation2 + $0xd0] sm:$0xff] %vm256_vm7, %v3368_v54  ;;  %v3366_v22 = vadd.f32 %v3311_v1, %v3072_v7  ;;  %v4039_v3 = vld [vmem:[#allocation2 + $0x10] sm:$0xff] }
 0x1a6   : > { %v3459_v32 = vld [vmem:[#allocation2 + $0xa0] sm:$0xff]  ;;  %v6230_v62 = vpop.f32.mrf.mxu1  ;;  %v3734_v16 = vpop.f32.mrf.mxu0 }
 0x1a7   : > { %3819 = vst.msk [vmem:[#allocation2 + $0xb0] sm:$0xff] %vm256_vm7, %v3787_v39  ;;  %v3785_v43 = vadd.f32 %v3718_v48, %v3459_v32  ;;  %3398 = vst.msk [vmem:[#allocation2 + $0xc0] sm:$0xff] %vm256_vm7, %v3366_v22  ;;  %v3369_v13 = vadd.f32 %v6230_v62, %v3075_v38  ;;  %v4037_v48 = vld [vmem:[#allocation2] sm:$0xff] }
 0x1a8   : > { %v3462_v49 = vld [vmem:[#allocation2 + $0xb8] sm:$0xff]  ;;  %v3314_v28 = vpop.f32.mrf.mxu1  ;;  %v6264_v10 = vpop.f32.mrf.mxu0 }
 0x1a9   : > { %3817 = vst.msk [vmem:[#allocation2 + $0xa0] sm:$0xff] %vm256_vm7, %v3785_v43  ;;  %v3788_v36 = vadd.f32 %v6260_v34, %v3462_v49  ;;  %3401 = vst.msk [vmem:[#allocation2 + $0xd8] sm:$0xff] %vm256_vm7, %v3369_v13  ;;  %v3367_v63 = vadd.f32 %v3314_v28, %v3073_v52  ;;  %v4040_v34 = vld [vmem:[#allocation2 + $0x18] sm:$0xff] }
 0x1aa   : > { %v3460_v33 = vld [vmem:[#allocation2 + $0xa8] sm:$0xff]  ;;  %v6233_v14 = vpop.f32.mrf.mxu1  ;;  %v3737_v27 = vpop.f32.mrf.mxu0 }
 0x1ab   : > { %3820 = vst.msk [vmem:[#allocation2 + $0xb8] sm:$0xff] %vm256_vm7, %v3788_v36  ;;  %v3786_v61 = vadd.f32 %v3721_v37, %v3460_v33  ;;  %3399 = vst.msk [vmem:[#allocation2 + $0xc8] sm:$0xff] %vm256_vm7, %v3367_v63  ;;  %v3372_v51 = vadd.f32 %v6233_v14, %v3078_v29  ;;  %v4038_v37 = vld [vmem:[#allocation2 + $0x8] sm:$0xff] }
 0x1ac   : > { %v3465_v9 = vld [vmem:[#allocation2 + $0xd0] sm:$0xff]  ;;  %v3327_v21 = vpop.f32.mrf.mxu1  ;;  %v6267_v8 = vpop.f32.mrf.mxu0 }
 0x1ad   : > { %3818 = vst.msk [vmem:[#allocation2 + $0xa8] sm:$0xff] %vm256_vm7, %v3786_v61  ;;  %v3791_v0 = vadd.f32 %v6263_v24, %v3465_v9  ;;  %3404 = vst.msk [vmem:[#allocation2 + $0xf0] sm:$0xff] %vm256_vm7, %v3372_v51  ;;  %v3370_v19 = vadd.f32 %v3327_v21, %v3076_v41  ;;  %v4043_v24 = vld [vmem:[#allocation2 + $0x30] sm:$0xff] }
 0x1ae   : > { %v3463_v55 = vld [vmem:[#allocation2 + $0xc0] sm:$0xff]  ;;  %v6234_v50 = vpop.f32.mrf.mxu1  ;;  %v3750_v11 = vpop.f32.mrf.mxu0 }
 0x1af   : > { %3823 = vst.msk [vmem:[#allocation2 + $0xd0] sm:$0xff] %vm256_vm7, %v3791_v0  ;;  %v3789_v35 = vadd.f32 %v3734_v16, %v3463_v55  ;;  %3402 = vst.msk [vmem:[#allocation2 + $0xe0] sm:$0xff] %vm256_vm7, %v3370_v19  ;;  %v3373_v59 = vadd.f32 %v6234_v50, %v3079_v30  ;;  %v4041_v16 = vld [vmem:[#allocation2 + $0x20] sm:$0xff] }
 0x1b0   : > { %v3466_v23 = vld [vmem:[#allocation2 + $0xd8] sm:$0xff]  ;;  %v3330_v31 = vpop.f32.mrf.mxu1  ;;  %v6268_v53 = vpop.f32.mrf.mxu0  ;;  %v8380_v50 = vld [vmem:[%s8548_s2] ss:$0 sm:$0xff] }
 0x1b1   : > { %3821 = vst.msk [vmem:[#allocation2 + $0xc0] sm:$0xff] %vm256_vm7, %v3789_v35  ;;  %v3792_v6 = vadd.f32 %v6264_v10, %v3466_v23  ;;  %3405 = vst.msk [vmem:[#allocation2 + $0xf8] sm:$0xff] %vm256_vm7, %v3373_v59  ;;  %v3371_v57 = vadd.f32 %v3330_v31, %v3077_v17  ;;  %v4044_v10 = vld [vmem:[#allocation2 + $0x38] sm:$0xff]  ;;  %v4045_v35 = vld [vmem:[#allocation2 + $0x40] sm:$0xff] }
 0x1b2   : > { %v3464_v46 = vld [vmem:[#allocation2 + $0xc8] sm:$0xff]  ;;  %v6273_v56 = vpop.f32.mrf.mxu1  ;;  %v3753_v4 = vpop.f32.mrf.mxu0 }
 0x1b3   : > { %3824 = vst.msk [vmem:[#allocation2 + $0xd8] sm:$0xff] %vm256_vm7, %v3792_v6  ;;  %v3790_v12 = vadd.f32 %v3737_v27, %v3464_v46  ;;  %3403 = vst.msk [vmem:[#allocation2 + $0xe8] sm:$0xff] %vm256_vm7, %v3371_v57  ;;  %v4333_v20 = vadd.f32 %v6273_v56, %v4039_v3  ;;  %v4042_v27 = vld [vmem:[#allocation2 + $0x28] sm:$0xff]  ;;  %v4048_v57 = vld [vmem:[#allocation2 + $0x58] sm:$0xff] }
 0x1b4   : > { %v3469_v47 = vld [vmem:[#allocation2 + $0xf0] sm:$0xff]  ;;  %v4204_v45 = vpop.f32.mrf.mxu1  ;;  %v6307_v5 = vpop.f32.mrf.mxu0 }
 0x1b5   : > { %3822 = vst.msk [vmem:[#allocation2 + $0xc8] sm:$0xff] %vm256_vm7, %v3790_v12  ;;  %v3795_v60 = vadd.f32 %v6267_v8, %v3469_v47  ;;  %4365 = vst.msk [vmem:[#allocation2 + $0x10] sm:$0xff] %vm256_vm7, %v4333_v20  ;;  %v4331_v44 = vadd.f32 %v4204_v45, %v4037_v48  ;;  %v4047_v8 = vld [vmem:[#allocation2 + $0x50] sm:$0xff]  ;;  %v4046_v48 = vld [vmem:[#allocation2 + $0x48] sm:$0xff] }
 0x1b6   : > { %v3467_v25 = vld [vmem:[#allocation2 + $0xe0] sm:$0xff]  ;;  %v6274_v40 = vpop.f32.mrf.mxu1  ;;  %v4770_v2 = vpop.f32.mrf.mxu0 }
 0x1b7   : > { %3827 = vst.msk [vmem:[#allocation2 + $0xf0] sm:$0xff] %vm256_vm7, %v3795_v60  ;;  %v3793_v26 = vadd.f32 %v3750_v11, %v3467_v25  ;;  %4363 = vst.msk [vmem:[#allocation2] sm:$0xff] %vm256_vm7, %v4331_v44  ;;  %v4334_v58 = vadd.f32 %v6274_v40, %v4040_v34 }
 0x1b8   : > { %v3470_v42 = vld [vmem:[#allocation2 + $0xf8] sm:$0xff]  ;;  %v4207_v18 = vpop.f32.mrf.mxu1  ;;  %v6308_v54 = vpop.f32.mrf.mxu0 }
 0x1b9   : > { %3825 = vst.msk [vmem:[#allocation2 + $0xe0] sm:$0xff] %vm256_vm7, %v3793_v26  ;;  %v3796_v15 = vadd.f32 %v6268_v53, %v3470_v42  ;;  %4366 = vst.msk [vmem:[#allocation2 + $0x18] sm:$0xff] %vm256_vm7, %v4334_v58  ;;  %v4332_v7 = vadd.f32 %v4207_v18, %v4038_v37  ;;  %v4051_v26 = vld [vmem:[#allocation2 + $0x70] sm:$0xff] }
 0x1ba   : > { %v3468_v1 = vld [vmem:[#allocation2 + $0xe8] sm:$0xff]  ;;  %v6277_v39 = vpop.f32.mrf.mxu1  ;;  %v4773_v22 = vpop.f32.mrf.mxu0 }
 0x1bb   : > { %3828 = vst.msk [vmem:[#allocation2 + $0xf8] sm:$0xff] %vm256_vm7, %v3796_v15  ;;  %v3794_v32 = vadd.f32 %v3753_v4, %v3468_v1  ;;  %4364 = vst.msk [vmem:[#allocation2 + $0x8] sm:$0xff] %vm256_vm7, %v4332_v7  ;;  %v4337_v38 = vadd.f32 %v6277_v39, %v4043_v24  ;;  %v4049_v24 = vld [vmem:[#allocation2 + $0x60] sm:$0xff] }
 0x1bc   : > { %v4605_v62 = vld [vmem:[#allocation2 + $0x10] sm:$0xff]  ;;  %v4220_v43 = vpop.f32.mrf.mxu1  ;;  %v6311_v13 = vpop.f32.mrf.mxu0 }
 0x1bd   : > { %3826 = vst.msk [vmem:[#allocation2 + $0xe8] sm:$0xff] %vm256_vm7, %v3794_v32  ;;  %v4899_v49 = vadd.f32 %v6307_v5, %v4605_v62  ;;  %4369 = vst.msk [vmem:[#allocation2 + $0x30] sm:$0xff] %vm256_vm7, %v4337_v38  ;;  %v4335_v52 = vadd.f32 %v4220_v43, %v4041_v16 }
 0x1be   : > { %v4603_v28 = vld [vmem:[#allocation2] sm:$0xff]  ;;  %v6278_v36 = vpop.f32.mrf.mxu1  ;;  %v4786_v63 = vpop.f32.mrf.mxu0 }
 0x1bf   : > { %4931 = vst.msk [vmem:[#allocation2 + $0x10] sm:$0xff] %vm256_vm7, %v4899_v49  ;;  %v4897_v33 = vadd.f32 %v4770_v2, %v4603_v28  ;;  %4367 = vst.msk [vmem:[#allocation2 + $0x20] sm:$0xff] %vm256_vm7, %v4335_v52  ;;  %v4338_v29 = vadd.f32 %v6278_v36, %v4044_v10  ;;  %v4052_v49 = vld [vmem:[#allocation2 + $0x78] sm:$0xff] }
 0x1c0   : > { %v4606_v14 = vld [vmem:[#allocation2 + $0x18] sm:$0xff]  ;;  %v4223_v61 = vpop.f32.mrf.mxu1  ;;  %v6312_v51 = vpop.f32.mrf.mxu0 }
 0x1c1   : > { %4929 = vst.msk [vmem:[#allocation2] sm:$0xff] %vm256_vm7, %v4897_v33  ;;  %v4900_v9 = vadd.f32 %v6308_v54, %v4606_v14  ;;  %4370 = vst.msk [vmem:[#allocation2 + $0x38] sm:$0xff] %vm256_vm7, %v4338_v29  ;;  %v4336_v41 = vadd.f32 %v4223_v61, %v4042_v27  ;;  %v4050_v27 = vld [vmem:[#allocation2 + $0x68] sm:$0xff] }
 0x1c2   : > { %v4604_v21 = vld [vmem:[#allocation2 + $0x8] sm:$0xff]  ;;  %v6281_v0 = vpop.f32.mrf.mxu1  ;;  %v4789_v19 = vpop.f32.mrf.mxu0 }
 0x1c3   : > { %4932 = vst.msk [vmem:[#allocation2 + $0x18] sm:$0xff] %vm256_vm7, %v4900_v9  ;;  %v4898_v55 = vadd.f32 %v4773_v22, %v4604_v21  ;;  %4368 = vst.msk [vmem:[#allocation2 + $0x28] sm:$0xff] %vm256_vm7, %v4336_v41  ;;  %v4341_v30 = vadd.f32 %v6281_v0, %v4047_v8 }
 0x1c4   : > { %v4609_v11 = vld [vmem:[#allocation2 + $0x30] sm:$0xff]  ;;  %v4236_v59 = vpop.f32.mrf.mxu1  ;;  %v6315_v23 = vpop.f32.mrf.mxu0 }
 0x1c5   : > { %4930 = vst.msk [vmem:[#allocation2 + $0x8] sm:$0xff] %vm256_vm7, %v4898_v55  ;;  %v4903_v17 = vadd.f32 %v6311_v13, %v4609_v11  ;;  %4373 = vst.msk [vmem:[#allocation2 + $0x50] sm:$0xff] %vm256_vm7, %v4341_v30  ;;  %v4339_v31 = vadd.f32 %v4236_v59, %v4045_v35  ;;  %v4055_v55 = vld [vmem:[#allocation2 + $0x90] sm:$0xff] }
 0x1c6   : > { %v4966_v53 = vld [vmem:[#allocation2 + $0x10] sm:$0xff]  ;;  %v4607_v6 = vld [vmem:[#allocation2 + $0x20] sm:$0xff]  ;;  %v6282_v46 = vpop.f32.mrf.mxu1  ;;  %v4802_v3 = vpop.f32.mrf.mxu0 }
 0x1c7   : > { %v5005_v56 = vadd.f32 %v8380_v50, %v4966_v53  ;;  %4935 = vst.msk [vmem:[#allocation2 + $0x30] sm:$0xff] %vm256_vm7, %v4903_v17  ;;  %v4901_v4 = vadd.f32 %v4786_v63, %v4607_v6  ;;  %4371 = vst.msk [vmem:[#allocation2 + $0x40] sm:$0xff] %vm256_vm7, %v4339_v31  ;;  %v4342_v12 = vadd.f32 %v6282_v46, %v4048_v57  ;;  %v4053_v6 = vld [vmem:[#allocation2 + $0x80] sm:$0xff] }
 0x1c8   : > { %v4964_v20 = vld [vmem:[#allocation2] sm:$0xff]  ;;  %v4610_v47 = vld [vmem:[#allocation2 + $0x38] sm:$0xff]  ;;  %v4239_v45 = vpop.f32.mrf.mxu1  ;;  %v6316_v5 = vpop.f32.mrf.mxu0 }
 0x1c9   : > { %v5037_v60 = vmax.f32 %v5005_v56, 0.0  ;;  %v5003_v44 = vadd.f32 %v8380_v50, %v4964_v20  ;;  %4933 = vst.msk [vmem:[#allocation2 + $0x20] sm:$0xff] %vm256_vm7, %v4901_v4  ;;  %v4904_v25 = vadd.f32 %v6312_v51, %v4610_v47  ;;  %4374 = vst.msk [vmem:[#allocation2 + $0x58] sm:$0xff] %vm256_vm7, %v4342_v12  ;;  %v4340_v34 = vadd.f32 %v4239_v45, %v4046_v48  ;;  %v4056_v48 = vld [vmem:[#allocation2 + $0x98] sm:$0xff] }
 0x1ca   : > { %v4967_v40 = vld [vmem:[#allocation2 + $0x18] sm:$0xff]  ;;  %v4608_v2 = vld [vmem:[#allocation2 + $0x28] sm:$0xff]  ;;  %v6285_v58 = vpop.f32.mrf.mxu1  ;;  %v4805_v42 = vpop.f32.mrf.mxu0 }
 0x1cb   : > { %5069 = vst.msk [vmem:[%s8391_s19 + $0x10] sm:$0xff] %vm256_vm7, %v5037_v60  ;;  %v5035_v37 = vmax.f32 %v5003_v44, 0.0  ;;  %v5006_v18 = vadd.f32 %v8380_v50, %v4967_v40  ;;  %4936 = vst.msk [vmem:[#allocation2 + $0x38] sm:$0xff] %vm256_vm7, %v4904_v25  ;;  %v4902_v54 = vadd.f32 %v4789_v19, %v4608_v2  ;;  %v4345_v15 = vadd.f32 %v6285_v58, %v4051_v26  ;;  %v4054_v26 = vld [vmem:[#allocation2 + $0x88] sm:$0xff] }
 0x1cc   : > { %4372 = vst.msk [vmem:[#allocation2 + $0x48] sm:$0xff] %vm256_vm7, %v4340_v34  ;;  %v4965_v7 = vld [vmem:[#allocation2 + $0x8] sm:$0xff]  ;;  %v4613_v1 = vld [vmem:[#allocation2 + $0x50] sm:$0xff]  ;;  %v4252_v39 = vpop.f32.mrf.mxu1  ;;  %v6319_v22 = vpop.f32.mrf.mxu0 }
 0x1cd   : > { %5067 = vst.msk [vmem:[%s8391_s19] sm:$0xff] %vm256_vm7, %v5035_v37  ;;  %v5038_v32 = vmax.f32 %v5006_v18, 0.0  ;;  %v5004_v38 = vadd.f32 %v8380_v50, %v4965_v7  ;;  %4934 = vst.msk [vmem:[#allocation2 + $0x28] sm:$0xff] %vm256_vm7, %v4902_v54  ;;  %v4907_v62 = vadd.f32 %v6315_v23, %v4613_v1  ;;  %v4343_v16 = vadd.f32 %v4252_v39, %v4049_v24  ;;  %v4059_v24 = vld [vmem:[#allocation2 + $0xb0] sm:$0xff] }
 0x1ce   : > { %4377 = vst.msk [vmem:[#allocation2 + $0x70] sm:$0xff] %vm256_vm7, %v4345_v15  ;;  %v4970_v43 = vld [vmem:[#allocation2 + $0x30] sm:$0xff]  ;;  %v4611_v13 = vld [vmem:[#allocation2 + $0x40] sm:$0xff]  ;;  %v6286_v52 = vpop.f32.mrf.mxu1  ;;  %v4818_v28 = vpop.f32.mrf.mxu0 }
 0x1cf   : > { %5070 = vst.msk [vmem:[%s8391_s19 + $0x18] sm:$0xff] %vm256_vm7, %v5038_v32  ;;  %v5036_v10 = vmax.f32 %v5004_v38, 0.0  ;;  %v5009_v36 = vadd.f32 %v8380_v50, %v4970_v43  ;;  %4939 = vst.msk [vmem:[#allocation2 + $0x50] sm:$0xff] %vm256_vm7, %v4907_v62  ;;  %v4905_v63 = vadd.f32 %v4802_v3, %v4611_v13  ;;  %v4346_v33 = vadd.f32 %v6286_v52, %v4052_v49  ;;  %v4057_v49 = vld [vmem:[#allocation2 + $0xa0] sm:$0xff] }
 0x1d0   : > { %4375 = vst.msk [vmem:[#allocation2 + $0x60] sm:$0xff] %vm256_vm7, %v4343_v16  ;;  %v4968_v29 = vld [vmem:[#allocation2 + $0x20] sm:$0xff]  ;;  %v4614_v14 = vld [vmem:[#allocation2 + $0x58] sm:$0xff]  ;;  %v4255_v61 = vpop.f32.mrf.mxu1  ;;  %v6320_v51 = vpop.f32.mrf.mxu0 }
 0x1d1   : > { %5068 = vst.msk [vmem:[%s8391_s19 + $0x8] sm:$0xff] %vm256_vm7, %v5036_v10  ;;  %v5041_v9 = vmax.f32 %v5009_v36, 0.0  ;;  %v5007_v41 = vadd.f32 %v8380_v50, %v4968_v29  ;;  %4937 = vst.msk [vmem:[#allocation2 + $0x40] sm:$0xff] %vm256_vm7, %v4905_v63  ;;  %v4908_v21 = vadd.f32 %v6316_v5, %v4614_v14  ;;  %v4344_v8 = vadd.f32 %v4255_v61, %v4050_v27  ;;  %v4060_v27 = vld [vmem:[#allocation2 + $0xb8] sm:$0xff] }
 0x1d2   : > { %4378 = vst.msk [vmem:[#allocation2 + $0x78] sm:$0xff] %vm256_vm7, %v4346_v33  ;;  %v4971_v0 = vld [vmem:[#allocation2 + $0x38] sm:$0xff]  ;;  %v6289_v30 = vpop.f32.mrf.mxu1  ;;  %v4821_v11 = vpop.f32.mrf.mxu0 }
 0x1d3   : > { %v4612_v19 = vld [vmem:[#allocation2 + $0x48] sm:$0xff]  ;;  %5073 = vst.msk [vmem:[%s8391_s19 + $0x30] sm:$0xff] %vm256_vm7, %v5041_v9  ;;  %v5039_v35 = vmax.f32 %v5007_v41, 0.0  ;;  %v5010_v59 = vadd.f32 %v8380_v50, %v4971_v0  ;;  %4940 = vst.msk [vmem:[#allocation2 + $0x58] sm:$0xff] %vm256_vm7, %v4908_v21  ;;  %v4349_v17 = vadd.f32 %v6289_v30, %v4055_v55 }
 0x1d4   : > { %v4906_v23 = vadd.f32 %v4805_v42, %v4612_v19  ;;  %4376 = vst.msk [vmem:[#allocation2 + $0x68] sm:$0xff] %vm256_vm7, %v4344_v8  ;;  %v4969_v31 = vld [vmem:[#allocation2 + $0x28] sm:$0xff]  ;;  %v4268_v57 = vpop.f32.mrf.mxu1  ;;  %v6323_v46 = vpop.f32.mrf.mxu0 }
 0x1d5   : > { %v4617_v53 = vld [vmem:[#allocation2 + $0x70] sm:$0xff]  ;;  %5071 = vst.msk [vmem:[%s8391_s19 + $0x20] sm:$0xff] %vm256_vm7, %v5039_v35  ;;  %v5042_v3 = vmax.f32 %v5010_v59, 0.0  ;;  %v5008_v56 = vadd.f32 %v8380_v50, %v4969_v31  ;;  %4381 = vst.msk [vmem:[#allocation2 + $0x90] sm:$0xff] %vm256_vm7, %v4349_v17  ;;  %v4347_v12 = vadd.f32 %v4268_v57, %v4053_v6  ;;  %v4058_v55 = vld [vmem:[#allocation2 + $0xa8] sm:$0xff] }
 0x1d6   : > { %4938 = vst.msk [vmem:[#allocation2 + $0x48] sm:$0xff] %vm256_vm7, %v4906_v23  ;;  %v4911_v4 = vadd.f32 %v6319_v22, %v4617_v53  ;;  %v4974_v20 = vld [vmem:[#allocation2 + $0x50] sm:$0xff]  ;;  %v6290_v45 = vpop.f32.mrf.mxu1  ;;  %v4834_v5 = vpop.f32.mrf.mxu0 }
 0x1d7   : > { %v4615_v47 = vld [vmem:[#allocation2 + $0x60] sm:$0xff]  ;;  %5074 = vst.msk [vmem:[%s8391_s19 + $0x38] sm:$0xff] %vm256_vm7, %v5042_v3  ;;  %v5040_v60 = vmax.f32 %v5008_v56, 0.0  ;;  %v5013_v44 = vadd.f32 %v8380_v50, %v4974_v20  ;;  %4379 = vst.msk [vmem:[#allocation2 + $0x80] sm:$0xff] %vm256_vm7, %v4347_v12  ;;  %v4350_v34 = vadd.f32 %v6290_v45, %v4056_v48  ;;  %v4063_v6 = vld [vmem:[#allocation2 + $0xd0] sm:$0xff] }
 0x1d8   : > { %4943 = vst.msk [vmem:[#allocation2 + $0x70] sm:$0xff] %vm256_vm7, %v4911_v4  ;;  %v4909_v25 = vadd.f32 %v4818_v28, %v4615_v47  ;;  %v4972_v40 = vld [vmem:[#allocation2 + $0x40] sm:$0xff]  ;;  %v4271_v58 = vpop.f32.mrf.mxu1  ;;  %v6324_v42 = vpop.f32.mrf.mxu0 }
 0x1d9   : > { %v4618_v2 = vld [vmem:[#allocation2 + $0x78] sm:$0xff]  ;;  %5072 = vst.msk [vmem:[%s8391_s19 + $0x28] sm:$0xff] %vm256_vm7, %v5040_v60  ;;  %v5045_v37 = vmax.f32 %v5013_v44, 0.0  ;;  %v5011_v18 = vadd.f32 %v8380_v50, %v4972_v40  ;;  %4382 = vst.msk [vmem:[#allocation2 + $0x98] sm:$0xff] %vm256_vm7, %v4350_v34  ;;  %v4348_v15 = vadd.f32 %v4271_v58, %v4054_v26  ;;  %v4061_v48 = vld [vmem:[#allocation2 + $0xc0] sm:$0xff] }
 0x1da   : > { %4941 = vst.msk [vmem:[#allocation2 + $0x60] sm:$0xff] %vm256_vm7, %v4909_v25  ;;  %v4912_v54 = vadd.f32 %v6320_v51, %v4618_v2  ;;  %v4975_v7 = vld [vmem:[#allocation2 + $0x58] sm:$0xff]  ;;  %v6293_v39 = vpop.f32.mrf.mxu1  ;;  %v4837_v22 = vpop.f32.mrf.mxu0 }
 0x1db   : > { %v4616_v1 = vld [vmem:[#allocation2 + $0x68] sm:$0xff]  ;;  %5077 = vst.msk [vmem:[%s8391_s19 + $0x50] sm:$0xff] %vm256_vm7, %v5045_v37  ;;  %v5043_v32 = vmax.f32 %v5011_v18, 0.0  ;;  %v5014_v38 = vadd.f32 %v8380_v50, %v4975_v7  ;;  %4380 = vst.msk [vmem:[#allocation2 + $0x88] sm:$0xff] %vm256_vm7, %v4348_v15  ;;  %v4353_v16 = vadd.f32 %v6293_v39, %v4059_v24  ;;  %v4064_v26 = vld [vmem:[#allocation2 + $0xd8] sm:$0xff] }
 0x1dc   : > { %4944 = vst.msk [vmem:[#allocation2 + $0x78] sm:$0xff] %vm256_vm7, %v4912_v54  ;;  %v4910_v62 = vadd.f32 %v4821_v11, %v4616_v1  ;;  %v4621_v13 = vld [vmem:[#allocation2 + $0x90] sm:$0xff]  ;;  %v4284_v52 = vpop.f32.mrf.mxu1  ;;  %v6327_v28 = vpop.f32.mrf.mxu0  ;;  %v4062_v24 = vld [vmem:[#allocation2 + $0xc8] sm:$0xff] }
 0x1dd   : > { %v4973_v43 = vld [vmem:[#allocation2 + $0x48] sm:$0xff]  ;;  %5075 = vst.msk [vmem:[%s8391_s19 + $0x40] sm:$0xff] %vm256_vm7, %v5043_v32  ;;  %v5046_v10 = vmax.f32 %v5014_v38, 0.0  ;;  %v4915_v63 = vadd.f32 %v6323_v46, %v4621_v13  ;;  %4385 = vst.msk [vmem:[#allocation2 + $0xb0] sm:$0xff] %vm256_vm7, %v4353_v16  ;;  %v4351_v33 = vadd.f32 %v4284_v52, %v4057_v49  ;;  %v4067_v49 = vld [vmem:[#allocation2 + $0xf0] sm:$0xff] }
 0x1de   : > { %v5012_v36 = vadd.f32 %v8380_v50, %v4973_v43  ;;  %4942 = vst.msk [vmem:[#allocation2 + $0x68] sm:$0xff] %vm256_vm7, %v4910_v62  ;;  %v4619_v14 = vld [vmem:[#allocation2 + $0x80] sm:$0xff]  ;;  %v6294_v61 = vpop.f32.mrf.mxu1  ;;  %v4850_v51 = vpop.f32.mrf.mxu0 }
 0x1df   : > { %v4978_v29 = vld [vmem:[#allocation2 + $0x70] sm:$0xff]  ;;  %5078 = vst.msk [vmem:[%s8391_s19 + $0x58] sm:$0xff] %vm256_vm7, %v5046_v10  ;;  %4947 = vst.msk [vmem:[#allocation2 + $0x90] sm:$0xff] %vm256_vm7, %v4915_v63  ;;  %v4913_v21 = vadd.f32 %v4834_v5, %v4619_v14  ;;  %v4354_v8 = vadd.f32 %v6294_v61, %v4060_v27  ;;  %v4065_v27 = vld [vmem:[#allocation2 + $0xe0] sm:$0xff] }
 0x1e0   : > { %v5044_v9 = vmax.f32 %v5012_v36, 0.0  ;;  %v5017_v41 = vadd.f32 %v8380_v50, %v4978_v29  ;;  %4383 = vst.msk [vmem:[#allocation2 + $0xa0] sm:$0xff] %vm256_vm7, %v4351_v33  ;;  %v4622_v19 = vld [vmem:[#allocation2 + $0x98] sm:$0xff]  ;;  %v4287_v30 = vpop.f32.mrf.mxu1  ;;  %v6328_v11 = vpop.f32.mrf.mxu0 }
 0x1e1   : > { %v4976_v0 = vld [vmem:[#allocation2 + $0x60] sm:$0xff]  ;;  %4945 = vst.msk [vmem:[#allocation2 + $0x80] sm:$0xff] %vm256_vm7, %v4913_v21  ;;  %v4916_v23 = vadd.f32 %v6324_v42, %v4622_v19  ;;  %4386 = vst.msk [vmem:[#allocation2 + $0xb8] sm:$0xff] %vm256_vm7, %v4354_v8  ;;  %v4352_v17 = vadd.f32 %v4287_v30, %v4058_v55  ;;  %v4068_v19 = vld [vmem:[#allocation2 + $0xf8] sm:$0xff] }
 0x1e2   : > { %5076 = vst.msk [vmem:[%s8391_s19 + $0x48] sm:$0xff] %vm256_vm7, %v5044_v9  ;;  %v5049_v35 = vmax.f32 %v5017_v41, 0.0  ;;  %v5015_v59 = vadd.f32 %v8380_v50, %v4976_v0  ;;  %v4620_v53 = vld [vmem:[#allocation2 + $0x88] sm:$0xff]  ;;  %v6297_v57 = vpop.f32.mrf.mxu1  ;;  %v4853_v46 = vpop.f32.mrf.mxu0 }
 0x1e3   : > { %v4979_v31 = vld [vmem:[#allocation2 + $0x78] sm:$0xff]  ;;  %4948 = vst.msk [vmem:[#allocation2 + $0x98] sm:$0xff] %vm256_vm7, %v4916_v23  ;;  %v4914_v4 = vadd.f32 %v4837_v22, %v4620_v53  ;;  %4384 = vst.msk [vmem:[#allocation2 + $0xa8] sm:$0xff] %vm256_vm7, %v4352_v17  ;;  %v4357_v12 = vadd.f32 %v6297_v57, %v4063_v6  ;;  %v4066_v53 = vld [vmem:[#allocation2 + $0xe8] sm:$0xff] }
 0x1e4   : > { %5081 = vst.msk [vmem:[%s8391_s19 + $0x70] sm:$0xff] %vm256_vm7, %v5049_v35  ;;  %v5047_v3 = vmax.f32 %v5015_v59, 0.0  ;;  %v5018_v56 = vadd.f32 %v8380_v50, %v4979_v31  ;;  %v4625_v47 = vld [vmem:[#allocation2 + $0xb0] sm:$0xff]  ;;  %v4300_v45 = vpop.f32.mrf.mxu1  ;;  %v6331_v5 = vpop.f32.mrf.mxu0 }
 0x1e5   : > { %v4977_v20 = vld [vmem:[#allocation2 + $0x68] sm:$0xff]  ;;  %4946 = vst.msk [vmem:[#allocation2 + $0x88] sm:$0xff] %vm256_vm7, %v4914_v4  ;;  %v4919_v25 = vadd.f32 %v6327_v28, %v4625_v47  ;;  %4389 = vst.msk [vmem:[#allocation2 + $0xd0] sm:$0xff] %vm256_vm7, %v4357_v12  ;;  %v4355_v34 = vadd.f32 %v4300_v45, %v4061_v48 }
 0x1e6   : > { %5079 = vst.msk [vmem:[%s8391_s19 + $0x60] sm:$0xff] %vm256_vm7, %v5047_v3  ;;  %v5050_v60 = vmax.f32 %v5018_v56, 0.0  ;;  %v5016_v44 = vadd.f32 %v8380_v50, %v4977_v20  ;;  %v4982_v40 = vld [vmem:[#allocation2 + $0x90] sm:$0xff]  ;;  %v6298_v58 = vpop.f32.mrf.mxu1  ;;  %v4866_v42 = vpop.f32.mrf.mxu0 }
 0x1e7   : > { %v4623_v2 = vld [vmem:[#allocation2 + $0xa0] sm:$0xff]  ;;  %v5021_v18 = vadd.f32 %v8380_v50, %v4982_v40  ;;  %4951 = vst.msk [vmem:[#allocation2 + $0xb0] sm:$0xff] %vm256_vm7, %v4919_v25  ;;  %4387 = vst.msk [vmem:[#allocation2 + $0xc0] sm:$0xff] %vm256_vm7, %v4355_v34  ;;  %v4358_v15 = vadd.f32 %v6298_v58, %v4064_v26 }
 0x1e8   : > { %5082 = vst.msk [vmem:[%s8391_s19 + $0x78] sm:$0xff] %vm256_vm7, %v5050_v60  ;;  %v5048_v37 = vmax.f32 %v5016_v44, 0.0  ;;  %v4917_v54 = vadd.f32 %v4850_v51, %v4623_v2  ;;  %v4980_v7 = vld [vmem:[#allocation2 + $0x80] sm:$0xff]  ;;  %v4626_v1 = vld [vmem:[#allocation2 + $0xb8] sm:$0xff]  ;;  %v4303_v39 = vpop.f32.mrf.mxu1  ;;  %v6332_v22 = vpop.f32.mrf.mxu0 }
 0x1e9   : > { %v5053_v32 = vmax.f32 %v5021_v18, 0.0  ;;  %v5019_v38 = vadd.f32 %v8380_v50, %v4980_v7  ;;  %v4920_v62 = vadd.f32 %v6328_v11, %v4626_v1  ;;  %4390 = vst.msk [vmem:[#allocation2 + $0xd8] sm:$0xff] %vm256_vm7, %v4358_v15  ;;  %v4356_v16 = vadd.f32 %v4303_v39, %v4062_v24 }
 0x1ea   : > { %5080 = vst.msk [vmem:[%s8391_s19 + $0x68] sm:$0xff] %vm256_vm7, %v5048_v37  ;;  %4949 = vst.msk [vmem:[#allocation2 + $0xa0] sm:$0xff] %vm256_vm7, %v4917_v54  ;;  %v4983_v43 = vld [vmem:[#allocation2 + $0x98] sm:$0xff]  ;;  %v4624_v13 = vld [vmem:[#allocation2 + $0xa8] sm:$0xff]  ;;  %v6301_v52 = vpop.f32.mrf.mxu1  ;;  %v4869_v28 = vpop.f32.mrf.mxu0 }
 0x1eb   : > { %5085 = vst.msk [vmem:[%s8391_s19 + $0x90] sm:$0xff] %vm256_vm7, %v5053_v32  ;;  %v5051_v10 = vmax.f32 %v5019_v38, 0.0  ;;  %v5022_v36 = vadd.f32 %v8380_v50, %v4983_v43  ;;  %4952 = vst.msk [vmem:[#allocation2 + $0xb8] sm:$0xff] %vm256_vm7, %v4920_v62  ;;  %v4918_v63 = vadd.f32 %v4853_v46, %v4624_v13  ;;  %v4361_v33 = vadd.f32 %v6301_v52, %v4067_v49 }
 0x1ec   : > { %4388 = vst.msk [vmem:[#allocation2 + $0xc8] sm:$0xff] %vm256_vm7, %v4356_v16  ;;  %v4981_v29 = vld [vmem:[#allocation2 + $0x88] sm:$0xff]  ;;  %v4629_v14 = vld [vmem:[#allocation2 + $0xd0] sm:$0xff]  ;;  %v4316_v61 = vpop.f32.mrf.mxu1  ;;  %v6335_v30 = vpop.f32.mrf.mxu0 }
 0x1ed   : > { %5083 = vst.msk [vmem:[%s8391_s19 + $0x80] sm:$0xff] %vm256_vm7, %v5051_v10  ;;  %v5054_v51 = vmax.f32 %v5022_v36, 0.0  ;;  %v5020_v9 = vadd.f32 %v8380_v50, %v4981_v29  ;;  %4950 = vst.msk [vmem:[#allocation2 + $0xa8] sm:$0xff] %vm256_vm7, %v4918_v63  ;;  %v4923_v41 = vadd.f32 %v6331_v5, %v4629_v14  ;;  %v4359_v21 = vadd.f32 %v4316_v61, %v4065_v27 }
 0x1ee   : > { %4393 = vst.msk [vmem:[#allocation2 + $0xf0] sm:$0xff] %vm256_vm7, %v4361_v33  ;;  %v4986_v8 = vld [vmem:[#allocation2 + $0xb0] sm:$0xff]  ;;  %v4627_v0 = vld [vmem:[#allocation2 + $0xc0] sm:$0xff]  ;;  %v6302_v55 = vpop.f32.mrf.mxu1  ;;  %v4882_v20 = vpop.f32.mrf.mxu0 }
 0x1ef   : > { %5086 = vst.msk [vmem:[%s8391_s19 + $0x98] sm:$0xff] %vm256_vm7, %v5054_v51  ;;  %v5052_v11 = vmax.f32 %v5020_v9, 0.0  ;;  %v5025_v35 = vadd.f32 %v8380_v50, %v4986_v8  ;;  %4955 = vst.msk [vmem:[#allocation2 + $0xd0] sm:$0xff] %vm256_vm7, %v4923_v41  ;;  %v4921_v59 = vadd.f32 %v4866_v42, %v4627_v0  ;;  %v4362_v23 = vadd.f32 %v6302_v55, %v4068_v19 }
 0x1f0   : > { %4391 = vst.msk [vmem:[#allocation2 + $0xe0] sm:$0xff] %vm256_vm7, %v4359_v21  ;;  %v4630_v31 = vld [vmem:[#allocation2 + $0xd8] sm:$0xff]  ;;  %v4319_v6 = vpop.f32.mrf.mxu1  ;;  %v6336_v26 = vpop.f32.mrf.mxu0 }
 0x1f1   : > { %v4984_v17 = vld [vmem:[#allocation2 + $0xa0] sm:$0xff]  ;;  %5084 = vst.msk [vmem:[%s8391_s19 + $0x88] sm:$0xff] %vm256_vm7, %v5052_v11  ;;  %v5057_v57 = vmax.f32 %v5025_v35, 0.0  ;;  %4953 = vst.msk [vmem:[#allocation2 + $0xc0] sm:$0xff] %vm256_vm7, %v4921_v59  ;;  %v4924_v3 = vadd.f32 %v6332_v22, %v4630_v31  ;;  %v4360_v56 = vadd.f32 %v4319_v6, %v4066_v53 }
 0x1f2   : > { %v5023_v46 = vadd.f32 %v8380_v50, %v4984_v17  ;;  %4394 = vst.msk [vmem:[#allocation2 + $0xf8] sm:$0xff] %vm256_vm7, %v4362_v23  ;;  %v4987_v4 = vld [vmem:[#allocation2 + $0xb8] sm:$0xff]  ;;  %v4885_v22 = vpop.f32.mrf.mxu0 }
 0x1f3   : > { %v4628_v12 = vld [vmem:[#allocation2 + $0xc8] sm:$0xff]  ;;  %5089 = vst.msk [vmem:[%s8391_s19 + $0xb0] sm:$0xff] %vm256_vm7, %v5057_v57  ;;  %v5026_v48 = vadd.f32 %v8380_v50, %v4987_v4  ;;  %4956 = vst.msk [vmem:[#allocation2 + $0xd8] sm:$0xff] %vm256_vm7, %v4924_v3 }
 0x1f4   : > { %v5055_v47 = vmax.f32 %v5023_v46, 0.0  ;;  %v4922_v45 = vadd.f32 %v4869_v28, %v4628_v12  ;;  %4392 = vst.msk [vmem:[#allocation2 + $0xe8] sm:$0xff] %vm256_vm7, %v4360_v56  ;;  %v4985_v5 = vld [vmem:[#allocation2 + $0xa8] sm:$0xff] }
 0x1f5   : > { %v4633_v60 = vld [vmem:[#allocation2 + $0xf0] sm:$0xff]  ;;  %v5058_v44 = vmax.f32 %v5026_v48, 0.0  ;;  %v5024_v25 = vadd.f32 %v8380_v50, %v4985_v5 }
 0x1f6   : > { %5087 = vst.msk [vmem:[%s8391_s19 + $0xa0] sm:$0xff] %vm256_vm7, %v5055_v47  ;;  %4954 = vst.msk [vmem:[#allocation2 + $0xc8] sm:$0xff] %vm256_vm7, %v4922_v45  ;;  %v4927_v34 = vadd.f32 %v6335_v30, %v4633_v60  ;;  %v4990_v40 = vld [vmem:[#allocation2 + $0xd0] sm:$0xff] }
 0x1f7   : > { %v4631_v2 = vld [vmem:[#allocation2 + $0xe0] sm:$0xff]  ;;  %5090 = vst.msk [vmem:[%s8391_s19 + $0xb8] sm:$0xff] %vm256_vm7, %v5058_v44  ;;  %v5056_v58 = vmax.f32 %v5024_v25, 0.0  ;;  %v5029_v42 = vadd.f32 %v8380_v50, %v4990_v40 }
 0x1f8   : > { %4959 = vst.msk [vmem:[#allocation2 + $0xf0] sm:$0xff] %vm256_vm7, %v4927_v34  ;;  %v4925_v37 = vadd.f32 %v4882_v20, %v4631_v2  ;;  %v4988_v18 = vld [vmem:[#allocation2 + $0xc0] sm:$0xff] }
 0x1f9   : > { %v4634_v54 = vld [vmem:[#allocation2 + $0xf8] sm:$0xff]  ;;  %5088 = vst.msk [vmem:[%s8391_s19 + $0xa8] sm:$0xff] %vm256_vm7, %v5056_v58  ;;  %v5061_v15 = vmax.f32 %v5029_v42, 0.0  ;;  %v5027_v7 = vadd.f32 %v8380_v50, %v4988_v18 }
 0x1fa   : > { %4957 = vst.msk [vmem:[#allocation2 + $0xe0] sm:$0xff] %vm256_vm7, %v4925_v37  ;;  %v4928_v1 = vadd.f32 %v6336_v26, %v4634_v54  ;;  %v4991_v24 = vld [vmem:[#allocation2 + $0xd8] sm:$0xff] }
 0x1fb   : > { %v4632_v39 = vld [vmem:[#allocation2 + $0xe8] sm:$0xff]  ;;  %5093 = vst.msk [vmem:[%s8391_s19 + $0xd0] sm:$0xff] %vm256_vm7, %v5061_v15  ;;  %v5059_v32 = vmax.f32 %v5027_v7, 0.0  ;;  %v5030_v38 = vadd.f32 %v8380_v50, %v4991_v24 }
 0x1fc   : > { %4960 = vst.msk [vmem:[#allocation2 + $0xf8] sm:$0xff] %vm256_vm7, %v4928_v1  ;;  %v4926_v62 = vadd.f32 %v4885_v22, %v4632_v39 }
 0x1fd   : > { %v4989_v16 = vld [vmem:[#allocation2 + $0xc8] sm:$0xff]  ;;  %5091 = vst.msk [vmem:[%s8391_s19 + $0xc0] sm:$0xff] %vm256_vm7, %v5059_v32  ;;  %v5062_v43 = vmax.f32 %v5030_v38, 0.0 }
 0x1fe   : > { %v5028_v13 = vadd.f32 %v8380_v50, %v4989_v16  ;;  %4958 = vst.msk [vmem:[#allocation2 + $0xe8] sm:$0xff] %vm256_vm7, %v4926_v62 }
 0x1ff   : > { %v4994_v49 = vld [vmem:[#allocation2 + $0xf0] sm:$0xff]  ;;  %5094 = vst.msk [vmem:[%s8391_s19 + $0xd8] sm:$0xff] %vm256_vm7, %v5062_v43 }
 0x200   : > { %v5060_v52 = vmax.f32 %v5028_v13, 0.0  ;;  %v5033_v28 = vadd.f32 %v8380_v50, %v4994_v49 }
 0x201   : > { %v4992_v10 = vld [vmem:[#allocation2 + $0xe0] sm:$0xff] }
 0x202   : > { %5092 = vst.msk [vmem:[%s8391_s19 + $0xc8] sm:$0xff] %vm256_vm7, %v5060_v52  ;;  %v5065_v36 = vmax.f32 %v5033_v28, 0.0  ;;  %v5031_v63 = vadd.f32 %v8380_v50, %v4992_v10 }
 0x203   : > { %v4995_v33 = vld [vmem:[#allocation2 + $0xf8] sm:$0xff] }
 0x204   : > { %5097 = vst.msk [vmem:[%s8391_s19 + $0xf0] sm:$0xff] %vm256_vm7, %v5065_v36  ;;  %v5063_v29 = vmax.f32 %v5031_v63, 0.0  ;;  %v5034_v14 = vadd.f32 %v8380_v50, %v4995_v33 }
 0x205   : > { %v4993_v27 = vld [vmem:[#allocation2 + $0xe8] sm:$0xff] }
 0x206   : > { %5095 = vst.msk [vmem:[%s8391_s19 + $0xe0] sm:$0xff] %vm256_vm7, %v5063_v29  ;;  %v5066_v61 = vmax.f32 %v5034_v14, 0.0  ;;  %v5032_v51 = vadd.f32 %v8380_v50, %v4993_v27 }
 0x208   : > { %5098 = vst.msk [vmem:[%s8391_s19 + $0xf8] sm:$0xff] %vm256_vm7, %v5066_v61  ;;  %v5064_v9 = vmax.f32 %v5032_v51, 0.0 }
 0x20a   : > { %5096 = vst.msk [vmem:[%s8391_s19 + $0xe8] sm:$0xff] %vm256_vm7, %v5064_v9 }
 0x20b PF: > { %s13_s14 = sadd.s32 1, %s6445_s14   ;;  %s8554_s12 = smov %s6441_s13 }
 0x20c   : > { %p10_p5 = scmp.ge.s32.totalorder %s13_s14, 4   ;;  %s8555_s13 = smov %s8557_s15 }
 0x20e   :  { %12 = sbr.rel (!%p10_p5) target bundleno = 2 (0x2), region = 86 }

</bundles_post_ra>
